<compile_context>
chip_gen: v7x
topology: tpu7x:2x2x1
jax: 0.10.0
libtpu: 0.0.40
codegen_flags: <defaults>
</compile_context>

<pallas_src>
import functools

import jax
import jax.numpy as jnp
import numpy as np
from jax.experimental import pallas as pl
from jax.experimental.pallas import tpu as pltpu

_TM = 512                        # max row tile
_TK = 2048                       # max K tile when the contraction axis must be split
_TS = 1024                       # row tile of the scale/shift/ReLU epilogue pass
_K_SINGLE_MAX = 4608             # single-K-tile threshold (covers 9*512 bottleneck)
_MIN_TM_SPLIT = 256              # force >=2 M blocks (v7x megacore) when tiles stay >= this
_VMEM_LIMIT = 48 * 1024 * 1024   # explicit scoped-VMEM budget (< v7x 64 MiB physical)
_BN_EPS = 1e-5


# ----------------------------- small helpers -------------------------------- #

def _cdiv(a, b):
    return -(-a // b)


def _round_up(x, m):
    return _cdiv(x, m) * m


def _pad2(x, rows, cols):
    pr, pc = rows - x.shape[0], cols - x.shape[1]
    if pr == 0 and pc == 0:
        return x
    return jnp.pad(x, ((0, pr), (0, pc)))


def _divisor_tile(m, cap):
    """Largest multiple of 8 <= cap that divides m exactly (None if m % 8 != 0)."""
    if m % 8:
        return None
    t = min(cap, m)
    t -= t % 8
    while t >= 8 and m % t:
        t -= 8
    return t if t >= 8 else None


# ------------------------------ Pallas kernels ------------------------------ #

def _mm_kernel(*refs, has_bias, emit_stats, act, multi_k, has_prologue,
               prologue_relu):
    """out = act((prologue(A) @ W) + bias); optional per-M-tile channel sum /
    sum-of-squares side output (fused training-mode BatchNorm statistics)."""
    it = iter(refs)
    a_ref = next(it)
    asc_ref = next(it) if has_prologue else None
    ash_ref = next(it) if has_prologue else None
    w_ref = next(it)
    b_ref = next(it) if has_bias else None
    out_ref = next(it)
    stats_ref = next(it) if emit_stats else None
    acc_ref = next(it) if multi_k else None

    def load_a():
        a = a_ref[...]
        if has_prologue:
            # fused BatchNorm scale/shift (+ReLU) of the producer layer, applied
            # per (tap-tiled) column of the raw im2col patches.
            a = a.astype(jnp.float32) * asc_ref[...] + ash_ref[...]
            if prologue_relu:
                a = jnp.maximum(a, 0.0)
            a = a.astype(jnp.bfloat16)
        return a

    def epilogue(acc):
        if emit_stats:
            s = jnp.sum(acc, axis=0, keepdims=True)
            sq = jnp.sum(acc * acc, axis=0, keepdims=True)
            rid = jax.lax.broadcasted_iota(jnp.int32, (8, acc.shape[1]), 0)
            stats_ref[...] = jnp.where(rid == 0, s, jnp.where(rid == 1, sq, 0.0))
        y = acc
        if has_bias:
            y = y + b_ref[...]
        if act == "tanh":
            y = jnp.tanh(y)
        out_ref[...] = y.astype(out_ref.dtype)

    if not multi_k:
        # single full-K tile: no accumulator scratch, no init/finalize branches
        epilogue(jnp.dot(load_a(), w_ref[...], preferred_element_type=jnp.float32))
    else:
        ki = pl.program_id(2)

        @pl.when(ki == 0)
        def _():
            acc_ref[...] = jnp.zeros_like(acc_ref)

        acc_ref[...] += jnp.dot(load_a(), w_ref[...],
                                preferred_element_type=jnp.float32)

        @pl.when(ki == pl.num_programs(2) - 1)
        def _():
            epilogue(acc_ref[...])


def _bn_act_kernel(*refs, relu, has_res):
    """y*scale + shift (+ residual) (+ ReLU) in f32, gridded over M tiles."""
    y_ref, s_ref, b_ref = refs[0], refs[1], refs[2]
    r_ref = refs[3] if has_res else None
    out_ref = refs[-1]
    y = y_ref[...].astype(jnp.float32) * s_ref[...] + b_ref[...]
    if has_res:
        y = y + r_ref[...].astype(jnp.float32)
    if relu:
        y = jnp.maximum(y, 0.0)
    out_ref[...] = y.astype(out_ref.dtype)


# ------------------------------ kernel wrappers ------------------------------ #

def pallas_matmul(a, w, *, bias=None, bias_is_row=False, act="none",
                  emit_stats=False, a_scale=None, a_shift=None, a_relu=True,
                  out_dtype=jnp.bfloat16, tn=None, tm=None):
    """Tiled bf16 MXU matmul  out = act(prologue(a) @ w + bias)  with an optional
    per-M-tile channel-statistics side output (fused BatchNorm statistics)."""
    m_, k_ = a.shape
    kw_, n_ = w.shape
    assert k_ == kw_

    # --- N (channel) tiling: untiled when emitting BN statistics ---
    if tn is None or tn >= n_:
        tn_ = n_
    else:
        assert tn % 128 == 0
        tn_ = tn
    np_ = _round_up(n_, tn_)
    gn = np_ // tn_
    assert not (emit_stats and gn != 1), "BN stats need an untiled channel axis"

    # --- M tiling (sized to m_, split for the 2nd v7x TensorCore when possible) ---
    if tm is not None:
        assert tm % 8 == 0
        tm_ = tm
        mp = _round_up(m_, tm_)
    else:
        nt = max(1, _cdiv(m_, _TM))
        if nt == 1 and gn == 1 and m_ >= 2 * _MIN_TM_SPLIT:
            nt = 2
        tm_ = _round_up(_cdiv(m_, nt), 8)
        mp = nt * tm_
    gm = mp // tm_

    # --- K tiling: single full-K tile (no zero K padding) whenever it fits VMEM ---
    multi_k = k_ > _K_SINGLE_MAX
    if not multi_k:
        kp = k_
        tk = k_
    else:
        kp = _round_up(k_, 128)
        tk = _TK
        while kp % tk:
            tk -= 128
    gk = kp // tk

    a = _pad2(a, mp, kp).astype(jnp.bfloat16)
    w = _pad2(w, kp, np_).astype(jnp.bfloat16)

    has_prologue = a_scale is not None
    has_bias = bias is not None

    inputs = [a]
    if multi_k:
        in_specs = [pl.BlockSpec((tm_, tk), lambda mi, ni, ki: (mi, ki))]
    else:
        in_specs = [pl.BlockSpec((tm_, tk), lambda mi, ni: (mi, 0))]

    if has_prologue:
        sc = _pad2(a_scale.reshape(1, -1).astype(jnp.float32), 1, kp)
        sh = _pad2(a_shift.reshape(1, -1).astype(jnp.float32), 1, kp)
        inputs += [sc, sh]
        if multi_k:
            pspec = pl.BlockSpec((1, tk), lambda mi, ni, ki: (0, ki))
        else:
            pspec = pl.BlockSpec((1, tk), lambda mi, ni: (0, 0))
        in_specs += [pspec, pspec]

    inputs.append(w)
    in_specs.append(pl.BlockSpec((tk, tn_),
                                 (lambda mi, ni, ki: (ki, ni)) if multi_k
                                 else (lambda mi, ni: (0, ni))))

    if has_bias:
        if bias_is_row:
            inputs.append(_pad2(bias.reshape(-1, 1).astype(jnp.float32), mp, 1))
            bspec = pl.BlockSpec((tm_, 1), (lambda mi, ni, ki: (mi, 0)) if multi_k
                                 else (lambda mi, ni: (mi, 0)))
        else:
            inputs.append(_pad2(bias.reshape(1, -1).astype(jnp.float32), 1, np_))
            bspec = pl.BlockSpec((1, tn_), (lambda mi, ni, ki: (0, ni)) if multi_k
                                 else (lambda mi, ni: (0, ni)))
        in_specs.append(bspec)

    out_shape = [jax.ShapeDtypeStruct((mp, np_), out_dtype)]
    out_specs = [pl.BlockSpec((tm_, tn_), (lambda mi, ni, ki: (mi, ni)) if multi_k
                              else (lambda mi, ni: (mi, ni)))]
    if emit_stats:
        out_shape.append(jax.ShapeDtypeStruct((gm * 8, np_), jnp.float32))
        out_specs.append(pl.BlockSpec((8, tn_), (lambda mi, ni, ki: (mi, 0)) if multi_k
                                      else (lambda mi, ni: (mi, 0))))

    grid = (gm, gn, gk) if multi_k else (gm, gn)
    sem = (("parallel", "parallel", "arbitrary") if multi_k
           else ("parallel", "parallel"))
    scratch = [pltpu.VMEM((tm_, tn_), jnp.float32)] if multi_k else []

    outs = pl.pallas_call(
        functools.partial(_mm_kernel, has_bias=has_bias, emit_stats=emit_stats,
                          act=act, multi_k=multi_k, has_prologue=has_prologue,
                          prologue_relu=a_relu),
        grid=grid,
        in_specs=in_specs,
        out_specs=out_specs if emit_stats else out_specs[0],
        out_shape=out_shape if emit_stats else out_shape[0],
        scratch_shapes=scratch,
        compiler_params=pltpu.CompilerParams(
            dimension_semantics=sem, vmem_limit_bytes=_VMEM_LIMIT),
    )(*inputs)
    return outs


def pallas_scale_shift_act(y, scale, shift, *, residual=None, relu=True,
                           out_dtype=jnp.bfloat16):
    mp, c = y.shape
    ts = min(_TS, mp)
    ts -= ts % 8
    while mp % ts:
        ts -= 8
    inputs = [y, scale, shift]
    in_specs = [pl.BlockSpec((ts, c), lambda mi: (mi, 0)),
                pl.BlockSpec((1, c), lambda mi: (0, 0)),
                pl.BlockSpec((1, c), lambda mi: (0, 0))]
    has_res = residual is not None
    if has_res:
        inputs.append(residual)
        in_specs.append(pl.BlockSpec((ts, c), lambda mi: (mi, 0)))
    return pl.pallas_call(
        functools.partial(_bn_act_kernel, relu=relu, has_res=has_res),
        grid=(mp // ts,),
        in_specs=in_specs,
        out_specs=pl.BlockSpec((ts, c), lambda mi: (mi, 0)),
        out_shape=jax.ShapeDtypeStruct((mp, c), out_dtype),
        compiler_params=pltpu.CompilerParams(
            dimension_semantics=("parallel",),
            vmem_limit_bytes=_VMEM_LIMIT),
    )(*inputs)


# -------------------------- conv lowering (JAX glue) ------------------------- #

def _im2col_nhwc(x, k, stride, pad, mode):
    # TODO(synk): fuse this halo gather into the matmul (tap-indexed K grid axis /
    # manual stripe DMA) so the k*k-replicated patch tensor never hits HBM.
    n, h, w, c = x.shape
    if pad:
        x = jnp.pad(x, ((0, 0), (pad, pad), (pad, pad), (0, 0)), mode=mode)
    hp, wp = h + 2 * pad, w + 2 * pad
    ho = (hp - k) // stride + 1
    wo = (wp - k) // stride + 1
    cols = []
    for dy in range(k):
        for dx in range(k):
            cols.append(x[:, dy:dy + stride * ho:stride, dx:dx + stride * wo:stride, :])
    a = jnp.stack(cols, axis=3).reshape(n * ho * wo, k * k * c)
    return a.astype(jnp.bfloat16), (n, ho, wo)


def _im2col_t_reflect(x, k, pad):
    """Channel-major patches^T (k*k*C, N*Ho*Wo) built from a transpose of the small
    feature map (NOT a transpose of the k*k-inflated patch matrix)."""
    n, h, w, c = x.shape
    xp = jnp.pad(x, ((0, 0), (pad, pad), (pad, pad), (0, 0)), mode="reflect")
    xt = jnp.transpose(xp, (3, 0, 1, 2))                  # (C, N, Hp, Wp) - cheap
    cols = [xt[:, :, dy:dy + h, dx:dx + w] for dy in range(k) for dx in range(k)]
    a_t = jnp.stack(cols, axis=0).reshape(k * k * c, n * h * w)
    return a_t.astype(jnp.bfloat16), (n, h, w)


def _conv_w_matrix(w_pt):
    # (Cout, Cin, kh, kw) -> (kh*kw*Cin, Cout); tap-major / channel-minor rows
    return jnp.transpose(w_pt, (2, 3, 1, 0)).reshape(-1, w_pt.shape[0])


def _convT_s2_patches(x):
    # 2x2 input neighbourhood per output super-pixel (zero pad on bottom/right)
    n, h, w, c = x.shape
    xp = jnp.pad(x, ((0, 0), (0, 1), (0, 1), (0, 0)))
    cols = [xp[:, :h, :w, :], xp[:, :h, 1:w + 1, :],
            xp[:, 1:h + 1, :w, :], xp[:, 1:h + 1, 1:w + 1, :]]
    return jnp.stack(cols, axis=3).reshape(n * h * w, 4 * c).astype(jnp.bfloat16)


def _convT_s2_weight(w_pt):
    # ConvTranspose2d(k=3, s=2, p=1, op=1) parity-decomposed combined weight.
    # rows: [x(i,j), x(i,j+1), x(i+1,j), x(i+1,j+1)]; cols: output parity [ee,eo,oe,oo].
    # NOTE: 7 of the 16 (Cin x Cout) blocks are structurally zero; acceptable while
    # the up path is HBM-bound.  TODO(synk): split per parity to skip zero K-blocks
    # when MXU-bound.
    cin, cout = w_pt.shape[0], w_pt.shape[1]
    wk = lambda kh, kw: w_pt[:, :, kh, kw]          # (Cin, Cout)
    z = jnp.zeros((cin, cout), w_pt.dtype)
    rows = [
        jnp.concatenate([wk(1, 1), wk(1, 2), wk(2, 1), wk(2, 2)], axis=1),
        jnp.concatenate([z,        wk(1, 0), z,        wk(2, 0)], axis=1),
        jnp.concatenate([z,        z,        wk(0, 1), wk(0, 2)], axis=1),
        jnp.concatenate([z,        z,        z,        wk(0, 0)], axis=1),
    ]
    return jnp.concatenate(rows, axis=0)            # (4*Cin, 4*Cout)


def _bn_from_stats(stats, count, gamma, beta, groups=1):
    st = stats.reshape(-1, 8, stats.shape[-1])
    s = jnp.sum(st[:, 0, :], axis=0)
    sq = jnp.sum(st[:, 1, :], axis=0)
    if groups > 1:                                   # combine parity-stacked columns
        s = s.reshape(groups, -1).sum(axis=0)
        sq = sq.reshape(groups, -1).sum(axis=0)
    mean = s / count
    var = jnp.maximum(sq / count - mean * mean, 0.0)
    scale = gamma * jax.lax.rsqrt(var + _BN_EPS)
    shift = beta - mean * scale
    if groups > 1:
        scale = jnp.tile(scale, groups)
        shift = jnp.tile(shift, groups)
    return (scale.reshape(1, -1).astype(jnp.float32),
            shift.reshape(1, -1).astype(jnp.float32))


# --------------------------------- layers ------------------------------------ #

def _conv_bn_relu(x, w_mat, gamma, beta, *, k, stride, pad, mode):
    a, (n, ho, wo) = _im2col_nhwc(x, k, stride, pad, mode)
    m = n * ho * wo
    y, stats = pallas_matmul(a, w_mat, emit_stats=True)
    scale, shift = _bn_from_stats(stats, float(m), gamma, beta)
    out = pallas_scale_shift_act(y, scale, shift, relu=True)
    return out[:m].reshape(n, ho, wo, w_mat.shape[1])


def _conv1x1_bias(x, w_mat, b, *, out_dtype=jnp.bfloat16):
    n, h, w, cin = x.shape
    m = n * h * w
    y = pallas_matmul(x.reshape(m, cin), w_mat, bias=b, out_dtype=out_dtype)
    return y[:m, :w_mat.shape[1]].reshape(n, h, w, w_mat.shape[1])


def _resnet_block(x, p):
    n, h, w, c = x.shape
    m = n * h * w
    tm_fit = _divisor_tile(m, _TM)
    if tm_fit is not None:
        # conv1: matmul + batch stats only (no standalone BN pass); BN1 + ReLU are
        # folded into conv2's A-operand prologue (valid: reflect padding commutes
        # with the per-channel affine + ReLU).
        a1, _ = _im2col_nhwc(x, 3, 1, 1, "reflect")
        y1, st1 = pallas_matmul(a1, p["w1"], emit_stats=True, tm=tm_fit)
        sc1, sh1 = _bn_from_stats(st1, float(m), p["g1"], p["b1"])
        a2, _ = _im2col_nhwc(y1.reshape(n, h, w, c), 3, 1, 1, "reflect")
        y2, st2 = pallas_matmul(a2, p["w2"], emit_stats=True, tm=tm_fit,
                                a_scale=jnp.tile(sc1, (1, 9)),
                                a_shift=jnp.tile(sh1, (1, 9)), a_relu=True)
        sc2, sh2 = _bn_from_stats(st2, float(m), p["g2"], p["b2"])
        out = pallas_scale_shift_act(y2, sc2, sh2,
                                     residual=x.reshape(m, c), relu=False)
        return out[:m].reshape(n, h, w, c)

    # fallback (m not tileable without row padding): unfused two-pass BN
    hdn = _conv_bn_relu(x, p["w1"], p["g1"], p["b1"],
                        k=3, stride=1, pad=1, mode="reflect")
    a2, _ = _im2col_nhwc(hdn, 3, 1, 1, "reflect")
    y2, st2 = pallas_matmul(a2, p["w2"], emit_stats=True)
    sc2, sh2 = _bn_from_stats(st2, float(m), p["g2"], p["b2"])
    res = x.reshape(m, c)
    if y2.shape[0] != m:
        res = _pad2(res, y2.shape[0], c)
    out = pallas_scale_shift_act(y2, sc2, sh2, residual=res, relu=False)
    return out[:m].reshape(n, h, w, c)


def _convT_bn_relu(x, w_comb, gamma, beta):
    n, h, w, _ = x.shape
    cout = gamma.shape[0]
    m = n * h * w
    y, stats = pallas_matmul(_convT_s2_patches(x), w_comb, emit_stats=True)
    scale, shift = _bn_from_stats(stats, float(4 * m), gamma, beta, groups=4)
    out = pallas_scale_shift_act(y, scale, shift, relu=True)
    out = out[:m].reshape(n, h, w, 2, 2, cout)
    return jnp.transpose(out, (0, 1, 3, 2, 4, 5)).reshape(n, 2 * h, 2 * w, cout)


def _final_conv_tanh(x, w_t_mat, b):
    # transposed formulation: out^T = W^T @ patches^T, lane-dense over N*H*W;
    # patches^T is built from a channel-major copy of x (no transpose of the
    # 49x-inflated patch matrix).
    a_t, (n, ho, wo) = _im2col_t_reflect(x, 7, 3)
    m = n * ho * wo
    cout = w_t_mat.shape[0]
    o_t = pallas_matmul(w_t_mat, a_t, bias=b, bias_is_row=True, act="tanh",
                        out_dtype=jnp.float32, tn=1024)
    return jnp.transpose(o_t[:cout, :m]).reshape(n, ho, wo, cout)


# ------------------------------ full forward --------------------------------- #

def pallas_forward(x_nchw, params, eps_nhwc):
    """params must come from prepare_params (matmul-ready, bf16 weights)."""
    x = jnp.transpose(x_nchw, (0, 2, 3, 1))                         # NHWC
    # encoder
    h = _conv_bn_relu(x, params["stem_w"], params["stem_g"], params["stem_b"],
                      k=7, stride=1, pad=3, mode="reflect")
    for (w, g, b) in params["down"]:
        h = _conv_bn_relu(h, w, g, b, k=3, stride=2, pad=1, mode="constant")
    for p in params["enc_blocks"]:
        h = _resnet_block(h, p)
    mu = _conv1x1_bias(h, params["mu_w"], params["mu_b"], out_dtype=jnp.float32)
    lv = _conv1x1_bias(h, params["lv_w"], params["lv_b"], out_dtype=jnp.float32)
    # training-mode reparameterisation (tiny; plain-JAX glue)
    z = mu + eps_nhwc * jnp.exp(0.5 * lv)
    # decoder
    d = _conv1x1_bias(z, params["dec_in_w"], params["dec_in_b"])
    for p in params["dec_blocks"]:
        d = _resnet_block(d, p)
    for (w, g, b) in params["up"]:
        d = _convT_bn_relu(d, w, g, b)
    out = _final_conv_tanh(d, params["out_w"], params["out_b"])
    return (jnp.transpose(out, (0, 3, 1, 2)),
            jnp.transpose(mu, (0, 3, 1, 2)),
            jnp.transpose(lv, (0, 3, 1, 2)))


# ------------------------------- parameters ---------------------------------- #

def init_params(key, *, input_nc, output_nc, ngf, nz, n_blocks):
    cbot = ngf * 8
    ks = iter(jax.random.split(key, 64))
    conv_w = lambda shape: 0.02 * jax.random.normal(next(ks), shape, jnp.float32)

    def bn(c):
        return (1.0 + 0.1 * jax.random.normal(next(ks), (c,), jnp.float32),
                0.1 * jax.random.normal(next(ks), (c,), jnp.float32))

    def resblock():
        g1, b1 = bn(cbot)
        g2, b2 = bn(cbot)
        return {"w1": conv_w((cbot, cbot, 3, 3)), "g1": g1, "b1": b1,
                "w2": conv_w((cbot, cbot, 3, 3)), "g2": g2, "b2": b2}

    p = {"stem_w": conv_w((ngf, input_nc, 7, 7))}
    p["stem_g"], p["stem_b"] = bn(ngf)
    p["down"] = []
    for i in range(3):
        cin, cout = ngf * 2 ** i, ngf * 2 ** (i + 1)
        g, b = bn(cout)
        p["down"].append((conv_w((cout, cin, 3, 3)), g, b))
    p["enc_blocks"] = [resblock() for _ in range(n_blocks // 2)]
    p["mu_w"], p["mu_b"] = conv_w((nz, cbot, 1, 1)), conv_w((nz,))
    p["lv_w"], p["lv_b"] = conv_w((nz, cbot, 1, 1)), conv_w((nz,))
    p["dec_in_w"], p["dec_in_b"] = conv_w((cbot, nz, 1, 1)), conv_w((cbot,))
    p["dec_blocks"] = [resblock() for _ in range(n_blocks // 2)]
    p["up"] = []
    for i in range(3):
        cin = ngf * 2 ** (3 - i)
        g, b = bn(cin // 2)
        p["up"].append((conv_w((cin, cin // 2, 3, 3)), g, b))   # ConvT layout (Cin,Cout,k,k)
    p["out_w"], p["out_b"] = conv_w((output_nc, ngf, 7, 7)), conv_w((output_nc,))
    return p


def prepare_params(p):
    """One-time weight re-layout / bf16 cast (hoisted out of the forward pass)."""
    bf = jnp.bfloat16

    def rb(bp):
        return {"w1": _conv_w_matrix(bp["w1"]).astype(bf), "g1": bp["g1"], "b1": bp["b1"],
                "w2": _conv_w_matrix(bp["w2"]).astype(bf), "g2": bp["g2"], "b2": bp["b2"]}

    q = {"stem_w": _conv_w_matrix(p["stem_w"]).astype(bf),
         "stem_g": p["stem_g"], "stem_b": p["stem_b"],
         "down": [(_conv_w_matrix(w).astype(bf), g, b) for (w, g, b) in p["down"]],
         "enc_blocks": [rb(bp) for bp in p["enc_blocks"]],
         "mu_w": jnp.transpose(p["mu_w"][:, :, 0, 0], (1, 0)).astype(bf),
         "mu_b": p["mu_b"],
         "lv_w": jnp.transpose(p["lv_w"][:, :, 0, 0], (1, 0)).astype(bf),
         "lv_b": p["lv_b"],
         "dec_in_w": jnp.transpose(p["dec_in_w"][:, :, 0, 0], (1, 0)).astype(bf),
         "dec_in_b": p["dec_in_b"],
         "dec_blocks": [rb(bp) for bp in p["dec_blocks"]],
         "up": [(_convT_s2_weight(w).astype(bf), g, b) for (w, g, b) in p["up"]],
         "out_w": jnp.transpose(p["out_w"], (0, 2, 3, 1))
                     .reshape(p["out_w"].shape[0], -1).astype(bf),
         "out_b": p["out_b"]}
    return q


# ---------------------------- pure-JAX reference ----------------------------- #

def _ref_conv(x, w, stride=1, pad=0, bias=None):
    out = jax.lax.conv_general_dilated(
        x, w, window_strides=(stride, stride), padding=[(pad, pad), (pad, pad)],
        dimension_numbers=("NCHW", "OIHW", "NCHW"))
    if bias is not None:
        out = out + bias[None, :, None, None]
    return out


def _ref_bn(x, g, b):
    mu = jnp.mean(x, axis=(0, 2, 3), keepdims=True)
    var = jnp.mean((x - mu) ** 2, axis=(0, 2, 3), keepdims=True)
    return (x - mu) * jax.lax.rsqrt(var + _BN_EPS) * g[None, :, None, None] \
        + b[None, :, None, None]


def _ref_rpad(x, p):
    return jnp.pad(x, ((0, 0), (0, 0), (p, p), (p, p)), mode="reflect")


def _ref_convT(x, w_pt):   # k=3, s=2, p=1, output_padding=1, no bias
    wk = jnp.transpose(w_pt[:, :, ::-1, ::-1], (1, 0, 2, 3))
    return jax.lax.conv_general_dilated(
        x, wk, window_strides=(1, 1), padding=[(1, 2), (1, 2)],
        lhs_dilation=(2, 2), dimension_numbers=("NCHW", "OIHW", "NCHW"))


def _ref_resblock(x, p):
    h = jnp.maximum(_ref_bn(_ref_conv(_ref_rpad(x, 1), p["w1"]), p["g1"], p["b1"]), 0.0)
    h = _ref_bn(_ref_conv(_ref_rpad(h, 1), p["w2"]), p["g2"], p["b2"])
    return x + h


def reference_forward(x, params, eps_nhwc):
    h = jnp.maximum(_ref_bn(_ref_conv(_ref_rpad(x, 3), params["stem_w"]),
                            params["stem_g"], params["stem_b"]), 0.0)
    for (w, g, b) in params["down"]:
        h = jnp.maximum(_ref_bn(_ref_conv(h, w, stride=2, pad=1), g, b), 0.0)
    for p in params["enc_blocks"]:
        h = _ref_resblock(h, p)
    mu = _ref_conv(h, params["mu_w"], bias=params["mu_b"])
    lv = _ref_conv(h, params["lv_w"], bias=params["lv_b"])
    z = mu + jnp.transpose(eps_nhwc, (0, 3, 1, 2)) * jnp.exp(0.5 * lv)
    d = _ref_conv(z, params["dec_in_w"], bias=params["dec_in_b"])
    for p in params["dec_blocks"]:
        d = _ref_resblock(d, p)
    for (w, g, b) in params["up"]:
        d = jnp.maximum(_ref_bn(_ref_convT(d, w), g, b), 0.0)
    d = _ref_conv(_ref_rpad(d, 3), params["out_w"], bias=params["out_b"])
    return jnp.tanh(d), mu, lv


# ----------------------------------- main ------------------------------------ #

if __name__ == "__main__":
    input_nc, output_nc, ngf, nz, n_blocks = 4, 3, 8, 8, 2
    batch, size = 2, 16
    hb = size // 8                                    # spatial size at the bottleneck

    key = jax.random.PRNGKey(0)
    kx, kp, ke = jax.random.split(key, 3)
    x = jax.random.normal(kx, (batch, input_nc, size, size), jnp.float32)
    params = init_params(kp, input_nc=input_nc, output_nc=output_nc,
                         ngf=ngf, nz=nz, n_blocks=n_blocks)
    eps = jax.random.normal(ke, (batch, hb, hb, nz), jnp.float32)

    mat_params = prepare_params(params)               # one-time weight re-layout

    out, mu, lv = jax.block_until_ready(
        jax.jit(pallas_forward)(x, mat_params, eps))

    assert out.shape == (batch, output_nc, size, size), out.shape
    assert mu.shape == (batch, nz, hb, hb), mu.shape
    assert lv.shape == (batch, nz, hb, hb), lv.shape

    ref_out, ref_mu, ref_lv = jax.block_until_ready(
        jax.jit(reference_forward)(x, params, eps))

    # bf16 MXU operands / bf16 activation storage -> loosened tolerance vs f32 reference
    for got, want in ((out, ref_out), (mu, ref_mu), (lv, ref_lv)):
        if not np.allclose(np.asarray(got), np.asarray(want), atol=5e-2, rtol=5e-2):
            raise AssertionError("Pallas ResnetVAEGenerator mismatch vs JAX reference")

    print("KERNEL_OK")
</pallas_src>

<mosaic_0001>
module attributes {stable_mosaic.version = 11 : i64} {
  func.func @_mm_kernel(%arg0: i32, %arg1: i32, %arg2: memref<256x196xbf16, #tpu.memory_space<vmem>>, %arg3: memref<196x8xbf16, #tpu.memory_space<vmem>>, %arg4: memref<256x8xbf16, #tpu.memory_space<vmem>>, %arg5: memref<8x8xf32, #tpu.memory_space<vmem>>) attributes {dimension_semantics = [#tpu.dimension_semantics<parallel>, #tpu.dimension_semantics<parallel>], iteration_bounds = array<i64: 2, 1>, scalar_prefetch = 0 : i64, scratch_operands = 0 : i64, tpu.core_type = #tpu.core_type<tc>, window_params = [{transform_indices = @transform_0, window_bounds = array<i64: 256, 196>}, {transform_indices = @transform_1, window_bounds = array<i64: 196, 8>}, {transform_indices = @transform_2, window_bounds = array<i64: 256, 8>}, {transform_indices = @transform_3, window_bounds = array<i64: 8, 8>}]} {
    %c0 = arith.constant 0 : index
    %c0_0 = arith.constant 0 : index
    %0 = vector.load %arg2[%c0, %c0_0] : memref<256x196xbf16, #tpu.memory_space<vmem>>, vector<256x196xbf16>
    %c0_1 = arith.constant 0 : index
    %c0_2 = arith.constant 0 : index
    %1 = vector.load %arg3[%c0_1, %c0_2] : memref<196x8xbf16, #tpu.memory_space<vmem>>, vector<196x8xbf16>
    %cst = arith.constant dense<0.000000e+00> : vector<256x8xf32>
    %2 = tpu.matmul %0, %1, %cst {dimension_numbers = #tpu.dot_dimension_numbers<[1], [0], [0], [1], [0, 0, 1, 1], [], []>} : vector<256x196xbf16>, vector<196x8xbf16>, vector<256x8xf32> -> vector<256x8xf32>
    %cst_3 = arith.constant dense<0.000000e+00> : vector<8xf32>
    %3 = vector.multi_reduction <add>, %2, %cst_3 [0] : vector<256x8xf32> to vector<8xf32>
    %4 = vector.shape_cast %3 : vector<8xf32> to vector<1x8xf32>
    %5 = arith.mulf %2, %2 : vector<256x8xf32>
    %cst_4 = arith.constant dense<0.000000e+00> : vector<8xf32>
    %6 = vector.multi_reduction <add>, %5, %cst_4 [0] : vector<256x8xf32> to vector<8xf32>
    %7 = vector.shape_cast %6 : vector<8xf32> to vector<1x8xf32>
    %8 = tpu.iota {dimensions = array<i32: 0>} : vector<8x8xi32>
    %c0_i32 = arith.constant 0 : i32
    %9 = vector.broadcast %c0_i32 : i32 to vector<8x8xi32>
    %10 = arith.cmpi eq, %8, %9 : vector<8x8xi32>
    %c1_i32 = arith.constant 1 : i32
    %11 = vector.broadcast %c1_i32 : i32 to vector<8x8xi32>
    %12 = arith.cmpi eq, %8, %11 : vector<8x8xi32>
    %cst_5 = arith.constant 0.000000e+00 : f32
    %13 = vector.shape_cast %7 : vector<1x8xf32> to vector<1x8xf32>
    %14 = vector.broadcast %13 : vector<1x8xf32> to vector<8x8xf32>
    %15 = vector.broadcast %cst_5 : f32 to vector<8x8xf32>
    %16 = arith.select %12, %14, %15 : vector<8x8xi1>, vector<8x8xf32>
    %17 = vector.shape_cast %4 : vector<1x8xf32> to vector<1x8xf32>
    %18 = vector.broadcast %17 : vector<1x8xf32> to vector<8x8xf32>
    %19 = arith.select %10, %18, %16 : vector<8x8xi1>, vector<8x8xf32>
    %c0_6 = arith.constant 0 : index
    %c0_7 = arith.constant 0 : index
    %20 = vector.load %arg5[%c0_6, %c0_7] : memref<8x8xf32, #tpu.memory_space<vmem>>, vector<8x8xf32>
    tpu.vector_store %arg5[%c0_6, %c0_7], %19 {strides = array<i32>} : memref<8x8xf32, #tpu.memory_space<vmem>>, vector<8x8xf32>,
    %21 = arith.truncf %2 : vector<256x8xf32> to vector<256x8xbf16>
    %c0_8 = arith.constant 0 : index
    %c0_9 = arith.constant 0 : index
    %22 = vector.load %arg4[%c0_8, %c0_9] : memref<256x8xbf16, #tpu.memory_space<vmem>>, vector<256x8xbf16>
    tpu.vector_store %arg4[%c0_8, %c0_9], %21 {strides = array<i32>} : memref<256x8xbf16, #tpu.memory_space<vmem>>, vector<256x8xbf16>,
    return
  }
  func.func @transform_0(%arg0: i32, %arg1: i32) -> (i32, i32) {
    %c0_i32 = arith.constant 0 : i32
    %c0_i32_0 = arith.constant 0 : i32
    return %arg0, %c0_i32 : i32, i32
  }
  func.func @transform_1(%arg0: i32, %arg1: i32) -> (i32, i32) {
    %c0_i32 = arith.constant 0 : i32
    %c0_i32_0 = arith.constant 0 : i32
    return %c0_i32, %arg1 : i32, i32
  }
  func.func @transform_2(%arg0: i32, %arg1: i32) -> (i32, i32) {
    %c0_i32 = arith.constant 0 : i32
    return %arg0, %arg1 : i32, i32
  }
  func.func @transform_3(%arg0: i32, %arg1: i32) -> (i32, i32) {
    %c0_i32 = arith.constant 0 : i32
    %c0_i32_0 = arith.constant 0 : i32
    return %arg0, %c0_i32 : i32, i32
  }
}

module attributes {stable_mosaic.version = 11 : i64} {
  func.func @_bn_act_kernel(%arg0: i32, %arg1: memref<512x8xbf16, #tpu.memory_space<vmem>>, %arg2: memref<1x8xf32, #tpu.memory_space<vmem>>, %arg3: memref<1x8xf32, #tpu.memory_space<vmem>>, %arg4: memref<512x8xbf16, #tpu.memory_space<vmem>>) attributes {dimension_semantics = [#tpu.dimension_semantics<parallel>], iteration_bounds = array<i64: 1>, scalar_prefetch = 0 : i64, scratch_operands = 0 : i64, tpu.core_type = #tpu.core_type<tc>, window_params = [{transform_indices = @transform_0, window_bounds = array<i64: 512, 8>}, {pipeline_mode = #tpu.pipeline_mode<synchronous>, transform_indices = @transform_1, window_bounds = array<i64: 1, 8>}, {pipeline_mode = #tpu.pipeline_mode<synchronous>, transform_indices = @transform_2, window_bounds = array<i64: 1, 8>}, {transform_indices = @transform_3, window_bounds = array<i64: 512, 8>}]} {
    %c0 = arith.constant 0 : index
    %c0_0 = arith.constant 0 : index
    %0 = vector.load %arg1[%c0, %c0_0] : memref<512x8xbf16, #tpu.memory_space<vmem>>, vector<512x8xbf16>
    %1 = arith.extf %0 : vector<512x8xbf16> to vector<512x8xf32>
    %c0_1 = arith.constant 0 : index
    %c0_2 = arith.constant 0 : index
    %2 = vector.load %arg2[%c0_1, %c0_2] : memref<1x8xf32, #tpu.memory_space<vmem>>, vector<1x8xf32>
    %3 = vector.broadcast %2 : vector<1x8xf32> to vector<512x8xf32>
    %4 = arith.mulf %1, %3 : vector<512x8xf32>
    %c0_3 = arith.constant 0 : index
    %c0_4 = arith.constant 0 : index
    %5 = vector.load %arg3[%c0_3, %c0_4] : memref<1x8xf32, #tpu.memory_space<vmem>>, vector<1x8xf32>
    %6 = vector.broadcast %5 : vector<1x8xf32> to vector<512x8xf32>
    %7 = arith.addf %4, %6 : vector<512x8xf32>
    %cst = arith.constant 0.000000e+00 : f32
    %8 = vector.broadcast %cst : f32 to vector<512x8xf32>
    %9 = arith.maximumf %7, %8 : vector<512x8xf32>
    %10 = arith.truncf %9 : vector<512x8xf32> to vector<512x8xbf16>
    %c0_5 = arith.constant 0 : index
    %c0_6 = arith.constant 0 : index
    %11 = vector.load %arg4[%c0_5, %c0_6] : memref<512x8xbf16, #tpu.memory_space<vmem>>, vector<512x8xbf16>
    tpu.vector_store %arg4[%c0_5, %c0_6], %10 {strides = array<i32>} : memref<512x8xbf16, #tpu.memory_space<vmem>>, vector<512x8xbf16>,
    return
  }
  func.func @transform_0(%arg0: i32) -> (i32, i32) {
    %c0_i32 = arith.constant 0 : i32
    %c0_i32_0 = arith.constant 0 : i32
    return %arg0, %c0_i32 : i32, i32
  }
  func.func @transform_1(%arg0: i32) -> (i32, i32) {
    %c0_i32 = arith.constant 0 : i32
    %c0_i32_0 = arith.constant 0 : i32
    %c0_i32_1 = arith.constant 0 : i32
    return %c0_i32, %c0_i32_0 : i32, i32
  }
  func.func @transform_2(%arg0: i32) -> (i32, i32) {
    %c0_i32 = arith.constant 0 : i32
    %c0_i32_0 = arith.constant 0 : i32
    %c0_i32_1 = arith.constant 0 : i32
    return %c0_i32, %c0_i32_0 : i32, i32
  }
  func.func @transform_3(%arg0: i32) -> (i32, i32) {
    %c0_i32 = arith.constant 0 : i32
    %c0_i32_0 = arith.constant 0 : i32
    return %arg0, %c0_i32 : i32, i32
  }
}

module attributes {stable_mosaic.version = 11 : i64} {
  func.func @_mm_kernel(%arg0: i32, %arg1: i32, %arg2: memref<128x72xbf16, #tpu.memory_space<vmem>>, %arg3: memref<72x16xbf16, #tpu.memory_space<vmem>>, %arg4: memref<128x16xbf16, #tpu.memory_space<vmem>>, %arg5: memref<8x16xf32, #tpu.memory_space<vmem>>) attributes {dimension_semantics = [#tpu.dimension_semantics<parallel>, #tpu.dimension_semantics<parallel>], iteration_bounds = array<i64: 1, 1>, scalar_prefetch = 0 : i64, scratch_operands = 0 : i64, tpu.core_type = #tpu.core_type<tc>, window_params = [{transform_indices = @transform_0, window_bounds = array<i64: 128, 72>}, {transform_indices = @transform_1, window_bounds = array<i64: 72, 16>}, {transform_indices = @transform_2, window_bounds = array<i64: 128, 16>}, {transform_indices = @transform_3, window_bounds = array<i64: 8, 16>}]} {
    %c0 = arith.constant 0 : index
    %c0_0 = arith.constant 0 : index
    %0 = vector.load %arg2[%c0, %c0_0] : memref<128x72xbf16, #tpu.memory_space<vmem>>, vector<128x72xbf16>
    %c0_1 = arith.constant 0 : index
    %c0_2 = arith.constant 0 : index
    %1 = vector.load %arg3[%c0_1, %c0_2] : memref<72x16xbf16, #tpu.memory_space<vmem>>, vector<72x16xbf16>
    %cst = arith.constant dense<0.000000e+00> : vector<128x16xf32>
    %2 = tpu.matmul %0, %1, %cst {dimension_numbers = #tpu.dot_dimension_numbers<[1], [0], [0], [1], [0, 0, 1, 1], [], []>} : vector<128x72xbf16>, vector<72x16xbf16>, vector<128x16xf32> -> vector<128x16xf32>
    %cst_3 = arith.constant dense<0.000000e+00> : vector<16xf32>
    %3 = vector.multi_reduction <add>, %2, %cst_3 [0] : vector<128x16xf32> to vector<16xf32>
    %4 = vector.shape_cast %3 : vector<16xf32> to vector<1x16xf32>
    %5 = arith.mulf %2, %2 : vector<128x16xf32>
    %cst_4 = arith.constant dense<0.000000e+00> : vector<16xf32>
    %6 = vector.multi_reduction <add>, %5, %cst_4 [0] : vector<128x16xf32> to vector<16xf32>
    %7 = vector.shape_cast %6 : vector<16xf32> to vector<1x16xf32>
    %8 = tpu.iota {dimensions = array<i32: 0>} : vector<8x16xi32>
    %c0_i32 = arith.constant 0 : i32
    %9 = vector.broadcast %c0_i32 : i32 to vector<8x16xi32>
    %10 = arith.cmpi eq, %8, %9 : vector<8x16xi32>
    %c1_i32 = arith.constant 1 : i32
    %11 = vector.broadcast %c1_i32 : i32 to vector<8x16xi32>
    %12 = arith.cmpi eq, %8, %11 : vector<8x16xi32>
    %cst_5 = arith.constant 0.000000e+00 : f32
    %13 = vector.shape_cast %7 : vector<1x16xf32> to vector<1x16xf32>
    %14 = vector.broadcast %13 : vector<1x16xf32> to vector<8x16xf32>
    %15 = vector.broadcast %cst_5 : f32 to vector<8x16xf32>
    %16 = arith.select %12, %14, %15 : vector<8x16xi1>, vector<8x16xf32>
    %17 = vector.shape_cast %4 : vector<1x16xf32> to vector<1x16xf32>
    %18 = vector.broadcast %17 : vector<1x16xf32> to vector<8x16xf32>
    %19 = arith.select %10, %18, %16 : vector<8x16xi1>, vector<8x16xf32>
    %c0_6 = arith.constant 0 : index
    %c0_7 = arith.constant 0 : index
    %20 = vector.load %arg5[%c0_6, %c0_7] : memref<8x16xf32, #tpu.memory_space<vmem>>, vector<8x16xf32>
    tpu.vector_store %arg5[%c0_6, %c0_7], %19 {strides = array<i32>} : memref<8x16xf32, #tpu.memory_space<vmem>>, vector<8x16xf32>,
    %21 = arith.truncf %2 : vector<128x16xf32> to vector<128x16xbf16>
    %c0_8 = arith.constant 0 : index
    %c0_9 = arith.constant 0 : index
    %22 = vector.load %arg4[%c0_8, %c0_9] : memref<128x16xbf16, #tpu.memory_space<vmem>>, vector<128x16xbf16>
    tpu.vector_store %arg4[%c0_8, %c0_9], %21 {strides = array<i32>} : memref<128x16xbf16, #tpu.memory_space<vmem>>, vector<128x16xbf16>,
    return
  }
  func.func @transform_0(%arg0: i32, %arg1: i32) -> (i32, i32) {
    %c0_i32 = arith.constant 0 : i32
    %c0_i32_0 = arith.constant 0 : i32
    return %arg0, %c0_i32 : i32, i32
  }
  func.func @transform_1(%arg0: i32, %arg1: i32) -> (i32, i32) {
    %c0_i32 = arith.constant 0 : i32
    %c0_i32_0 = arith.constant 0 : i32
    return %c0_i32, %arg1 : i32, i32
  }
  func.func @transform_2(%arg0: i32, %arg1: i32) -> (i32, i32) {
    %c0_i32 = arith.constant 0 : i32
    return %arg0, %arg1 : i32, i32
  }
  func.func @transform_3(%arg0: i32, %arg1: i32) -> (i32, i32) {
    %c0_i32 = arith.constant 0 : i32
    %c0_i32_0 = arith.constant 0 : i32
    return %arg0, %c0_i32 : i32, i32
  }
}

module attributes {stable_mosaic.version = 11 : i64} {
  func.func @_bn_act_kernel(%arg0: i32, %arg1: memref<128x16xbf16, #tpu.memory_space<vmem>>, %arg2: memref<1x16xf32, #tpu.memory_space<vmem>>, %arg3: memref<1x16xf32, #tpu.memory_space<vmem>>, %arg4: memref<128x16xbf16, #tpu.memory_space<vmem>>) attributes {dimension_semantics = [#tpu.dimension_semantics<parallel>], iteration_bounds = array<i64: 1>, scalar_prefetch = 0 : i64, scratch_operands = 0 : i64, tpu.core_type = #tpu.core_type<tc>, window_params = [{transform_indices = @transform_0, window_bounds = array<i64: 128, 16>}, {pipeline_mode = #tpu.pipeline_mode<synchronous>, transform_indices = @transform_1, window_bounds = array<i64: 1, 16>}, {pipeline_mode = #tpu.pipeline_mode<synchronous>, transform_indices = @transform_2, window_bounds = array<i64: 1, 16>}, {transform_indices = @transform_3, window_bounds = array<i64: 128, 16>}]} {
    %c0 = arith.constant 0 : index
    %c0_0 = arith.constant 0 : index
    %0 = vector.load %arg1[%c0, %c0_0] : memref<128x16xbf16, #tpu.memory_space<vmem>>, vector<128x16xbf16>
    %1 = arith.extf %0 : vector<128x16xbf16> to vector<128x16xf32>
    %c0_1 = arith.constant 0 : index
    %c0_2 = arith.constant 0 : index
    %2 = vector.load %arg2[%c0_1, %c0_2] : memref<1x16xf32, #tpu.memory_space<vmem>>, vector<1x16xf32>
    %3 = vector.broadcast %2 : vector<1x16xf32> to vector<128x16xf32>
    %4 = arith.mulf %1, %3 : vector<128x16xf32>
    %c0_3 = arith.constant 0 : index
    %c0_4 = arith.constant 0 : index
    %5 = vector.load %arg3[%c0_3, %c0_4] : memref<1x16xf32, #tpu.memory_space<vmem>>, vector<1x16xf32>
    %6 = vector.broadcast %5 : vector<1x16xf32> to vector<128x16xf32>
    %7 = arith.addf %4, %6 : vector<128x16xf32>
    %cst = arith.constant 0.000000e+00 : f32
    %8 = vector.broadcast %cst : f32 to vector<128x16xf32>
    %9 = arith.maximumf %7, %8 : vector<128x16xf32>
    %10 = arith.truncf %9 : vector<128x16xf32> to vector<128x16xbf16>
    %c0_5 = arith.constant 0 : index
    %c0_6 = arith.constant 0 : index
    %11 = vector.load %arg4[%c0_5, %c0_6] : memref<128x16xbf16, #tpu.memory_space<vmem>>, vector<128x16xbf16>
    tpu.vector_store %arg4[%c0_5, %c0_6], %10 {strides = array<i32>} : memref<128x16xbf16, #tpu.memory_space<vmem>>, vector<128x16xbf16>,
    return
  }
  func.func @transform_0(%arg0: i32) -> (i32, i32) {
    %c0_i32 = arith.constant 0 : i32
    %c0_i32_0 = arith.constant 0 : i32
    return %arg0, %c0_i32 : i32, i32
  }
  func.func @transform_1(%arg0: i32) -> (i32, i32) {
    %c0_i32 = arith.constant 0 : i32
    %c0_i32_0 = arith.constant 0 : i32
    %c0_i32_1 = arith.constant 0 : i32
    return %c0_i32, %c0_i32_0 : i32, i32
  }
  func.func @transform_2(%arg0: i32) -> (i32, i32) {
    %c0_i32 = arith.constant 0 : i32
    %c0_i32_0 = arith.constant 0 : i32
    %c0_i32_1 = arith.constant 0 : i32
    return %c0_i32, %c0_i32_0 : i32, i32
  }
  func.func @transform_3(%arg0: i32) -> (i32, i32) {
    %c0_i32 = arith.constant 0 : i32
    %c0_i32_0 = arith.constant 0 : i32
    return %arg0, %c0_i32 : i32, i32
  }
}

module attributes {stable_mosaic.version = 11 : i64} {
  func.func @_mm_kernel(%arg0: i32, %arg1: i32, %arg2: memref<32x144xbf16, #tpu.memory_space<vmem>>, %arg3: memref<144x32xbf16, #tpu.memory_space<vmem>>, %arg4: memref<32x32xbf16, #tpu.memory_space<vmem>>, %arg5: memref<8x32xf32, #tpu.memory_space<vmem>>) attributes {dimension_semantics = [#tpu.dimension_semantics<parallel>, #tpu.dimension_semantics<parallel>], iteration_bounds = array<i64: 1, 1>, scalar_prefetch = 0 : i64, scratch_operands = 0 : i64, tpu.core_type = #tpu.core_type<tc>, window_params = [{transform_indices = @transform_0, window_bounds = array<i64: 32, 144>}, {transform_indices = @transform_1, window_bounds = array<i64: 144, 32>}, {transform_indices = @transform_2, window_bounds = array<i64: 32, 32>}, {transform_indices = @transform_3, window_bounds = array<i64: 8, 32>}]} {
    %c0 = arith.constant 0 : index
    %c0_0 = arith.constant 0 : index
    %0 = vector.load %arg2[%c0, %c0_0] : memref<32x144xbf16, #tpu.memory_space<vmem>>, vector<32x144xbf16>
    %c0_1 = arith.constant 0 : index
    %c0_2 = arith.constant 0 : index
    %1 = vector.load %arg3[%c0_1, %c0_2] : memref<144x32xbf16, #tpu.memory_space<vmem>>, vector<144x32xbf16>
    %cst = arith.constant dense<0.000000e+00> : vector<32x32xf32>
    %2 = tpu.matmul %0, %1, %cst {dimension_numbers = #tpu.dot_dimension_numbers<[1], [0], [0], [1], [0, 0, 1, 1], [], []>} : vector<32x144xbf16>, vector<144x32xbf16>, vector<32x32xf32> -> vector<32x32xf32>
    %cst_3 = arith.constant dense<0.000000e+00> : vector<32xf32>
    %3 = vector.multi_reduction <add>, %2, %cst_3 [0] : vector<32x32xf32> to vector<32xf32>
    %4 = vector.shape_cast %3 : vector<32xf32> to vector<1x32xf32>
    %5 = arith.mulf %2, %2 : vector<32x32xf32>
    %cst_4 = arith.constant dense<0.000000e+00> : vector<32xf32>
    %6 = vector.multi_reduction <add>, %5, %cst_4 [0] : vector<32x32xf32> to vector<32xf32>
    %7 = vector.shape_cast %6 : vector<32xf32> to vector<1x32xf32>
    %8 = tpu.iota {dimensions = array<i32: 0>} : vector<8x32xi32>
    %c0_i32 = arith.constant 0 : i32
    %9 = vector.broadcast %c0_i32 : i32 to vector<8x32xi32>
    %10 = arith.cmpi eq, %8, %9 : vector<8x32xi32>
    %c1_i32 = arith.constant 1 : i32
    %11 = vector.broadcast %c1_i32 : i32 to vector<8x32xi32>
    %12 = arith.cmpi eq, %8, %11 : vector<8x32xi32>
    %cst_5 = arith.constant 0.000000e+00 : f32
    %13 = vector.shape_cast %7 : vector<1x32xf32> to vector<1x32xf32>
    %14 = vector.broadcast %13 : vector<1x32xf32> to vector<8x32xf32>
    %15 = vector.broadcast %cst_5 : f32 to vector<8x32xf32>
    %16 = arith.select %12, %14, %15 : vector<8x32xi1>, vector<8x32xf32>
    %17 = vector.shape_cast %4 : vector<1x32xf32> to vector<1x32xf32>
    %18 = vector.broadcast %17 : vector<1x32xf32> to vector<8x32xf32>
    %19 = arith.select %10, %18, %16 : vector<8x32xi1>, vector<8x32xf32>
    %c0_6 = arith.constant 0 : index
    %c0_7 = arith.constant 0 : index
    %20 = vector.load %arg5[%c0_6, %c0_7] : memref<8x32xf32, #tpu.memory_space<vmem>>, vector<8x32xf32>
    tpu.vector_store %arg5[%c0_6, %c0_7], %19 {strides = array<i32>} : memref<8x32xf32, #tpu.memory_space<vmem>>, vector<8x32xf32>,
    %21 = arith.truncf %2 : vector<32x32xf32> to vector<32x32xbf16>
    %c0_8 = arith.constant 0 : index
    %c0_9 = arith.constant 0 : index
    %22 = vector.load %arg4[%c0_8, %c0_9] : memref<32x32xbf16, #tpu.memory_space<vmem>>, vector<32x32xbf16>
    tpu.vector_store %arg4[%c0_8, %c0_9], %21 {strides = array<i32>} : memref<32x32xbf16, #tpu.memory_space<vmem>>, vector<32x32xbf16>,
    return
  }
  func.func @transform_0(%arg0: i32, %arg1: i32) -> (i32, i32) {
    %c0_i32 = arith.constant 0 : i32
    %c0_i32_0 = arith.constant 0 : i32
    return %arg0, %c0_i32 : i32, i32
  }
  func.func @transform_1(%arg0: i32, %arg1: i32) -> (i32, i32) {
    %c0_i32 = arith.constant 0 : i32
    %c0_i32_0 = arith.constant 0 : i32
    return %c0_i32, %arg1 : i32, i32
  }
  func.func @transform_2(%arg0: i32, %arg1: i32) -> (i32, i32) {
    %c0_i32 = arith.constant 0 : i32
    return %arg0, %arg1 : i32, i32
  }
  func.func @transform_3(%arg0: i32, %arg1: i32) -> (i32, i32) {
    %c0_i32 = arith.constant 0 : i32
    %c0_i32_0 = arith.constant 0 : i32
    return %arg0, %c0_i32 : i32, i32
  }
}

module attributes {stable_mosaic.version = 11 : i64} {
  func.func @_bn_act_kernel(%arg0: i32, %arg1: memref<32x32xbf16, #tpu.memory_space<vmem>>, %arg2: memref<1x32xf32, #tpu.memory_space<vmem>>, %arg3: memref<1x32xf32, #tpu.memory_space<vmem>>, %arg4: memref<32x32xbf16, #tpu.memory_space<vmem>>) attributes {dimension_semantics = [#tpu.dimension_semantics<parallel>], iteration_bounds = array<i64: 1>, scalar_prefetch = 0 : i64, scratch_operands = 0 : i64, tpu.core_type = #tpu.core_type<tc>, window_params = [{transform_indices = @transform_0, window_bounds = array<i64: 32, 32>}, {pipeline_mode = #tpu.pipeline_mode<synchronous>, transform_indices = @transform_1, window_bounds = array<i64: 1, 32>}, {pipeline_mode = #tpu.pipeline_mode<synchronous>, transform_indices = @transform_2, window_bounds = array<i64: 1, 32>}, {transform_indices = @transform_3, window_bounds = array<i64: 32, 32>}]} {
    %c0 = arith.constant 0 : index
    %c0_0 = arith.constant 0 : index
    %0 = vector.load %arg1[%c0, %c0_0] : memref<32x32xbf16, #tpu.memory_space<vmem>>, vector<32x32xbf16>
    %1 = arith.extf %0 : vector<32x32xbf16> to vector<32x32xf32>
    %c0_1 = arith.constant 0 : index
    %c0_2 = arith.constant 0 : index
    %2 = vector.load %arg2[%c0_1, %c0_2] : memref<1x32xf32, #tpu.memory_space<vmem>>, vector<1x32xf32>
    %3 = vector.broadcast %2 : vector<1x32xf32> to vector<32x32xf32>
    %4 = arith.mulf %1, %3 : vector<32x32xf32>
    %c0_3 = arith.constant 0 : index
    %c0_4 = arith.constant 0 : index
    %5 = vector.load %arg3[%c0_3, %c0_4] : memref<1x32xf32, #tpu.memory_space<vmem>>, vector<1x32xf32>
    %6 = vector.broadcast %5 : vector<1x32xf32> to vector<32x32xf32>
    %7 = arith.addf %4, %6 : vector<32x32xf32>
    %cst = arith.constant 0.000000e+00 : f32
    %8 = vector.broadcast %cst : f32 to vector<32x32xf32>
    %9 = arith.maximumf %7, %8 : vector<32x32xf32>
    %10 = arith.truncf %9 : vector<32x32xf32> to vector<32x32xbf16>
    %c0_5 = arith.constant 0 : index
    %c0_6 = arith.constant 0 : index
    %11 = vector.load %arg4[%c0_5, %c0_6] : memref<32x32xbf16, #tpu.memory_space<vmem>>, vector<32x32xbf16>
    tpu.vector_store %arg4[%c0_5, %c0_6], %10 {strides = array<i32>} : memref<32x32xbf16, #tpu.memory_space<vmem>>, vector<32x32xbf16>,
    return
  }
  func.func @transform_0(%arg0: i32) -> (i32, i32) {
    %c0_i32 = arith.constant 0 : i32
    %c0_i32_0 = arith.constant 0 : i32
    return %arg0, %c0_i32 : i32, i32
  }
  func.func @transform_1(%arg0: i32) -> (i32, i32) {
    %c0_i32 = arith.constant 0 : i32
    %c0_i32_0 = arith.constant 0 : i32
    %c0_i32_1 = arith.constant 0 : i32
    return %c0_i32, %c0_i32_0 : i32, i32
  }
  func.func @transform_2(%arg0: i32) -> (i32, i32) {
    %c0_i32 = arith.constant 0 : i32
    %c0_i32_0 = arith.constant 0 : i32
    %c0_i32_1 = arith.constant 0 : i32
    return %c0_i32, %c0_i32_0 : i32, i32
  }
  func.func @transform_3(%arg0: i32) -> (i32, i32) {
    %c0_i32 = arith.constant 0 : i32
    %c0_i32_0 = arith.constant 0 : i32
    return %arg0, %c0_i32 : i32, i32
  }
}

module attributes {stable_mosaic.version = 11 : i64} {
  func.func @_mm_kernel(%arg0: i32, %arg1: i32, %arg2: memref<8x288xbf16, #tpu.memory_space<vmem>>, %arg3: memref<288x64xbf16, #tpu.memory_space<vmem>>, %arg4: memref<8x64xbf16, #tpu.memory_space<vmem>>, %arg5: memref<8x64xf32, #tpu.memory_space<vmem>>) attributes {dimension_semantics = [#tpu.dimension_semantics<parallel>, #tpu.dimension_semantics<parallel>], iteration_bounds = array<i64: 1, 1>, scalar_prefetch = 0 : i64, scratch_operands = 0 : i64, tpu.core_type = #tpu.core_type<tc>, window_params = [{transform_indices = @transform_0, window_bounds = array<i64: 8, 288>}, {transform_indices = @transform_1, window_bounds = array<i64: 288, 64>}, {transform_indices = @transform_2, window_bounds = array<i64: 8, 64>}, {transform_indices = @transform_3, window_bounds = array<i64: 8, 64>}]} {
    %c0 = arith.constant 0 : index
    %c0_0 = arith.constant 0 : index
    %0 = vector.load %arg2[%c0, %c0_0] : memref<8x288xbf16, #tpu.memory_space<vmem>>, vector<8x288xbf16>
    %c0_1 = arith.constant 0 : index
    %c0_2 = arith.constant 0 : index
    %1 = vector.load %arg3[%c0_1, %c0_2] : memref<288x64xbf16, #tpu.memory_space<vmem>>, vector<288x64xbf16>
    %cst = arith.constant dense<0.000000e+00> : vector<8x64xf32>
    %2 = tpu.matmul %0, %1, %cst {dimension_numbers = #tpu.dot_dimension_numbers<[1], [0], [0], [1], [0, 0, 1, 1], [], []>} : vector<8x288xbf16>, vector<288x64xbf16>, vector<8x64xf32> -> vector<8x64xf32>
    %cst_3 = arith.constant dense<0.000000e+00> : vector<64xf32>
    %3 = vector.multi_reduction <add>, %2, %cst_3 [0] : vector<8x64xf32> to vector<64xf32>
    %4 = vector.shape_cast %3 : vector<64xf32> to vector<1x64xf32>
    %5 = arith.mulf %2, %2 : vector<8x64xf32>
    %cst_4 = arith.constant dense<0.000000e+00> : vector<64xf32>
    %6 = vector.multi_reduction <add>, %5, %cst_4 [0] : vector<8x64xf32> to vector<64xf32>
    %7 = vector.shape_cast %6 : vector<64xf32> to vector<1x64xf32>
    %8 = tpu.iota {dimensions = array<i32: 0>} : vector<8x64xi32>
    %c0_i32 = arith.constant 0 : i32
    %9 = vector.broadcast %c0_i32 : i32 to vector<8x64xi32>
    %10 = arith.cmpi eq, %8, %9 : vector<8x64xi32>
    %c1_i32 = arith.constant 1 : i32
    %11 = vector.broadcast %c1_i32 : i32 to vector<8x64xi32>
    %12 = arith.cmpi eq, %8, %11 : vector<8x64xi32>
    %cst_5 = arith.constant 0.000000e+00 : f32
    %13 = vector.shape_cast %7 : vector<1x64xf32> to vector<1x64xf32>
    %14 = vector.broadcast %13 : vector<1x64xf32> to vector<8x64xf32>
    %15 = vector.broadcast %cst_5 : f32 to vector<8x64xf32>
    %16 = arith.select %12, %14, %15 : vector<8x64xi1>, vector<8x64xf32>
    %17 = vector.shape_cast %4 : vector<1x64xf32> to vector<1x64xf32>
    %18 = vector.broadcast %17 : vector<1x64xf32> to vector<8x64xf32>
    %19 = arith.select %10, %18, %16 : vector<8x64xi1>, vector<8x64xf32>
    %c0_6 = arith.constant 0 : index
    %c0_7 = arith.constant 0 : index
    %20 = vector.load %arg5[%c0_6, %c0_7] : memref<8x64xf32, #tpu.memory_space<vmem>>, vector<8x64xf32>
    tpu.vector_store %arg5[%c0_6, %c0_7], %19 {strides = array<i32>} : memref<8x64xf32, #tpu.memory_space<vmem>>, vector<8x64xf32>,
    %21 = arith.truncf %2 : vector<8x64xf32> to vector<8x64xbf16>
    %c0_8 = arith.constant 0 : index
    %c0_9 = arith.constant 0 : index
    %22 = vector.load %arg4[%c0_8, %c0_9] : memref<8x64xbf16, #tpu.memory_space<vmem>>, vector<8x64xbf16>
    tpu.vector_store %arg4[%c0_8, %c0_9], %21 {strides = array<i32>} : memref<8x64xbf16, #tpu.memory_space<vmem>>, vector<8x64xbf16>,
    return
  }
  func.func @transform_0(%arg0: i32, %arg1: i32) -> (i32, i32) {
    %c0_i32 = arith.constant 0 : i32
    %c0_i32_0 = arith.constant 0 : i32
    return %arg0, %c0_i32 : i32, i32
  }
  func.func @transform_1(%arg0: i32, %arg1: i32) -> (i32, i32) {
    %c0_i32 = arith.constant 0 : i32
    %c0_i32_0 = arith.constant 0 : i32
    return %c0_i32, %arg1 : i32, i32
  }
  func.func @transform_2(%arg0: i32, %arg1: i32) -> (i32, i32) {
    %c0_i32 = arith.constant 0 : i32
    return %arg0, %arg1 : i32, i32
  }
  func.func @transform_3(%arg0: i32, %arg1: i32) -> (i32, i32) {
    %c0_i32 = arith.constant 0 : i32
    %c0_i32_0 = arith.constant 0 : i32
    return %arg0, %c0_i32 : i32, i32
  }
}

module attributes {stable_mosaic.version = 11 : i64} {
  func.func @_bn_act_kernel(%arg0: i32, %arg1: memref<8x64xbf16, #tpu.memory_space<vmem>>, %arg2: memref<1x64xf32, #tpu.memory_space<vmem>>, %arg3: memref<1x64xf32, #tpu.memory_space<vmem>>, %arg4: memref<8x64xbf16, #tpu.memory_space<vmem>>) attributes {dimension_semantics = [#tpu.dimension_semantics<parallel>], iteration_bounds = array<i64: 1>, scalar_prefetch = 0 : i64, scratch_operands = 0 : i64, tpu.core_type = #tpu.core_type<tc>, window_params = [{transform_indices = @transform_0, window_bounds = array<i64: 8, 64>}, {pipeline_mode = #tpu.pipeline_mode<synchronous>, transform_indices = @transform_1, window_bounds = array<i64: 1, 64>}, {pipeline_mode = #tpu.pipeline_mode<synchronous>, transform_indices = @transform_2, window_bounds = array<i64: 1, 64>}, {transform_indices = @transform_3, window_bounds = array<i64: 8, 64>}]} {
    %c0 = arith.constant 0 : index
    %c0_0 = arith.constant 0 : index
    %0 = vector.load %arg1[%c0, %c0_0] : memref<8x64xbf16, #tpu.memory_space<vmem>>, vector<8x64xbf16>
    %1 = arith.extf %0 : vector<8x64xbf16> to vector<8x64xf32>
    %c0_1 = arith.constant 0 : index
    %c0_2 = arith.constant 0 : index
    %2 = vector.load %arg2[%c0_1, %c0_2] : memref<1x64xf32, #tpu.memory_space<vmem>>, vector<1x64xf32>
    %3 = vector.broadcast %2 : vector<1x64xf32> to vector<8x64xf32>
    %4 = arith.mulf %1, %3 : vector<8x64xf32>
    %c0_3 = arith.constant 0 : index
    %c0_4 = arith.constant 0 : index
    %5 = vector.load %arg3[%c0_3, %c0_4] : memref<1x64xf32, #tpu.memory_space<vmem>>, vector<1x64xf32>
    %6 = vector.broadcast %5 : vector<1x64xf32> to vector<8x64xf32>
    %7 = arith.addf %4, %6 : vector<8x64xf32>
    %cst = arith.constant 0.000000e+00 : f32
    %8 = vector.broadcast %cst : f32 to vector<8x64xf32>
    %9 = arith.maximumf %7, %8 : vector<8x64xf32>
    %10 = arith.truncf %9 : vector<8x64xf32> to vector<8x64xbf16>
    %c0_5 = arith.constant 0 : index
    %c0_6 = arith.constant 0 : index
    %11 = vector.load %arg4[%c0_5, %c0_6] : memref<8x64xbf16, #tpu.memory_space<vmem>>, vector<8x64xbf16>
    tpu.vector_store %arg4[%c0_5, %c0_6], %10 {strides = array<i32>} : memref<8x64xbf16, #tpu.memory_space<vmem>>, vector<8x64xbf16>,
    return
  }
  func.func @transform_0(%arg0: i32) -> (i32, i32) {
    %c0_i32 = arith.constant 0 : i32
    %c0_i32_0 = arith.constant 0 : i32
    return %arg0, %c0_i32 : i32, i32
  }
  func.func @transform_1(%arg0: i32) -> (i32, i32) {
    %c0_i32 = arith.constant 0 : i32
    %c0_i32_0 = arith.constant 0 : i32
    %c0_i32_1 = arith.constant 0 : i32
    return %c0_i32, %c0_i32_0 : i32, i32
  }
  func.func @transform_2(%arg0: i32) -> (i32, i32) {
    %c0_i32 = arith.constant 0 : i32
    %c0_i32_0 = arith.constant 0 : i32
    %c0_i32_1 = arith.constant 0 : i32
    return %c0_i32, %c0_i32_0 : i32, i32
  }
  func.func @transform_3(%arg0: i32) -> (i32, i32) {
    %c0_i32 = arith.constant 0 : i32
    %c0_i32_0 = arith.constant 0 : i32
    return %arg0, %c0_i32 : i32, i32
  }
}

module attributes {stable_mosaic.version = 11 : i64} {
  func.func @_mm_kernel(%arg0: i32, %arg1: i32, %arg2: memref<8x576xbf16, #tpu.memory_space<vmem>>, %arg3: memref<576x64xbf16, #tpu.memory_space<vmem>>, %arg4: memref<8x64xbf16, #tpu.memory_space<vmem>>, %arg5: memref<8x64xf32, #tpu.memory_space<vmem>>) attributes {dimension_semantics = [#tpu.dimension_semantics<parallel>, #tpu.dimension_semantics<parallel>], iteration_bounds = array<i64: 1, 1>, scalar_prefetch = 0 : i64, scratch_operands = 0 : i64, tpu.core_type = #tpu.core_type<tc>, window_params = [{transform_indices = @transform_0, window_bounds = array<i64: 8, 576>}, {transform_indices = @transform_1, window_bounds = array<i64: 576, 64>}, {transform_indices = @transform_2, window_bounds = array<i64: 8, 64>}, {transform_indices = @transform_3, window_bounds = array<i64: 8, 64>}]} {
    %c0 = arith.constant 0 : index
    %c0_0 = arith.constant 0 : index
    %0 = vector.load %arg2[%c0, %c0_0] : memref<8x576xbf16, #tpu.memory_space<vmem>>, vector<8x576xbf16>
    %c0_1 = arith.constant 0 : index
    %c0_2 = arith.constant 0 : index
    %1 = vector.load %arg3[%c0_1, %c0_2] : memref<576x64xbf16, #tpu.memory_space<vmem>>, vector<576x64xbf16>
    %cst = arith.constant dense<0.000000e+00> : vector<8x64xf32>
    %2 = tpu.matmul %0, %1, %cst {dimension_numbers = #tpu.dot_dimension_numbers<[1], [0], [0], [1], [0, 0, 1, 1], [], []>} : vector<8x576xbf16>, vector<576x64xbf16>, vector<8x64xf32> -> vector<8x64xf32>
    %cst_3 = arith.constant dense<0.000000e+00> : vector<64xf32>
    %3 = vector.multi_reduction <add>, %2, %cst_3 [0] : vector<8x64xf32> to vector<64xf32>
    %4 = vector.shape_cast %3 : vector<64xf32> to vector<1x64xf32>
    %5 = arith.mulf %2, %2 : vector<8x64xf32>
    %cst_4 = arith.constant dense<0.000000e+00> : vector<64xf32>
    %6 = vector.multi_reduction <add>, %5, %cst_4 [0] : vector<8x64xf32> to vector<64xf32>
    %7 = vector.shape_cast %6 : vector<64xf32> to vector<1x64xf32>
    %8 = tpu.iota {dimensions = array<i32: 0>} : vector<8x64xi32>
    %c0_i32 = arith.constant 0 : i32
    %9 = vector.broadcast %c0_i32 : i32 to vector<8x64xi32>
    %10 = arith.cmpi eq, %8, %9 : vector<8x64xi32>
    %c1_i32 = arith.constant 1 : i32
    %11 = vector.broadcast %c1_i32 : i32 to vector<8x64xi32>
    %12 = arith.cmpi eq, %8, %11 : vector<8x64xi32>
    %cst_5 = arith.constant 0.000000e+00 : f32
    %13 = vector.shape_cast %7 : vector<1x64xf32> to vector<1x64xf32>
    %14 = vector.broadcast %13 : vector<1x64xf32> to vector<8x64xf32>
    %15 = vector.broadcast %cst_5 : f32 to vector<8x64xf32>
    %16 = arith.select %12, %14, %15 : vector<8x64xi1>, vector<8x64xf32>
    %17 = vector.shape_cast %4 : vector<1x64xf32> to vector<1x64xf32>
    %18 = vector.broadcast %17 : vector<1x64xf32> to vector<8x64xf32>
    %19 = arith.select %10, %18, %16 : vector<8x64xi1>, vector<8x64xf32>
    %c0_6 = arith.constant 0 : index
    %c0_7 = arith.constant 0 : index
    %20 = vector.load %arg5[%c0_6, %c0_7] : memref<8x64xf32, #tpu.memory_space<vmem>>, vector<8x64xf32>
    tpu.vector_store %arg5[%c0_6, %c0_7], %19 {strides = array<i32>} : memref<8x64xf32, #tpu.memory_space<vmem>>, vector<8x64xf32>,
    %21 = arith.truncf %2 : vector<8x64xf32> to vector<8x64xbf16>
    %c0_8 = arith.constant 0 : index
    %c0_9 = arith.constant 0 : index
    %22 = vector.load %arg4[%c0_8, %c0_9] : memref<8x64xbf16, #tpu.memory_space<vmem>>, vector<8x64xbf16>
    tpu.vector_store %arg4[%c0_8, %c0_9], %21 {strides = array<i32>} : memref<8x64xbf16, #tpu.memory_space<vmem>>, vector<8x64xbf16>,
    return
  }
  func.func @transform_0(%arg0: i32, %arg1: i32) -> (i32, i32) {
    %c0_i32 = arith.constant 0 : i32
    %c0_i32_0 = arith.constant 0 : i32
    return %arg0, %c0_i32 : i32, i32
  }
  func.func @transform_1(%arg0: i32, %arg1: i32) -> (i32, i32) {
    %c0_i32 = arith.constant 0 : i32
    %c0_i32_0 = arith.constant 0 : i32
    return %c0_i32, %arg1 : i32, i32
  }
  func.func @transform_2(%arg0: i32, %arg1: i32) -> (i32, i32) {
    %c0_i32 = arith.constant 0 : i32
    return %arg0, %arg1 : i32, i32
  }
  func.func @transform_3(%arg0: i32, %arg1: i32) -> (i32, i32) {
    %c0_i32 = arith.constant 0 : i32
    %c0_i32_0 = arith.constant 0 : i32
    return %arg0, %c0_i32 : i32, i32
  }
}

module attributes {stable_mosaic.version = 11 : i64} {
  func.func @_mm_kernel(%arg0: i32, %arg1: i32, %arg2: memref<8x576xbf16, #tpu.memory_space<vmem>>, %arg3: memref<1x576xf32, #tpu.memory_space<vmem>>, %arg4: memref<1x576xf32, #tpu.memory_space<vmem>>, %arg5: memref<576x64xbf16, #tpu.memory_space<vmem>>, %arg6: memref<8x64xbf16, #tpu.memory_space<vmem>>, %arg7: memref<8x64xf32, #tpu.memory_space<vmem>>) attributes {dimension_semantics = [#tpu.dimension_semantics<parallel>, #tpu.dimension_semantics<parallel>], iteration_bounds = array<i64: 1, 1>, scalar_prefetch = 0 : i64, scratch_operands = 0 : i64, tpu.core_type = #tpu.core_type<tc>, window_params = [{transform_indices = @transform_0, window_bounds = array<i64: 8, 576>}, {pipeline_mode = #tpu.pipeline_mode<synchronous>, transform_indices = @transform_1, window_bounds = array<i64: 1, 576>}, {pipeline_mode = #tpu.pipeline_mode<synchronous>, transform_indices = @transform_2, window_bounds = array<i64: 1, 576>}, {transform_indices = @transform_3, window_bounds = array<i64: 576, 64>}, {transform_indices = @transform_4, window_bounds = array<i64: 8, 64>}, {transform_indices = @transform_5, window_bounds = array<i64: 8, 64>}]} {
    %c0 = arith.constant 0 : index
    %c0_0 = arith.constant 0 : index
    %0 = vector.load %arg2[%c0, %c0_0] : memref<8x576xbf16, #tpu.memory_space<vmem>>, vector<8x576xbf16>
    %1 = arith.extf %0 : vector<8x576xbf16> to vector<8x576xf32>
    %c0_1 = arith.constant 0 : index
    %c0_2 = arith.constant 0 : index
    %2 = vector.load %arg3[%c0_1, %c0_2] : memref<1x576xf32, #tpu.memory_space<vmem>>, vector<1x576xf32>
    %3 = vector.broadcast %2 : vector<1x576xf32> to vector<8x576xf32>
    %4 = arith.mulf %1, %3 : vector<8x576xf32>
    %c0_3 = arith.constant 0 : index
    %c0_4 = arith.constant 0 : index
    %5 = vector.load %arg4[%c0_3, %c0_4] : memref<1x576xf32, #tpu.memory_space<vmem>>, vector<1x576xf32>
    %6 = vector.broadcast %5 : vector<1x576xf32> to vector<8x576xf32>
    %7 = arith.addf %4, %6 : vector<8x576xf32>
    %cst = arith.constant 0.000000e+00 : f32
    %8 = vector.broadcast %cst : f32 to vector<8x576xf32>
    %9 = arith.maximumf %7, %8 : vector<8x576xf32>
    %10 = arith.truncf %9 : vector<8x576xf32> to vector<8x576xbf16>
    %c0_5 = arith.constant 0 : index
    %c0_6 = arith.constant 0 : index
    %11 = vector.load %arg5[%c0_5, %c0_6] : memref<576x64xbf16, #tpu.memory_space<vmem>>, vector<576x64xbf16>
    %cst_7 = arith.constant dense<0.000000e+00> : vector<8x64xf32>
    %12 = tpu.matmul %10, %11, %cst_7 {dimension_numbers = #tpu.dot_dimension_numbers<[1], [0], [0], [1], [0, 0, 1, 1], [], []>} : vector<8x576xbf16>, vector<576x64xbf16>, vector<8x64xf32> -> vector<8x64xf32>
    %cst_8 = arith.constant dense<0.000000e+00> : vector<64xf32>
    %13 = vector.multi_reduction <add>, %12, %cst_8 [0] : vector<8x64xf32> to vector<64xf32>
    %14 = vector.shape_cast %13 : vector<64xf32> to vector<1x64xf32>
    %15 = arith.mulf %12, %12 : vector<8x64xf32>
    %cst_9 = arith.constant dense<0.000000e+00> : vector<64xf32>
    %16 = vector.multi_reduction <add>, %15, %cst_9 [0] : vector<8x64xf32> to vector<64xf32>
    %17 = vector.shape_cast %16 : vector<64xf32> to vector<1x64xf32>
    %18 = tpu.iota {dimensions = array<i32: 0>} : vector<8x64xi32>
    %c0_i32 = arith.constant 0 : i32
    %19 = vector.broadcast %c0_i32 : i32 to vector<8x64xi32>
    %20 = arith.cmpi eq, %18, %19 : vector<8x64xi32>
    %c1_i32 = arith.constant 1 : i32
    %21 = vector.broadcast %c1_i32 : i32 to vector<8x64xi32>
    %22 = arith.cmpi eq, %18, %21 : vector<8x64xi32>
    %cst_10 = arith.constant 0.000000e+00 : f32
    %23 = vector.shape_cast %17 : vector<1x64xf32> to vector<1x64xf32>
    %24 = vector.broadcast %23 : vector<1x64xf32> to vector<8x64xf32>
    %25 = vector.broadcast %cst_10 : f32 to vector<8x64xf32>
    %26 = arith.select %22, %24, %25 : vector<8x64xi1>, vector<8x64xf32>
    %27 = vector.shape_cast %14 : vector<1x64xf32> to vector<1x64xf32>
    %28 = vector.broadcast %27 : vector<1x64xf32> to vector<8x64xf32>
    %29 = arith.select %20, %28, %26 : vector<8x64xi1>, vector<8x64xf32>
    %c0_11 = arith.constant 0 : index
    %c0_12 = arith.constant 0 : index
    %30 = vector.load %arg7[%c0_11, %c0_12] : memref<8x64xf32, #tpu.memory_space<vmem>>, vector<8x64xf32>
    tpu.vector_store %arg7[%c0_11, %c0_12], %29 {strides = array<i32>} : memref<8x64xf32, #tpu.memory_space<vmem>>, vector<8x64xf32>,
    %31 = arith.truncf %12 : vector<8x64xf32> to vector<8x64xbf16>
    %c0_13 = arith.constant 0 : index
    %c0_14 = arith.constant 0 : index
    %32 = vector.load %arg6[%c0_13, %c0_14] : memref<8x64xbf16, #tpu.memory_space<vmem>>, vector<8x64xbf16>
    tpu.vector_store %arg6[%c0_13, %c0_14], %31 {strides = array<i32>} : memref<8x64xbf16, #tpu.memory_space<vmem>>, vector<8x64xbf16>,
    return
  }
  func.func @transform_0(%arg0: i32, %arg1: i32) -> (i32, i32) {
    %c0_i32 = arith.constant 0 : i32
    %c0_i32_0 = arith.constant 0 : i32
    return %arg0, %c0_i32 : i32, i32
  }
  func.func @transform_1(%arg0: i32, %arg1: i32) -> (i32, i32) {
    %c0_i32 = arith.constant 0 : i32
    %c0_i32_0 = arith.constant 0 : i32
    %c0_i32_1 = arith.constant 0 : i32
    return %c0_i32, %c0_i32_0 : i32, i32
  }
  func.func @transform_2(%arg0: i32, %arg1: i32) -> (i32, i32) {
    %c0_i32 = arith.constant 0 : i32
    %c0_i32_0 = arith.constant 0 : i32
    %c0_i32_1 = arith.constant 0 : i32
    return %c0_i32, %c0_i32_0 : i32, i32
  }
  func.func @transform_3(%arg0: i32, %arg1: i32) -> (i32, i32) {
    %c0_i32 = arith.constant 0 : i32
    %c0_i32_0 = arith.constant 0 : i32
    return %c0_i32, %arg1 : i32, i32
  }
  func.func @transform_4(%arg0: i32, %arg1: i32) -> (i32, i32) {
    %c0_i32 = arith.constant 0 : i32
    return %arg0, %arg1 : i32, i32
  }
  func.func @transform_5(%arg0: i32, %arg1: i32) -> (i32, i32) {
    %c0_i32 = arith.constant 0 : i32
    %c0_i32_0 = arith.constant 0 : i32
    return %arg0, %c0_i32 : i32, i32
  }
}

module attributes {stable_mosaic.version = 11 : i64} {
  func.func @_bn_act_kernel(%arg0: i32, %arg1: memref<8x64xbf16, #tpu.memory_space<vmem>>, %arg2: memref<1x64xf32, #tpu.memory_space<vmem>>, %arg3: memref<1x64xf32, #tpu.memory_space<vmem>>, %arg4: memref<8x64xbf16, #tpu.memory_space<vmem>>, %arg5: memref<8x64xbf16, #tpu.memory_space<vmem>>) attributes {dimension_semantics = [#tpu.dimension_semantics<parallel>], iteration_bounds = array<i64: 1>, scalar_prefetch = 0 : i64, scratch_operands = 0 : i64, tpu.core_type = #tpu.core_type<tc>, window_params = [{transform_indices = @transform_0, window_bounds = array<i64: 8, 64>}, {pipeline_mode = #tpu.pipeline_mode<synchronous>, transform_indices = @transform_1, window_bounds = array<i64: 1, 64>}, {pipeline_mode = #tpu.pipeline_mode<synchronous>, transform_indices = @transform_2, window_bounds = array<i64: 1, 64>}, {transform_indices = @transform_3, window_bounds = array<i64: 8, 64>}, {transform_indices = @transform_4, window_bounds = array<i64: 8, 64>}]} {
    %c0 = arith.constant 0 : index
    %c0_0 = arith.constant 0 : index
    %0 = vector.load %arg1[%c0, %c0_0] : memref<8x64xbf16, #tpu.memory_space<vmem>>, vector<8x64xbf16>
    %1 = arith.extf %0 : vector<8x64xbf16> to vector<8x64xf32>
    %c0_1 = arith.constant 0 : index
    %c0_2 = arith.constant 0 : index
    %2 = vector.load %arg2[%c0_1, %c0_2] : memref<1x64xf32, #tpu.memory_space<vmem>>, vector<1x64xf32>
    %3 = vector.broadcast %2 : vector<1x64xf32> to vector<8x64xf32>
    %4 = arith.mulf %1, %3 : vector<8x64xf32>
    %c0_3 = arith.constant 0 : index
    %c0_4 = arith.constant 0 : index
    %5 = vector.load %arg3[%c0_3, %c0_4] : memref<1x64xf32, #tpu.memory_space<vmem>>, vector<1x64xf32>
    %6 = vector.broadcast %5 : vector<1x64xf32> to vector<8x64xf32>
    %7 = arith.addf %4, %6 : vector<8x64xf32>
    %c0_5 = arith.constant 0 : index
    %c0_6 = arith.constant 0 : index
    %8 = vector.load %arg4[%c0_5, %c0_6] : memref<8x64xbf16, #tpu.memory_space<vmem>>, vector<8x64xbf16>
    %9 = arith.extf %8 : vector<8x64xbf16> to vector<8x64xf32>
    %10 = arith.addf %7, %9 : vector<8x64xf32>
    %11 = arith.truncf %10 : vector<8x64xf32> to vector<8x64xbf16>
    %c0_7 = arith.constant 0 : index
    %c0_8 = arith.constant 0 : index
    %12 = vector.load %arg5[%c0_7, %c0_8] : memref<8x64xbf16, #tpu.memory_space<vmem>>, vector<8x64xbf16>
    tpu.vector_store %arg5[%c0_7, %c0_8], %11 {strides = array<i32>} : memref<8x64xbf16, #tpu.memory_space<vmem>>, vector<8x64xbf16>,
    return
  }
  func.func @transform_0(%arg0: i32) -> (i32, i32) {
    %c0_i32 = arith.constant 0 : i32
    %c0_i32_0 = arith.constant 0 : i32
    return %arg0, %c0_i32 : i32, i32
  }
  func.func @transform_1(%arg0: i32) -> (i32, i32) {
    %c0_i32 = arith.constant 0 : i32
    %c0_i32_0 = arith.constant 0 : i32
    %c0_i32_1 = arith.constant 0 : i32
    return %c0_i32, %c0_i32_0 : i32, i32
  }
  func.func @transform_2(%arg0: i32) -> (i32, i32) {
    %c0_i32 = arith.constant 0 : i32
    %c0_i32_0 = arith.constant 0 : i32
    %c0_i32_1 = arith.constant 0 : i32
    return %c0_i32, %c0_i32_0 : i32, i32
  }
  func.func @transform_3(%arg0: i32) -> (i32, i32) {
    %c0_i32 = arith.constant 0 : i32
    %c0_i32_0 = arith.constant 0 : i32
    return %arg0, %c0_i32 : i32, i32
  }
  func.func @transform_4(%arg0: i32) -> (i32, i32) {
    %c0_i32 = arith.constant 0 : i32
    %c0_i32_0 = arith.constant 0 : i32
    return %arg0, %c0_i32 : i32, i32
  }
}

module attributes {stable_mosaic.version = 11 : i64} {
  func.func @_mm_kernel(%arg0: i32, %arg1: i32, %arg2: memref<8x64xbf16, #tpu.memory_space<vmem>>, %arg3: memref<64x8xbf16, #tpu.memory_space<vmem>>, %arg4: memref<1x8xf32, #tpu.memory_space<vmem>>, %arg5: memref<8x8xf32, #tpu.memory_space<vmem>>) attributes {dimension_semantics = [#tpu.dimension_semantics<parallel>, #tpu.dimension_semantics<parallel>], iteration_bounds = array<i64: 1, 1>, scalar_prefetch = 0 : i64, scratch_operands = 0 : i64, tpu.core_type = #tpu.core_type<tc>, window_params = [{transform_indices = @transform_0, window_bounds = array<i64: 8, 64>}, {transform_indices = @transform_1, window_bounds = array<i64: 64, 8>}, {transform_indices = @transform_2, window_bounds = array<i64: 1, 8>}, {transform_indices = @transform_3, window_bounds = array<i64: 8, 8>}]} {
    %c0 = arith.constant 0 : index
    %c0_0 = arith.constant 0 : index
    %0 = vector.load %arg2[%c0, %c0_0] : memref<8x64xbf16, #tpu.memory_space<vmem>>, vector<8x64xbf16>
    %c0_1 = arith.constant 0 : index
    %c0_2 = arith.constant 0 : index
    %1 = vector.load %arg3[%c0_1, %c0_2] : memref<64x8xbf16, #tpu.memory_space<vmem>>, vector<64x8xbf16>
    %cst = arith.constant dense<0.000000e+00> : vector<8x8xf32>
    %2 = tpu.matmul %0, %1, %cst {dimension_numbers = #tpu.dot_dimension_numbers<[1], [0], [0], [1], [0, 0, 1, 1], [], []>} : vector<8x64xbf16>, vector<64x8xbf16>, vector<8x8xf32> -> vector<8x8xf32>
    %c0_3 = arith.constant 0 : index
    %c0_4 = arith.constant 0 : index
    %3 = vector.load %arg4[%c0_3, %c0_4] : memref<1x8xf32, #tpu.memory_space<vmem>>, vector<1x8xf32>
    %4 = vector.broadcast %3 : vector<1x8xf32> to vector<8x8xf32>
    %5 = arith.addf %2, %4 : vector<8x8xf32>
    %c0_5 = arith.constant 0 : index
    %c0_6 = arith.constant 0 : index
    %6 = vector.load %arg5[%c0_5, %c0_6] : memref<8x8xf32, #tpu.memory_space<vmem>>, vector<8x8xf32>
    tpu.vector_store %arg5[%c0_5, %c0_6], %5 {strides = array<i32>} : memref<8x8xf32, #tpu.memory_space<vmem>>, vector<8x8xf32>,
    return
  }
  func.func @transform_0(%arg0: i32, %arg1: i32) -> (i32, i32) {
    %c0_i32 = arith.constant 0 : i32
    %c0_i32_0 = arith.constant 0 : i32
    return %arg0, %c0_i32 : i32, i32
  }
  func.func @transform_1(%arg0: i32, %arg1: i32) -> (i32, i32) {
    %c0_i32 = arith.constant 0 : i32
    %c0_i32_0 = arith.constant 0 : i32
    return %c0_i32, %arg1 : i32, i32
  }
  func.func @transform_2(%arg0: i32, %arg1: i32) -> (i32, i32) {
    %c0_i32 = arith.constant 0 : i32
    %c0_i32_0 = arith.constant 0 : i32
    return %c0_i32, %arg1 : i32, i32
  }
  func.func @transform_3(%arg0: i32, %arg1: i32) -> (i32, i32) {
    %c0_i32 = arith.constant 0 : i32
    return %arg0, %arg1 : i32, i32
  }
}

module attributes {stable_mosaic.version = 11 : i64} {
  func.func @_mm_kernel(%arg0: i32, %arg1: i32, %arg2: memref<8x8xbf16, #tpu.memory_space<vmem>>, %arg3: memref<8x64xbf16, #tpu.memory_space<vmem>>, %arg4: memref<1x64xf32, #tpu.memory_space<vmem>>, %arg5: memref<8x64xbf16, #tpu.memory_space<vmem>>) attributes {dimension_semantics = [#tpu.dimension_semantics<parallel>, #tpu.dimension_semantics<parallel>], iteration_bounds = array<i64: 1, 1>, scalar_prefetch = 0 : i64, scratch_operands = 0 : i64, tpu.core_type = #tpu.core_type<tc>, window_params = [{transform_indices = @transform_0, window_bounds = array<i64: 8, 8>}, {transform_indices = @transform_1, window_bounds = array<i64: 8, 64>}, {transform_indices = @transform_2, window_bounds = array<i64: 1, 64>}, {transform_indices = @transform_3, window_bounds = array<i64: 8, 64>}]} {
    %c0 = arith.constant 0 : index
    %c0_0 = arith.constant 0 : index
    %0 = vector.load %arg2[%c0, %c0_0] : memref<8x8xbf16, #tpu.memory_space<vmem>>, vector<8x8xbf16>
    %c0_1 = arith.constant 0 : index
    %c0_2 = arith.constant 0 : index
    %1 = vector.load %arg3[%c0_1, %c0_2] : memref<8x64xbf16, #tpu.memory_space<vmem>>, vector<8x64xbf16>
    %cst = arith.constant dense<0.000000e+00> : vector<8x64xf32>
    %2 = tpu.matmul %0, %1, %cst {dimension_numbers = #tpu.dot_dimension_numbers<[1], [0], [0], [1], [0, 0, 1, 1], [], []>} : vector<8x8xbf16>, vector<8x64xbf16>, vector<8x64xf32> -> vector<8x64xf32>
    %c0_3 = arith.constant 0 : index
    %c0_4 = arith.constant 0 : index
    %3 = vector.load %arg4[%c0_3, %c0_4] : memref<1x64xf32, #tpu.memory_space<vmem>>, vector<1x64xf32>
    %4 = vector.broadcast %3 : vector<1x64xf32> to vector<8x64xf32>
    %5 = arith.addf %2, %4 : vector<8x64xf32>
    %6 = arith.truncf %5 : vector<8x64xf32> to vector<8x64xbf16>
    %c0_5 = arith.constant 0 : index
    %c0_6 = arith.constant 0 : index
    %7 = vector.load %arg5[%c0_5, %c0_6] : memref<8x64xbf16, #tpu.memory_space<vmem>>, vector<8x64xbf16>
    tpu.vector_store %arg5[%c0_5, %c0_6], %6 {strides = array<i32>} : memref<8x64xbf16, #tpu.memory_space<vmem>>, vector<8x64xbf16>,
    return
  }
  func.func @transform_0(%arg0: i32, %arg1: i32) -> (i32, i32) {
    %c0_i32 = arith.constant 0 : i32
    %c0_i32_0 = arith.constant 0 : i32
    return %arg0, %c0_i32 : i32, i32
  }
  func.func @transform_1(%arg0: i32, %arg1: i32) -> (i32, i32) {
    %c0_i32 = arith.constant 0 : i32
    %c0_i32_0 = arith.constant 0 : i32
    return %c0_i32, %arg1 : i32, i32
  }
  func.func @transform_2(%arg0: i32, %arg1: i32) -> (i32, i32) {
    %c0_i32 = arith.constant 0 : i32
    %c0_i32_0 = arith.constant 0 : i32
    return %c0_i32, %arg1 : i32, i32
  }
  func.func @transform_3(%arg0: i32, %arg1: i32) -> (i32, i32) {
    %c0_i32 = arith.constant 0 : i32
    return %arg0, %arg1 : i32, i32
  }
}

module attributes {stable_mosaic.version = 11 : i64} {
  func.func @_mm_kernel(%arg0: i32, %arg1: i32, %arg2: memref<8x256xbf16, #tpu.memory_space<vmem>>, %arg3: memref<256x128xbf16, #tpu.memory_space<vmem>>, %arg4: memref<8x128xbf16, #tpu.memory_space<vmem>>, %arg5: memref<8x128xf32, #tpu.memory_space<vmem>>) attributes {dimension_semantics = [#tpu.dimension_semantics<parallel>, #tpu.dimension_semantics<parallel>], iteration_bounds = array<i64: 1, 1>, scalar_prefetch = 0 : i64, scratch_operands = 0 : i64, tpu.core_type = #tpu.core_type<tc>, window_params = [{transform_indices = @transform_0, window_bounds = array<i64: 8, 256>}, {transform_indices = @transform_1, window_bounds = array<i64: 256, 128>}, {transform_indices = @transform_2, window_bounds = array<i64: 8, 128>}, {transform_indices = @transform_3, window_bounds = array<i64: 8, 128>}]} {
    %c0 = arith.constant 0 : index
    %c0_0 = arith.constant 0 : index
    %0 = vector.load %arg2[%c0, %c0_0] : memref<8x256xbf16, #tpu.memory_space<vmem>>, vector<8x256xbf16>
    %c0_1 = arith.constant 0 : index
    %c0_2 = arith.constant 0 : index
    %1 = vector.load %arg3[%c0_1, %c0_2] : memref<256x128xbf16, #tpu.memory_space<vmem>>, vector<256x128xbf16>
    %cst = arith.constant dense<0.000000e+00> : vector<8x128xf32>
    %2 = tpu.matmul %0, %1, %cst {dimension_numbers = #tpu.dot_dimension_numbers<[1], [0], [0], [1], [0, 0, 1, 1], [], []>} : vector<8x256xbf16>, vector<256x128xbf16>, vector<8x128xf32> -> vector<8x128xf32>
    %cst_3 = arith.constant dense<0.000000e+00> : vector<128xf32>
    %3 = vector.multi_reduction <add>, %2, %cst_3 [0] : vector<8x128xf32> to vector<128xf32>
    %4 = vector.shape_cast %3 : vector<128xf32> to vector<1x128xf32>
    %5 = arith.mulf %2, %2 : vector<8x128xf32>
    %cst_4 = arith.constant dense<0.000000e+00> : vector<128xf32>
    %6 = vector.multi_reduction <add>, %5, %cst_4 [0] : vector<8x128xf32> to vector<128xf32>
    %7 = vector.shape_cast %6 : vector<128xf32> to vector<1x128xf32>
    %8 = tpu.iota {dimensions = array<i32: 0>} : vector<8x128xi32>
    %c0_i32 = arith.constant 0 : i32
    %9 = vector.broadcast %c0_i32 : i32 to vector<8x128xi32>
    %10 = arith.cmpi eq, %8, %9 : vector<8x128xi32>
    %c1_i32 = arith.constant 1 : i32
    %11 = vector.broadcast %c1_i32 : i32 to vector<8x128xi32>
    %12 = arith.cmpi eq, %8, %11 : vector<8x128xi32>
    %cst_5 = arith.constant 0.000000e+00 : f32
    %13 = vector.shape_cast %7 : vector<1x128xf32> to vector<1x128xf32>
    %14 = vector.broadcast %13 : vector<1x128xf32> to vector<8x128xf32>
    %15 = vector.broadcast %cst_5 : f32 to vector<8x128xf32>
    %16 = arith.select %12, %14, %15 : vector<8x128xi1>, vector<8x128xf32>
    %17 = vector.shape_cast %4 : vector<1x128xf32> to vector<1x128xf32>
    %18 = vector.broadcast %17 : vector<1x128xf32> to vector<8x128xf32>
    %19 = arith.select %10, %18, %16 : vector<8x128xi1>, vector<8x128xf32>
    %c0_6 = arith.constant 0 : index
    %c0_7 = arith.constant 0 : index
    %20 = vector.load %arg5[%c0_6, %c0_7] : memref<8x128xf32, #tpu.memory_space<vmem>>, vector<8x128xf32>
    tpu.vector_store %arg5[%c0_6, %c0_7], %19 {strides = array<i32>} : memref<8x128xf32, #tpu.memory_space<vmem>>, vector<8x128xf32>,
    %21 = arith.truncf %2 : vector<8x128xf32> to vector<8x128xbf16>
    %c0_8 = arith.constant 0 : index
    %c0_9 = arith.constant 0 : index
    %22 = vector.load %arg4[%c0_8, %c0_9] : memref<8x128xbf16, #tpu.memory_space<vmem>>, vector<8x128xbf16>
    tpu.vector_store %arg4[%c0_8, %c0_9], %21 {strides = array<i32>} : memref<8x128xbf16, #tpu.memory_space<vmem>>, vector<8x128xbf16>,
    return
  }
  func.func @transform_0(%arg0: i32, %arg1: i32) -> (i32, i32) {
    %c0_i32 = arith.constant 0 : i32
    %c0_i32_0 = arith.constant 0 : i32
    return %arg0, %c0_i32 : i32, i32
  }
  func.func @transform_1(%arg0: i32, %arg1: i32) -> (i32, i32) {
    %c0_i32 = arith.constant 0 : i32
    %c0_i32_0 = arith.constant 0 : i32
    return %c0_i32, %arg1 : i32, i32
  }
  func.func @transform_2(%arg0: i32, %arg1: i32) -> (i32, i32) {
    %c0_i32 = arith.constant 0 : i32
    return %arg0, %arg1 : i32, i32
  }
  func.func @transform_3(%arg0: i32, %arg1: i32) -> (i32, i32) {
    %c0_i32 = arith.constant 0 : i32
    %c0_i32_0 = arith.constant 0 : i32
    return %arg0, %c0_i32 : i32, i32
  }
}

module attributes {stable_mosaic.version = 11 : i64} {
  func.func @_bn_act_kernel(%arg0: i32, %arg1: memref<8x128xbf16, #tpu.memory_space<vmem>>, %arg2: memref<1x128xf32, #tpu.memory_space<vmem>>, %arg3: memref<1x128xf32, #tpu.memory_space<vmem>>, %arg4: memref<8x128xbf16, #tpu.memory_space<vmem>>) attributes {dimension_semantics = [#tpu.dimension_semantics<parallel>], iteration_bounds = array<i64: 1>, scalar_prefetch = 0 : i64, scratch_operands = 0 : i64, tpu.core_type = #tpu.core_type<tc>, window_params = [{transform_indices = @transform_0, window_bounds = array<i64: 8, 128>}, {pipeline_mode = #tpu.pipeline_mode<synchronous>, transform_indices = @transform_1, window_bounds = array<i64: 1, 128>}, {pipeline_mode = #tpu.pipeline_mode<synchronous>, transform_indices = @transform_2, window_bounds = array<i64: 1, 128>}, {transform_indices = @transform_3, window_bounds = array<i64: 8, 128>}]} {
    %c0 = arith.constant 0 : index
    %c0_0 = arith.constant 0 : index
    %0 = vector.load %arg1[%c0, %c0_0] : memref<8x128xbf16, #tpu.memory_space<vmem>>, vector<8x128xbf16>
    %1 = arith.extf %0 : vector<8x128xbf16> to vector<8x128xf32>
    %c0_1 = arith.constant 0 : index
    %c0_2 = arith.constant 0 : index
    %2 = vector.load %arg2[%c0_1, %c0_2] : memref<1x128xf32, #tpu.memory_space<vmem>>, vector<1x128xf32>
    %3 = vector.broadcast %2 : vector<1x128xf32> to vector<8x128xf32>
    %4 = arith.mulf %1, %3 : vector<8x128xf32>
    %c0_3 = arith.constant 0 : index
    %c0_4 = arith.constant 0 : index
    %5 = vector.load %arg3[%c0_3, %c0_4] : memref<1x128xf32, #tpu.memory_space<vmem>>, vector<1x128xf32>
    %6 = vector.broadcast %5 : vector<1x128xf32> to vector<8x128xf32>
    %7 = arith.addf %4, %6 : vector<8x128xf32>
    %cst = arith.constant 0.000000e+00 : f32
    %8 = vector.broadcast %cst : f32 to vector<8x128xf32>
    %9 = arith.maximumf %7, %8 : vector<8x128xf32>
    %10 = arith.truncf %9 : vector<8x128xf32> to vector<8x128xbf16>
    %c0_5 = arith.constant 0 : index
    %c0_6 = arith.constant 0 : index
    %11 = vector.load %arg4[%c0_5, %c0_6] : memref<8x128xbf16, #tpu.memory_space<vmem>>, vector<8x128xbf16>
    tpu.vector_store %arg4[%c0_5, %c0_6], %10 {strides = array<i32>} : memref<8x128xbf16, #tpu.memory_space<vmem>>, vector<8x128xbf16>,
    return
  }
  func.func @transform_0(%arg0: i32) -> (i32, i32) {
    %c0_i32 = arith.constant 0 : i32
    %c0_i32_0 = arith.constant 0 : i32
    return %arg0, %c0_i32 : i32, i32
  }
  func.func @transform_1(%arg0: i32) -> (i32, i32) {
    %c0_i32 = arith.constant 0 : i32
    %c0_i32_0 = arith.constant 0 : i32
    %c0_i32_1 = arith.constant 0 : i32
    return %c0_i32, %c0_i32_0 : i32, i32
  }
  func.func @transform_2(%arg0: i32) -> (i32, i32) {
    %c0_i32 = arith.constant 0 : i32
    %c0_i32_0 = arith.constant 0 : i32
    %c0_i32_1 = arith.constant 0 : i32
    return %c0_i32, %c0_i32_0 : i32, i32
  }
  func.func @transform_3(%arg0: i32) -> (i32, i32) {
    %c0_i32 = arith.constant 0 : i32
    %c0_i32_0 = arith.constant 0 : i32
    return %arg0, %c0_i32 : i32, i32
  }
}

module attributes {stable_mosaic.version = 11 : i64} {
  func.func @_mm_kernel(%arg0: i32, %arg1: i32, %arg2: memref<32x128xbf16, #tpu.memory_space<vmem>>, %arg3: memref<128x64xbf16, #tpu.memory_space<vmem>>, %arg4: memref<32x64xbf16, #tpu.memory_space<vmem>>, %arg5: memref<8x64xf32, #tpu.memory_space<vmem>>) attributes {dimension_semantics = [#tpu.dimension_semantics<parallel>, #tpu.dimension_semantics<parallel>], iteration_bounds = array<i64: 1, 1>, scalar_prefetch = 0 : i64, scratch_operands = 0 : i64, tpu.core_type = #tpu.core_type<tc>, window_params = [{transform_indices = @transform_0, window_bounds = array<i64: 32, 128>}, {transform_indices = @transform_1, window_bounds = array<i64: 128, 64>}, {transform_indices = @transform_2, window_bounds = array<i64: 32, 64>}, {transform_indices = @transform_3, window_bounds = array<i64: 8, 64>}]} {
    %c0 = arith.constant 0 : index
    %c0_0 = arith.constant 0 : index
    %0 = vector.load %arg2[%c0, %c0_0] : memref<32x128xbf16, #tpu.memory_space<vmem>>, vector<32x128xbf16>
    %c0_1 = arith.constant 0 : index
    %c0_2 = arith.constant 0 : index
    %1 = vector.load %arg3[%c0_1, %c0_2] : memref<128x64xbf16, #tpu.memory_space<vmem>>, vector<128x64xbf16>
    %cst = arith.constant dense<0.000000e+00> : vector<32x64xf32>
    %2 = tpu.matmul %0, %1, %cst {dimension_numbers = #tpu.dot_dimension_numbers<[1], [0], [0], [1], [0, 0, 1, 1], [], []>} : vector<32x128xbf16>, vector<128x64xbf16>, vector<32x64xf32> -> vector<32x64xf32>
    %cst_3 = arith.constant dense<0.000000e+00> : vector<64xf32>
    %3 = vector.multi_reduction <add>, %2, %cst_3 [0] : vector<32x64xf32> to vector<64xf32>
    %4 = vector.shape_cast %3 : vector<64xf32> to vector<1x64xf32>
    %5 = arith.mulf %2, %2 : vector<32x64xf32>
    %cst_4 = arith.constant dense<0.000000e+00> : vector<64xf32>
    %6 = vector.multi_reduction <add>, %5, %cst_4 [0] : vector<32x64xf32> to vector<64xf32>
    %7 = vector.shape_cast %6 : vector<64xf32> to vector<1x64xf32>
    %8 = tpu.iota {dimensions = array<i32: 0>} : vector<8x64xi32>
    %c0_i32 = arith.constant 0 : i32
    %9 = vector.broadcast %c0_i32 : i32 to vector<8x64xi32>
    %10 = arith.cmpi eq, %8, %9 : vector<8x64xi32>
    %c1_i32 = arith.constant 1 : i32
    %11 = vector.broadcast %c1_i32 : i32 to vector<8x64xi32>
    %12 = arith.cmpi eq, %8, %11 : vector<8x64xi32>
    %cst_5 = arith.constant 0.000000e+00 : f32
    %13 = vector.shape_cast %7 : vector<1x64xf32> to vector<1x64xf32>
    %14 = vector.broadcast %13 : vector<1x64xf32> to vector<8x64xf32>
    %15 = vector.broadcast %cst_5 : f32 to vector<8x64xf32>
    %16 = arith.select %12, %14, %15 : vector<8x64xi1>, vector<8x64xf32>
    %17 = vector.shape_cast %4 : vector<1x64xf32> to vector<1x64xf32>
    %18 = vector.broadcast %17 : vector<1x64xf32> to vector<8x64xf32>
    %19 = arith.select %10, %18, %16 : vector<8x64xi1>, vector<8x64xf32>
    %c0_6 = arith.constant 0 : index
    %c0_7 = arith.constant 0 : index
    %20 = vector.load %arg5[%c0_6, %c0_7] : memref<8x64xf32, #tpu.memory_space<vmem>>, vector<8x64xf32>
    tpu.vector_store %arg5[%c0_6, %c0_7], %19 {strides = array<i32>} : memref<8x64xf32, #tpu.memory_space<vmem>>, vector<8x64xf32>,
    %21 = arith.truncf %2 : vector<32x64xf32> to vector<32x64xbf16>
    %c0_8 = arith.constant 0 : index
    %c0_9 = arith.constant 0 : index
    %22 = vector.load %arg4[%c0_8, %c0_9] : memref<32x64xbf16, #tpu.memory_space<vmem>>, vector<32x64xbf16>
    tpu.vector_store %arg4[%c0_8, %c0_9], %21 {strides = array<i32>} : memref<32x64xbf16, #tpu.memory_space<vmem>>, vector<32x64xbf16>,
    return
  }
  func.func @transform_0(%arg0: i32, %arg1: i32) -> (i32, i32) {
    %c0_i32 = arith.constant 0 : i32
    %c0_i32_0 = arith.constant 0 : i32
    return %arg0, %c0_i32 : i32, i32
  }
  func.func @transform_1(%arg0: i32, %arg1: i32) -> (i32, i32) {
    %c0_i32 = arith.constant 0 : i32
    %c0_i32_0 = arith.constant 0 : i32
    return %c0_i32, %arg1 : i32, i32
  }
  func.func @transform_2(%arg0: i32, %arg1: i32) -> (i32, i32) {
    %c0_i32 = arith.constant 0 : i32
    return %arg0, %arg1 : i32, i32
  }
  func.func @transform_3(%arg0: i32, %arg1: i32) -> (i32, i32) {
    %c0_i32 = arith.constant 0 : i32
    %c0_i32_0 = arith.constant 0 : i32
    return %arg0, %c0_i32 : i32, i32
  }
}

module attributes {stable_mosaic.version = 11 : i64} {
  func.func @_bn_act_kernel(%arg0: i32, %arg1: memref<32x64xbf16, #tpu.memory_space<vmem>>, %arg2: memref<1x64xf32, #tpu.memory_space<vmem>>, %arg3: memref<1x64xf32, #tpu.memory_space<vmem>>, %arg4: memref<32x64xbf16, #tpu.memory_space<vmem>>) attributes {dimension_semantics = [#tpu.dimension_semantics<parallel>], iteration_bounds = array<i64: 1>, scalar_prefetch = 0 : i64, scratch_operands = 0 : i64, tpu.core_type = #tpu.core_type<tc>, window_params = [{transform_indices = @transform_0, window_bounds = array<i64: 32, 64>}, {pipeline_mode = #tpu.pipeline_mode<synchronous>, transform_indices = @transform_1, window_bounds = array<i64: 1, 64>}, {pipeline_mode = #tpu.pipeline_mode<synchronous>, transform_indices = @transform_2, window_bounds = array<i64: 1, 64>}, {transform_indices = @transform_3, window_bounds = array<i64: 32, 64>}]} {
    %c0 = arith.constant 0 : index
    %c0_0 = arith.constant 0 : index
    %0 = vector.load %arg1[%c0, %c0_0] : memref<32x64xbf16, #tpu.memory_space<vmem>>, vector<32x64xbf16>
    %1 = arith.extf %0 : vector<32x64xbf16> to vector<32x64xf32>
    %c0_1 = arith.constant 0 : index
    %c0_2 = arith.constant 0 : index
    %2 = vector.load %arg2[%c0_1, %c0_2] : memref<1x64xf32, #tpu.memory_space<vmem>>, vector<1x64xf32>
    %3 = vector.broadcast %2 : vector<1x64xf32> to vector<32x64xf32>
    %4 = arith.mulf %1, %3 : vector<32x64xf32>
    %c0_3 = arith.constant 0 : index
    %c0_4 = arith.constant 0 : index
    %5 = vector.load %arg3[%c0_3, %c0_4] : memref<1x64xf32, #tpu.memory_space<vmem>>, vector<1x64xf32>
    %6 = vector.broadcast %5 : vector<1x64xf32> to vector<32x64xf32>
    %7 = arith.addf %4, %6 : vector<32x64xf32>
    %cst = arith.constant 0.000000e+00 : f32
    %8 = vector.broadcast %cst : f32 to vector<32x64xf32>
    %9 = arith.maximumf %7, %8 : vector<32x64xf32>
    %10 = arith.truncf %9 : vector<32x64xf32> to vector<32x64xbf16>
    %c0_5 = arith.constant 0 : index
    %c0_6 = arith.constant 0 : index
    %11 = vector.load %arg4[%c0_5, %c0_6] : memref<32x64xbf16, #tpu.memory_space<vmem>>, vector<32x64xbf16>
    tpu.vector_store %arg4[%c0_5, %c0_6], %10 {strides = array<i32>} : memref<32x64xbf16, #tpu.memory_space<vmem>>, vector<32x64xbf16>,
    return
  }
  func.func @transform_0(%arg0: i32) -> (i32, i32) {
    %c0_i32 = arith.constant 0 : i32
    %c0_i32_0 = arith.constant 0 : i32
    return %arg0, %c0_i32 : i32, i32
  }
  func.func @transform_1(%arg0: i32) -> (i32, i32) {
    %c0_i32 = arith.constant 0 : i32
    %c0_i32_0 = arith.constant 0 : i32
    %c0_i32_1 = arith.constant 0 : i32
    return %c0_i32, %c0_i32_0 : i32, i32
  }
  func.func @transform_2(%arg0: i32) -> (i32, i32) {
    %c0_i32 = arith.constant 0 : i32
    %c0_i32_0 = arith.constant 0 : i32
    %c0_i32_1 = arith.constant 0 : i32
    return %c0_i32, %c0_i32_0 : i32, i32
  }
  func.func @transform_3(%arg0: i32) -> (i32, i32) {
    %c0_i32 = arith.constant 0 : i32
    %c0_i32_0 = arith.constant 0 : i32
    return %arg0, %c0_i32 : i32, i32
  }
}

module attributes {stable_mosaic.version = 11 : i64} {
  func.func @_mm_kernel(%arg0: i32, %arg1: i32, %arg2: memref<128x64xbf16, #tpu.memory_space<vmem>>, %arg3: memref<64x32xbf16, #tpu.memory_space<vmem>>, %arg4: memref<128x32xbf16, #tpu.memory_space<vmem>>, %arg5: memref<8x32xf32, #tpu.memory_space<vmem>>) attributes {dimension_semantics = [#tpu.dimension_semantics<parallel>, #tpu.dimension_semantics<parallel>], iteration_bounds = array<i64: 1, 1>, scalar_prefetch = 0 : i64, scratch_operands = 0 : i64, tpu.core_type = #tpu.core_type<tc>, window_params = [{transform_indices = @transform_0, window_bounds = array<i64: 128, 64>}, {transform_indices = @transform_1, window_bounds = array<i64: 64, 32>}, {transform_indices = @transform_2, window_bounds = array<i64: 128, 32>}, {transform_indices = @transform_3, window_bounds = array<i64: 8, 32>}]} {
    %c0 = arith.constant 0 : index
    %c0_0 = arith.constant 0 : index
    %0 = vector.load %arg2[%c0, %c0_0] : memref<128x64xbf16, #tpu.memory_space<vmem>>, vector<128x64xbf16>
    %c0_1 = arith.constant 0 : index
    %c0_2 = arith.constant 0 : index
    %1 = vector.load %arg3[%c0_1, %c0_2] : memref<64x32xbf16, #tpu.memory_space<vmem>>, vector<64x32xbf16>
    %cst = arith.constant dense<0.000000e+00> : vector<128x32xf32>
    %2 = tpu.matmul %0, %1, %cst {dimension_numbers = #tpu.dot_dimension_numbers<[1], [0], [0], [1], [0, 0, 1, 1], [], []>} : vector<128x64xbf16>, vector<64x32xbf16>, vector<128x32xf32> -> vector<128x32xf32>
    %cst_3 = arith.constant dense<0.000000e+00> : vector<32xf32>
    %3 = vector.multi_reduction <add>, %2, %cst_3 [0] : vector<128x32xf32> to vector<32xf32>
    %4 = vector.shape_cast %3 : vector<32xf32> to vector<1x32xf32>
    %5 = arith.mulf %2, %2 : vector<128x32xf32>
    %cst_4 = arith.constant dense<0.000000e+00> : vector<32xf32>
    %6 = vector.multi_reduction <add>, %5, %cst_4 [0] : vector<128x32xf32> to vector<32xf32>
    %7 = vector.shape_cast %6 : vector<32xf32> to vector<1x32xf32>
    %8 = tpu.iota {dimensions = array<i32: 0>} : vector<8x32xi32>
    %c0_i32 = arith.constant 0 : i32
    %9 = vector.broadcast %c0_i32 : i32 to vector<8x32xi32>
    %10 = arith.cmpi eq, %8, %9 : vector<8x32xi32>
    %c1_i32 = arith.constant 1 : i32
    %11 = vector.broadcast %c1_i32 : i32 to vector<8x32xi32>
    %12 = arith.cmpi eq, %8, %11 : vector<8x32xi32>
    %cst_5 = arith.constant 0.000000e+00 : f32
    %13 = vector.shape_cast %7 : vector<1x32xf32> to vector<1x32xf32>
    %14 = vector.broadcast %13 : vector<1x32xf32> to vector<8x32xf32>
    %15 = vector.broadcast %cst_5 : f32 to vector<8x32xf32>
    %16 = arith.select %12, %14, %15 : vector<8x32xi1>, vector<8x32xf32>
    %17 = vector.shape_cast %4 : vector<1x32xf32> to vector<1x32xf32>
    %18 = vector.broadcast %17 : vector<1x32xf32> to vector<8x32xf32>
    %19 = arith.select %10, %18, %16 : vector<8x32xi1>, vector<8x32xf32>
    %c0_6 = arith.constant 0 : index
    %c0_7 = arith.constant 0 : index
    %20 = vector.load %arg5[%c0_6, %c0_7] : memref<8x32xf32, #tpu.memory_space<vmem>>, vector<8x32xf32>
    tpu.vector_store %arg5[%c0_6, %c0_7], %19 {strides = array<i32>} : memref<8x32xf32, #tpu.memory_space<vmem>>, vector<8x32xf32>,
    %21 = arith.truncf %2 : vector<128x32xf32> to vector<128x32xbf16>
    %c0_8 = arith.constant 0 : index
    %c0_9 = arith.constant 0 : index
    %22 = vector.load %arg4[%c0_8, %c0_9] : memref<128x32xbf16, #tpu.memory_space<vmem>>, vector<128x32xbf16>
    tpu.vector_store %arg4[%c0_8, %c0_9], %21 {strides = array<i32>} : memref<128x32xbf16, #tpu.memory_space<vmem>>, vector<128x32xbf16>,
    return
  }
  func.func @transform_0(%arg0: i32, %arg1: i32) -> (i32, i32) {
    %c0_i32 = arith.constant 0 : i32
    %c0_i32_0 = arith.constant 0 : i32
    return %arg0, %c0_i32 : i32, i32
  }
  func.func @transform_1(%arg0: i32, %arg1: i32) -> (i32, i32) {
    %c0_i32 = arith.constant 0 : i32
    %c0_i32_0 = arith.constant 0 : i32
    return %c0_i32, %arg1 : i32, i32
  }
  func.func @transform_2(%arg0: i32, %arg1: i32) -> (i32, i32) {
    %c0_i32 = arith.constant 0 : i32
    return %arg0, %arg1 : i32, i32
  }
  func.func @transform_3(%arg0: i32, %arg1: i32) -> (i32, i32) {
    %c0_i32 = arith.constant 0 : i32
    %c0_i32_0 = arith.constant 0 : i32
    return %arg0, %c0_i32 : i32, i32
  }
}

module attributes {stable_mosaic.version = 11 : i64} {
  func.func @_bn_act_kernel(%arg0: i32, %arg1: memref<128x32xbf16, #tpu.memory_space<vmem>>, %arg2: memref<1x32xf32, #tpu.memory_space<vmem>>, %arg3: memref<1x32xf32, #tpu.memory_space<vmem>>, %arg4: memref<128x32xbf16, #tpu.memory_space<vmem>>) attributes {dimension_semantics = [#tpu.dimension_semantics<parallel>], iteration_bounds = array<i64: 1>, scalar_prefetch = 0 : i64, scratch_operands = 0 : i64, tpu.core_type = #tpu.core_type<tc>, window_params = [{transform_indices = @transform_0, window_bounds = array<i64: 128, 32>}, {pipeline_mode = #tpu.pipeline_mode<synchronous>, transform_indices = @transform_1, window_bounds = array<i64: 1, 32>}, {pipeline_mode = #tpu.pipeline_mode<synchronous>, transform_indices = @transform_2, window_bounds = array<i64: 1, 32>}, {transform_indices = @transform_3, window_bounds = array<i64: 128, 32>}]} {
    %c0 = arith.constant 0 : index
    %c0_0 = arith.constant 0 : index
    %0 = vector.load %arg1[%c0, %c0_0] : memref<128x32xbf16, #tpu.memory_space<vmem>>, vector<128x32xbf16>
    %1 = arith.extf %0 : vector<128x32xbf16> to vector<128x32xf32>
    %c0_1 = arith.constant 0 : index
    %c0_2 = arith.constant 0 : index
    %2 = vector.load %arg2[%c0_1, %c0_2] : memref<1x32xf32, #tpu.memory_space<vmem>>, vector<1x32xf32>
    %3 = vector.broadcast %2 : vector<1x32xf32> to vector<128x32xf32>
    %4 = arith.mulf %1, %3 : vector<128x32xf32>
    %c0_3 = arith.constant 0 : index
    %c0_4 = arith.constant 0 : index
    %5 = vector.load %arg3[%c0_3, %c0_4] : memref<1x32xf32, #tpu.memory_space<vmem>>, vector<1x32xf32>
    %6 = vector.broadcast %5 : vector<1x32xf32> to vector<128x32xf32>
    %7 = arith.addf %4, %6 : vector<128x32xf32>
    %cst = arith.constant 0.000000e+00 : f32
    %8 = vector.broadcast %cst : f32 to vector<128x32xf32>
    %9 = arith.maximumf %7, %8 : vector<128x32xf32>
    %10 = arith.truncf %9 : vector<128x32xf32> to vector<128x32xbf16>
    %c0_5 = arith.constant 0 : index
    %c0_6 = arith.constant 0 : index
    %11 = vector.load %arg4[%c0_5, %c0_6] : memref<128x32xbf16, #tpu.memory_space<vmem>>, vector<128x32xbf16>
    tpu.vector_store %arg4[%c0_5, %c0_6], %10 {strides = array<i32>} : memref<128x32xbf16, #tpu.memory_space<vmem>>, vector<128x32xbf16>,
    return
  }
  func.func @transform_0(%arg0: i32) -> (i32, i32) {
    %c0_i32 = arith.constant 0 : i32
    %c0_i32_0 = arith.constant 0 : i32
    return %arg0, %c0_i32 : i32, i32
  }
  func.func @transform_1(%arg0: i32) -> (i32, i32) {
    %c0_i32 = arith.constant 0 : i32
    %c0_i32_0 = arith.constant 0 : i32
    %c0_i32_1 = arith.constant 0 : i32
    return %c0_i32, %c0_i32_0 : i32, i32
  }
  func.func @transform_2(%arg0: i32) -> (i32, i32) {
    %c0_i32 = arith.constant 0 : i32
    %c0_i32_0 = arith.constant 0 : i32
    %c0_i32_1 = arith.constant 0 : i32
    return %c0_i32, %c0_i32_0 : i32, i32
  }
  func.func @transform_3(%arg0: i32) -> (i32, i32) {
    %c0_i32 = arith.constant 0 : i32
    %c0_i32_0 = arith.constant 0 : i32
    return %arg0, %c0_i32 : i32, i32
  }
}

module attributes {stable_mosaic.version = 11 : i64} {
  func.func @_mm_kernel(%arg0: i32, %arg1: i32, %arg2: memref<8x392xbf16, #tpu.memory_space<vmem>>, %arg3: memref<392x512xbf16, #tpu.memory_space<vmem>>, %arg4: memref<8x1xf32, #tpu.memory_space<vmem>>, %arg5: memref<8x512xf32, #tpu.memory_space<vmem>>) attributes {dimension_semantics = [#tpu.dimension_semantics<parallel>, #tpu.dimension_semantics<parallel>], iteration_bounds = array<i64: 1, 1>, scalar_prefetch = 0 : i64, scratch_operands = 0 : i64, tpu.core_type = #tpu.core_type<tc>, window_params = [{transform_indices = @transform_0, window_bounds = array<i64: 8, 392>}, {transform_indices = @transform_1, window_bounds = array<i64: 392, 512>}, {transform_indices = @transform_2, window_bounds = array<i64: 8, 1>}, {transform_indices = @transform_3, window_bounds = array<i64: 8, 512>}]} {
    %c0 = arith.constant 0 : index
    %c0_0 = arith.constant 0 : index
    %0 = vector.load %arg2[%c0, %c0_0] : memref<8x392xbf16, #tpu.memory_space<vmem>>, vector<8x392xbf16>
    %c0_1 = arith.constant 0 : index
    %c0_2 = arith.constant 0 : index
    %1 = vector.load %arg3[%c0_1, %c0_2] : memref<392x512xbf16, #tpu.memory_space<vmem>>, vector<392x512xbf16>
    %cst = arith.constant dense<0.000000e+00> : vector<8x512xf32>
    %2 = tpu.matmul %0, %1, %cst {dimension_numbers = #tpu.dot_dimension_numbers<[1], [0], [0], [1], [0, 0, 1, 1], [], []>} : vector<8x392xbf16>, vector<392x512xbf16>, vector<8x512xf32> -> vector<8x512xf32>
    %c0_3 = arith.constant 0 : index
    %c0_4 = arith.constant 0 : index
    %3 = vector.load %arg4[%c0_3, %c0_4] : memref<8x1xf32, #tpu.memory_space<vmem>>, vector<8x1xf32>
    %4 = vector.broadcast %3 : vector<8x1xf32> to vector<8x512xf32>
    %5 = arith.addf %2, %4 : vector<8x512xf32>
    %6 = math.tanh %5 : vector<8x512xf32>
    %c0_5 = arith.constant 0 : index
    %c0_6 = arith.constant 0 : index
    %7 = vector.load %arg5[%c0_5, %c0_6] : memref<8x512xf32, #tpu.memory_space<vmem>>, vector<8x512xf32>
    tpu.vector_store %arg5[%c0_5, %c0_6], %6 {strides = array<i32>} : memref<8x512xf32, #tpu.memory_space<vmem>>, vector<8x512xf32>,
    return
  }
  func.func @transform_0(%arg0: i32, %arg1: i32) -> (i32, i32) {
    %c0_i32 = arith.constant 0 : i32
    %c0_i32_0 = arith.constant 0 : i32
    return %arg0, %c0_i32 : i32, i32
  }
  func.func @transform_1(%arg0: i32, %arg1: i32) -> (i32, i32) {
    %c0_i32 = arith.constant 0 : i32
    %c0_i32_0 = arith.constant 0 : i32
    return %c0_i32, %arg1 : i32, i32
  }
  func.func @transform_2(%arg0: i32, %arg1: i32) -> (i32, i32) {
    %c0_i32 = arith.constant 0 : i32
    %c0_i32_0 = arith.constant 0 : i32
    return %arg0, %c0_i32 : i32, i32
  }
  func.func @transform_3(%arg0: i32, %arg1: i32) -> (i32, i32) {
    %c0_i32 = arith.constant 0 : i32
    return %arg0, %arg1 : i32, i32
  }
}

</mosaic_0001>

<bundles_post_ra>
// kernel: pallas_forward.24
= control target key start
LH: loop header
LB: loop body
LE: loop exit
PB: predicated region body
PF: predicated region fallthrough
CT: control target
= control target key end

     0   :  { %s1473_s12 = smov 0   ;;  %s1475_s13 = smov 0   ;;  %s1876_s0 = inlined_call_operand.vmem [shape: bf16[512,196], index: 0, kind: input, shape index: {}]   ;;  %s1877_s1 = inlined_call_operand.vmem [shape: bf16[196,8], index: 1, kind: input, shape index: {}]   ;;  %s1878_s2 = inlined_call_operand.vmem [shape: bf16[512,8], index: 2, kind: output, shape index: {0}]   ;;  %s1879_s3 = inlined_call_operand.vmem [shape: f32[16,8], index: 3, kind: output, shape index: {1}]  }
   0x1   :  { %s1477_s14 = smov 0  }
   0x2 LB: > { %s26_s15 = sadd.s32 1, %s1446_s13  ;;  %p1181_p0 = scmp.ge.s32.totalorder %s1450_s14, 1  ;;  %s1450_s14 = sphi %s1477_s14, %s14_s14   ;;  %s1446_s13 = sphi %s1475_s13, %s1881_s13   ;;  %s1442_s12 = sphi %s1473_s12, %s1880_s12  }
   0x3   : > { %p28_p1 = scmp.ge.s32.totalorder %s26_s15, 2  ;;  %p165_p2 = scmp.lt.s32.totalorder %s1450_s14, 3 }
   0x5   : > { %s1883_s15 = smov (%p28_p1, %s26_s15), 0  ;;  %p166_p3 = pnand %p1181_p0, %p165_p2 }
   0x6   : > { %v1367_v0 = vld [vmem:[%s1877_s1] sm:$0xff] (!%p166_p3)   ;;  %v1452_v1 = vmov (!%p166_p3), 0   ;;  %v1368_v2 = vld [vmem:[%s1877_s1 + $0x8] sm:$0xff] (!%p166_p3)   ;;  %s1182_s20 = sshll.u32 (!%p166_p3), %s1442_s12, 5  ;;  %v1369_v3 = vld [vmem:[%s1877_s1 + $0x10] sm:$0xff] (!%p166_p3)   ;;  %vm502_vm0 = vcmask (!%p166_p3), 556032  }
   0x7   : > { %169 = sbr.rel (%p166_p3) target bundleno = 381 (0x17d), region = 28  ;;  %555 = vmatprep.subr.bf16.mxu0 (!%p166_p3), %v1452_v1  ;;  %1316 = vmatprep.subr.bf16.mxu1 (!%p166_p3), %v1452_v1  ;;  %p202_p4 = scmp.lt.s32.totalorder (!%p166_p3), %s1182_s20, 63  ;;  %v1370_v4 = vld [vmem:[%s1877_s1 + $0x18] sm:$0xff] (!%p166_p3)   ;;  %v1371_v6 = vld [vmem:[%s1877_s1 + $0x20] sm:$0xff] (!%p166_p3)   ;;  %v1372_v7 = vld [vmem:[%s1877_s1 + $0x28] sm:$0xff] (!%p166_p3)   ;;  %vm551_vm1 = vcmask (!%p166_p3), 1041408  }
   0x8   : > { %556 = vmatpush1.bf16.msra.mxu0 (!%p166_p3), %v1367_v0  ;;  %1329 = vmatpush1.bf16.msra.mxu1 (!%p166_p3), %v1367_v0  ;;  %v1373_v9 = vld [vmem:[%s1877_s1 + $0x30] sm:$0xff] (!%p166_p3)   ;;  %v1374_v10 = vld [vmem:[%s1877_s1 + $0x38] sm:$0xff] (!%p166_p3)   ;;  %v1375_v11 = vld [vmem:[%s1877_s1 + $0x40] sm:$0xff] (!%p166_p3)   ;;  %vm716_vm2 = vcmask (!%p166_p3), 64512   ;;  %vm1022_vm3 = vcmask (!%p166_p3), 60416   ;;  %p221_p5 = scmp.lt.s32.totalorder (!%p166_p3), %s1442_s12, 1 }
   0x9   : > { %557 = vmatprep.subr.bf16.mxu0 (!%p166_p3), %v1452_v1  ;;  %1317 = vmatprep.subr.bf16.mxu1 (!%p166_p3), %v1452_v1  ;;  %v1376_v12 = vld [vmem:[%s1877_s1 + $0x48] sm:$0xff] (!%p166_p3)   ;;  %v1377_v13 = vld [vmem:[%s1877_s1 + $0x50] sm:$0xff] (!%p166_p3)   ;;  %v1378_v14 = vld [vmem:[%s1877_s1 + $0x58] sm:$0xff] (!%p166_p3)  }
   0xa   : > { %v1379_v15 = vld [vmem:[%s1877_s1 + $0x60] ss:$0 sps:$4 sm:$0x33] (!%p166_p3)  }
   0xb   : > { %v553_v16 = vsel (!%p166_p3), %vm551_vm1, %v1379_v15, 0 }
   0xc   : > { %558 = vmatpush1.bf16.msra.mxu0 (!%p166_p3), %v1368_v2  ;;  %1330 = vmatpush1.bf16.msra.mxu1 (!%p166_p3), %v1368_v2 }
   0xd   : > { %559 = vmatprep.subr.bf16.mxu0 (!%p166_p3), %v1452_v1  ;;  %1318 = vmatprep.subr.bf16.mxu1 (!%p166_p3), %v1452_v1 }
   0xe   : > { %s1885_s20 = smov (!%p202_p4, %s1182_s20), 63  ;;  %s1887_s12 = smov (!%p221_p5, %s1442_s12), 1 }
   0xf   : > { %s1283_s23 = sshll.u32 %s1885_s20, 3  ;;  %s1186_s25 = sshll.u32 %s1885_s20, 2 }
  0x10   : > { %560 = vmatpush1.bf16.msra.mxu0 %v1369_v3  ;;  %1331 = vmatpush1.bf16.msra.mxu1 %v1369_v3  ;;  %s1518_s28 = scalar_lea.vmem %s1876_s0, %s1283_s23  ;;  %s1619_s29 = scalar_lea.vmem %s1878_s2, %s1186_s25 }
  0x11   : > { %561 = vmatprep.subr.bf16.mxu0 %v1452_v1  ;;  %1319 = vmatprep.subr.bf16.mxu1 %v1452_v1  ;;  %v1382_v5 = vld [vmem:[%s1518_s28 + $0x4] ss:$8 sps:$4 sm:$0xff]   ;;  %v1380_v17 = vld [vmem:[%s1518_s28] ss:$8 sps:$4 sm:$0xff]   ;;  %v1383_v19 = vld [vmem:[%s1518_s28 + $0x14] ss:$8 sps:$4 sm:$0xff]  }
  0x12   : > { %1233 = vmatprep.mubr.msk.bf16.mxu0 %vm502_vm0, %v1382_v5  ;;  %v1394_v8 = vld [vmem:[%s1518_s28 + $0x84] ss:$8 sps:$4 sm:$0xff]   ;;  %v1392_v18 = vld [vmem:[%s1518_s28 + $0x80] ss:$8 sps:$4 sm:$0xff]   ;;  %v1398_v20 = vld [vmem:[%s1518_s28 + $0x94] ss:$8 sps:$4 sm:$0xff]  }
  0x13   : > { %1241 = vmatprep.mubr.msk.bf16.mxu1 %vm502_vm0, %v1394_v8  ;;  %v1385_v21 = vld [vmem:[%s1518_s28 + $0x10] ss:$8 sps:$4 sm:$0xff]   ;;  %v1386_v23 = vld [vmem:[%s1518_s28 + $0x24] ss:$8 sps:$4 sm:$0xff]   ;;  %v1388_v25 = vld [vmem:[%s1518_s28 + $0x20] ss:$8 sps:$4 sm:$0xff]  }
  0x14   : > { %562 = vmatpush1.bf16.msra.mxu0 %v1370_v4  ;;  %1332 = vmatpush1.bf16.msra.mxu1 %v1370_v4  ;;  %v1400_v22 = vld [vmem:[%s1518_s28 + $0x90] ss:$8 sps:$4 sm:$0xff]   ;;  %v1404_v24 = vld [vmem:[%s1518_s28 + $0xa4] ss:$8 sps:$4 sm:$0xff]   ;;  %v1406_v26 = vld [vmem:[%s1518_s28 + $0xa0] ss:$8 sps:$4 sm:$0xff]  }
  0x15   : > { %563 = vmatprep.subr.bf16.mxu0 %v1452_v1  ;;  %1320 = vmatprep.subr.bf16.mxu1 %v1452_v1  ;;  %v1389_v27 = vld [vmem:[%s1518_s28 + $0x34] ss:$8 sps:$4 sm:$0xff]   ;;  %v1391_v29 = vld [vmem:[%s1518_s28 + $0x30] ss:$8 sps:$4 sm:$0xff]   ;;  %v1395_v31 = vld [vmem:[%s1518_s28 + $0x44] ss:$8 sps:$4 sm:$0xff]  }
  0x16   : > { %v1410_v28 = vld [vmem:[%s1518_s28 + $0xb4] ss:$8 sps:$4 sm:$0xff]   ;;  %v1412_v30 = vld [vmem:[%s1518_s28 + $0xb0] ss:$8 sps:$4 sm:$0xff]   ;;  %v1416_v32 = vld [vmem:[%s1518_s28 + $0xc4] ss:$8 sps:$4 sm:$0xff]  }
  0x17   : > { %v1397_v33 = vld [vmem:[%s1518_s28 + $0x40] ss:$8 sps:$4 sm:$0xff]   ;;  %v1401_v35 = vld [vmem:[%s1518_s28 + $0x54] ss:$8 sps:$4 sm:$0xff]   ;;  %v1403_v37 = vld [vmem:[%s1518_s28 + $0x50] ss:$8 sps:$4 sm:$0xff]  }
  0x18   : > { %564 = vmatpush1.bf16.msra.mxu0 %v1371_v6  ;;  %1333 = vmatpush1.bf16.msra.mxu1 %v1371_v6  ;;  %v1418_v34 = vld [vmem:[%s1518_s28 + $0xc0] ss:$8 sps:$4 sm:$0xff]   ;;  %v1419_v36 = vld [vmem:[%s1518_s28 + $0xd4] ss:$8 sps:$4 sm:$0xff]   ;;  %v1421_v38 = vld [vmem:[%s1518_s28 + $0xd0] ss:$8 sps:$4 sm:$0xff]  }
  0x19   : > { %565 = vmatprep.subr.bf16.mxu0 %v1452_v1  ;;  %1321 = vmatprep.subr.bf16.mxu1 %v1452_v1  ;;  %v1407_v39 = vld [vmem:[%s1518_s28 + $0x64] ss:$8 sps:$4 sm:$0xff]   ;;  %v1409_v41 = vld [vmem:[%s1518_s28 + $0x60] ss:$8 sps:$4 sm:$0xff]   ;;  %v1413_v43 = vld [vmem:[%s1518_s28 + $0x74] ss:$8 sps:$4 sm:$0xff]  }
  0x1a   : > { %v1422_v40 = vld [vmem:[%s1518_s28 + $0xe4] ss:$8 sps:$4 sm:$0xff]   ;;  %v1424_v42 = vld [vmem:[%s1518_s28 + $0xe0] ss:$8 sps:$4 sm:$0xff]   ;;  %v1425_v44 = vld [vmem:[%s1518_s28 + $0xf4] ss:$8 sps:$4 sm:$0xff]  }
  0x1b   : > { %v1415_v45 = vld [vmem:[%s1518_s28 + $0x70] ss:$8 sps:$4 sm:$0xff]   ;;  %s1187_s20 = sshll.u32 %s1887_s12, 3 }
  0x1c   : > { %566 = vmatpush1.bf16.msra.mxu0 %v1372_v7  ;;  %1334 = vmatpush1.bf16.msra.mxu1 %v1372_v7  ;;  %v1427_v46 = vld [vmem:[%s1518_s28 + $0xf0] ss:$8 sps:$4 sm:$0xff]   ;;  %s224_s4 = scalar_lea.vmem %s1879_s3, %s1187_s20 }
  0x1d   : > { %567 = vmatprep.subr.bf16.mxu0 %v1452_v1  ;;  %1322 = vmatprep.subr.bf16.mxu1 %v1452_v1 }
  0x20   : > { %568 = vmatpush1.bf16.msra.mxu0 %v1373_v9  ;;  %1335 = vmatpush1.bf16.msra.mxu1 %v1373_v9 }
  0x21   : > { %569 = vmatprep.subr.bf16.mxu0 %v1452_v1  ;;  %1323 = vmatprep.subr.bf16.mxu1 %v1452_v1 }
  0x24   : > { %570 = vmatpush1.bf16.msra.mxu0 %v1374_v10  ;;  %1336 = vmatpush1.bf16.msra.mxu1 %v1374_v10 }
  0x25   : > { %571 = vmatprep.subr.bf16.mxu0 %v1452_v1  ;;  %1324 = vmatprep.subr.bf16.mxu1 %v1452_v1 }
  0x28   : > { %572 = vmatpush1.bf16.msra.mxu0 %v1375_v11  ;;  %1337 = vmatpush1.bf16.msra.mxu1 %v1375_v11 }
  0x29   : > { %573 = vmatprep.subr.bf16.mxu0 %v1452_v1  ;;  %1325 = vmatprep.subr.bf16.mxu1 %v1452_v1 }
  0x2c   : > { %574 = vmatpush1.bf16.msra.mxu0 %v1376_v12  ;;  %1338 = vmatpush1.bf16.msra.mxu1 %v1376_v12 }
  0x2d   : > { %575 = vmatprep.subr.bf16.mxu0 %v1452_v1  ;;  %1326 = vmatprep.subr.bf16.mxu1 %v1452_v1 }
  0x30   : > { %576 = vmatpush1.bf16.msra.mxu0 %v1377_v13  ;;  %1339 = vmatpush1.bf16.msra.mxu1 %v1377_v13 }
  0x31   : > { %577 = vmatprep.subr.bf16.mxu0 %v1452_v1  ;;  %1327 = vmatprep.subr.bf16.mxu1 %v1452_v1 }
  0x34   : > { %578 = vmatpush1.bf16.msra.mxu0 %v1378_v14  ;;  %1340 = vmatpush1.bf16.msra.mxu1 %v1378_v14 }
  0x35   : > { %579 = vmatprep.subr.bf16.mxu0 %v1452_v1  ;;  %1328 = vmatprep.subr.bf16.mxu1 %v1452_v1 }
  0x38   : > { %580 = vmatpush1.bf16.msra.mxu0 %v553_v16  ;;  %1341 = vmatpush1.bf16.msra.mxu1 %v553_v16 }
  0x3b   : > { %588 = vmatmul.mubr.bf16.vlgmr.msra.gmra.mrb[0].mxu0 %v1380_v17  ;;  %652 = vmatmul.mubr.bf16.vlgmr.msra.gmra.mrb[0].mxu1 %v1392_v18 }
  0x3c   : > { %1234 = vmatprep.mubr.msk.bf16.mxu0 %vm502_vm0, %v1383_v19  ;;  %1242 = vmatprep.mubr.msk.bf16.mxu1 %vm502_vm0, %v1398_v20 }
  0x43   : > { %596 = vmatmul.mubr.bf16.gmra.mrb[4].mxu0 %v1385_v21  ;;  %660 = vmatmul.mubr.bf16.gmra.mrb[4].mxu1 %v1400_v22 }
  0x44   : > { %1235 = vmatprep.mubr.msk.bf16.mxu0 %vm502_vm0, %v1386_v23  ;;  %1243 = vmatprep.mubr.msk.bf16.mxu1 %vm502_vm0, %v1404_v24 }
  0x4b   : > { %604 = vmatmul.mubr.bf16.gmra.mrb[8].mxu0 %v1388_v25  ;;  %668 = vmatmul.mubr.bf16.gmra.mrb[8].mxu1 %v1406_v26 }
  0x4c   : > { %1236 = vmatprep.mubr.msk.bf16.mxu0 %vm502_vm0, %v1389_v27  ;;  %1244 = vmatprep.mubr.msk.bf16.mxu1 %vm502_vm0, %v1410_v28 }
  0x53   : > { %612 = vmatmul.mubr.bf16.gmra.mrb[12].mxu0 %v1391_v29  ;;  %676 = vmatmul.mubr.bf16.gmra.mrb[12].mxu1 %v1412_v30 }
  0x54   : > { %1237 = vmatprep.mubr.msk.bf16.mxu0 %vm502_vm0, %v1395_v31  ;;  %1245 = vmatprep.mubr.msk.bf16.mxu1 %vm502_vm0, %v1416_v32 }
  0x5b   : > { %620 = vmatmul.mubr.bf16.gmra.mrb[16].mxu0 %v1397_v33  ;;  %684 = vmatmul.mubr.bf16.gmra.mrb[16].mxu1 %v1418_v34 }
  0x5c   : > { %1238 = vmatprep.mubr.msk.bf16.mxu0 %vm502_vm0, %v1401_v35  ;;  %1246 = vmatprep.mubr.msk.bf16.mxu1 %vm502_vm0, %v1419_v36 }
  0x63   : > { %628 = vmatmul.mubr.bf16.gmra.mrb[20].mxu0 %v1403_v37  ;;  %692 = vmatmul.mubr.bf16.gmra.mrb[20].mxu1 %v1421_v38 }
  0x64   : > { %1239 = vmatprep.mubr.msk.bf16.mxu0 %vm502_vm0, %v1407_v39  ;;  %1247 = vmatprep.mubr.msk.bf16.mxu1 %vm502_vm0, %v1422_v40 }
  0x6b   : > { %636 = vmatmul.mubr.bf16.gmra.mrb[24].mxu0 %v1409_v41  ;;  %700 = vmatmul.mubr.bf16.gmra.mrb[24].mxu1 %v1424_v42 }
  0x6c   : > { %1240 = vmatprep.mubr.msk.bf16.mxu0 %vm502_vm0, %v1413_v43  ;;  %1248 = vmatprep.mubr.msk.bf16.mxu1 %vm502_vm0, %v1425_v44 }
  0x73   : > { %644 = vmatmul.mubr.bf16.gmra.mrb[28].mxu0 %v1415_v45  ;;  %708 = vmatmul.mubr.bf16.gmra.mrb[28].mxu1 %v1427_v46 }
 0x10e   : > { %v589_v47 = vpop.f32.mrb[0].mxu0  ;;  %v1621_v48 = vpop.f32.mrb[0].mxu1 }
 0x10f   : > { %v786_v49 = vmul.f32 %v589_v47, %v589_v47  ;;  %v1284_v50 = vpack.c.bf16 %v589_v47, %v589_v47  ;;  %v591_v51 = vpop.f32.mrb[1].mxu0  ;;  %v655_v52 = vpop.f32.mrb[1].mxu1  ;;  %v1300_v54 = vpack.c.bf16 %v1621_v48, %v1621_v48  ;;  %v717_v56 = vsel %vm716_vm2, %v589_v47, 0.0 }
 0x110   : > { %v592_v53 = vpop.f32.mrb[2].mxu0  ;;  %v1625_v55 = vpop.f32.mrb[2].mxu1 }
 0x111   : > { %1023 = vst.msk [vmem:[%s1619_s29] sm:$0xf] %vm1022_vm3, %v1284_v50  ;;  %v718_v57 = vsel %vm716_vm2, %v592_v53, 0.0  ;;  %v787_v58 = vmul.f32 %v592_v53, %v592_v53  ;;  %v1285_v59 = vpack.c.bf16 %v592_v53, %v592_v53  ;;  %v594_v60 = vpop.f32.mrb[3].mxu0  ;;  %v658_v61 = vpop.f32.mrb[3].mxu1  ;;  %v818_v63 = vsel %vm716_vm2, %v786_v49, 0.0 }
 0x112   : > { %v719_v62 = vadd.f32 %v718_v57, %v717_v56  ;;  %1039 = vst.msk [vmem:[%s1619_s29 + $0x40] sm:$0xf] %vm1022_vm3, %v1300_v54  ;;  %v1301_v1 = vpack.c.bf16 %v1625_v55, %v1625_v55 }
 0x113   : > { %v819_v0 = vsel %vm716_vm2, %v787_v58, 0.0  ;;  %1024 = vst.msk [vmem:[%s1619_s29 + $0x4] sm:$0xf] %vm1022_vm3, %v1285_v59 }
 0x114   : > { %v820_v2 = vadd.f32 %v819_v0, %v818_v63  ;;  %1040 = vst.msk [vmem:[%s1619_s29 + $0x44] sm:$0xf] %vm1022_vm3, %v1301_v1 }
 0x116   : > { %v597_v3 = vpop.f32.mrb[4].mxu0  ;;  %v1641_v4 = vpop.f32.mrb[4].mxu1 }
 0x117   : > { %v720_v5 = vsel %vm716_vm2, %v597_v3, 0.0  ;;  %v788_v6 = vmul.f32 %v597_v3, %v597_v3  ;;  %v1286_v7 = vpack.c.bf16 %v597_v3, %v597_v3  ;;  %v599_v8 = vpop.f32.mrb[5].mxu0  ;;  %v663_v9 = vpop.f32.mrb[5].mxu1  ;;  %v1302_v12 = vpack.c.bf16 %v1641_v4, %v1641_v4 }
 0x118   : > { %v721_v10 = vadd.f32 %v720_v5, %v719_v62  ;;  %v600_v11 = vpop.f32.mrb[6].mxu0  ;;  %v1646_v13 = vpop.f32.mrb[6].mxu1 }
 0x119   : > { %v821_v14 = vsel %vm716_vm2, %v788_v6, 0.0  ;;  %1025 = vst.msk [vmem:[%s1619_s29 + $0x8] sm:$0xf] %vm1022_vm3, %v1286_v7  ;;  %v722_v15 = vsel %vm716_vm2, %v600_v11, 0.0  ;;  %v789_v16 = vmul.f32 %v600_v11, %v600_v11  ;;  %v1287_v17 = vpack.c.bf16 %v600_v11, %v600_v11  ;;  %v602_v18 = vpop.f32.mrb[7].mxu0  ;;  %v666_v19 = vpop.f32.mrb[7].mxu1 }
 0x11a   : > { %v822_v20 = vadd.f32 %v821_v14, %v820_v2  ;;  %v723_v21 = vadd.f32 %v722_v15, %v721_v10  ;;  %1041 = vst.msk [vmem:[%s1619_s29 + $0x48] sm:$0xf] %vm1022_vm3, %v1302_v12  ;;  %v1303_v23 = vpack.c.bf16 %v1646_v13, %v1646_v13 }
 0x11b   : > { %v823_v22 = vsel %vm716_vm2, %v789_v16, 0.0  ;;  %1026 = vst.msk [vmem:[%s1619_s29 + $0xc] sm:$0xf] %vm1022_vm3, %v1287_v17 }
 0x11c   : > { %v824_v24 = vadd.f32 %v823_v22, %v822_v20  ;;  %1042 = vst.msk [vmem:[%s1619_s29 + $0x4c] sm:$0xf] %vm1022_vm3, %v1303_v23 }
 0x11e   : > { %v605_v25 = vpop.f32.mrb[8].mxu0  ;;  %v1661_v26 = vpop.f32.mrb[8].mxu1 }
 0x11f   : > { %v724_v27 = vsel %vm716_vm2, %v605_v25, 0.0  ;;  %v790_v28 = vmul.f32 %v605_v25, %v605_v25  ;;  %v1288_v29 = vpack.c.bf16 %v605_v25, %v605_v25  ;;  %v607_v30 = vpop.f32.mrb[9].mxu0  ;;  %v671_v31 = vpop.f32.mrb[9].mxu1  ;;  %v1304_v34 = vpack.c.bf16 %v1661_v26, %v1661_v26 }
 0x120   : > { %v725_v32 = vadd.f32 %v724_v27, %v723_v21  ;;  %v608_v33 = vpop.f32.mrb[10].mxu0  ;;  %v1666_v35 = vpop.f32.mrb[10].mxu1 }
 0x121   : > { %v825_v36 = vsel %vm716_vm2, %v790_v28, 0.0  ;;  %1027 = vst.msk [vmem:[%s1619_s29 + $0x10] sm:$0xf] %vm1022_vm3, %v1288_v29  ;;  %v726_v37 = vsel %vm716_vm2, %v608_v33, 0.0  ;;  %v791_v38 = vmul.f32 %v608_v33, %v608_v33  ;;  %v1289_v39 = vpack.c.bf16 %v608_v33, %v608_v33  ;;  %v610_v40 = vpop.f32.mrb[11].mxu0  ;;  %v674_v41 = vpop.f32.mrb[11].mxu1 }
 0x122   : > { %v826_v42 = vadd.f32 %v825_v36, %v824_v24  ;;  %v727_v43 = vadd.f32 %v726_v37, %v725_v32  ;;  %1043 = vst.msk [vmem:[%s1619_s29 + $0x50] sm:$0xf] %vm1022_vm3, %v1304_v34  ;;  %v1305_v45 = vpack.c.bf16 %v1666_v35, %v1666_v35 }
 0x123   : > { %v827_v44 = vsel %vm716_vm2, %v791_v38, 0.0  ;;  %1028 = vst.msk [vmem:[%s1619_s29 + $0x14] sm:$0xf] %vm1022_vm3, %v1289_v39 }
 0x124   : > { %v828_v46 = vadd.f32 %v827_v44, %v826_v42  ;;  %1044 = vst.msk [vmem:[%s1619_s29 + $0x54] sm:$0xf] %vm1022_vm3, %v1305_v45 }
 0x126   : > { %v613_v47 = vpop.f32.mrb[12].mxu0  ;;  %v1681_v49 = vpop.f32.mrb[12].mxu1 }
 0x127   : > { %v728_v50 = vsel %vm716_vm2, %v613_v47, 0.0  ;;  %v792_v51 = vmul.f32 %v613_v47, %v613_v47  ;;  %v1290_v52 = vpack.c.bf16 %v613_v47, %v613_v47  ;;  %v615_v53 = vpop.f32.mrb[13].mxu0  ;;  %v679_v54 = vpop.f32.mrb[13].mxu1  ;;  %v1306_v58 = vpack.c.bf16 %v1681_v49, %v1681_v49 }
 0x128   : > { %v729_v56 = vadd.f32 %v728_v50, %v727_v43  ;;  %v616_v57 = vpop.f32.mrb[14].mxu0  ;;  %v1686_v59 = vpop.f32.mrb[14].mxu1 }
 0x129   : > { %v829_v60 = vsel %vm716_vm2, %v792_v51, 0.0  ;;  %1029 = vst.msk [vmem:[%s1619_s29 + $0x18] sm:$0xf] %vm1022_vm3, %v1290_v52  ;;  %v730_v61 = vsel %vm716_vm2, %v616_v57, 0.0  ;;  %v793_v62 = vmul.f32 %v616_v57, %v616_v57  ;;  %v1291_v63 = vpack.c.bf16 %v616_v57, %v616_v57  ;;  %v618_v0 = vpop.f32.mrb[15].mxu0  ;;  %v682_v1 = vpop.f32.mrb[15].mxu1 }
 0x12a   : > { %v830_v2 = vadd.f32 %v829_v60, %v828_v46  ;;  %v731_v3 = vadd.f32 %v730_v61, %v729_v56  ;;  %1045 = vst.msk [vmem:[%s1619_s29 + $0x58] sm:$0xf] %vm1022_vm3, %v1306_v58  ;;  %v1307_v6 = vpack.c.bf16 %v1686_v59, %v1686_v59 }
 0x12b   : > { %v831_v5 = vsel %vm716_vm2, %v793_v62, 0.0  ;;  %1030 = vst.msk [vmem:[%s1619_s29 + $0x1c] sm:$0xf] %vm1022_vm3, %v1291_v63 }
 0x12c   : > { %v832_v7 = vadd.f32 %v831_v5, %v830_v2  ;;  %1046 = vst.msk [vmem:[%s1619_s29 + $0x5c] sm:$0xf] %vm1022_vm3, %v1307_v6 }
 0x12e   : > { %v621_v8 = vpop.f32.mrb[16].mxu0  ;;  %v1701_v9 = vpop.f32.mrb[16].mxu1 }
 0x12f   : > { %v732_v10 = vsel %vm716_vm2, %v621_v8, 0.0  ;;  %v794_v11 = vmul.f32 %v621_v8, %v621_v8  ;;  %v1292_v12 = vpack.c.bf16 %v621_v8, %v621_v8  ;;  %v623_v14 = vpop.f32.mrb[17].mxu0  ;;  %v687_v15 = vpop.f32.mrb[17].mxu1  ;;  %v1308_v18 = vpack.c.bf16 %v1701_v9, %v1701_v9 }
 0x130   : > { %v733_v16 = vadd.f32 %v732_v10, %v731_v3  ;;  %v624_v17 = vpop.f32.mrb[18].mxu0  ;;  %v1706_v19 = vpop.f32.mrb[18].mxu1 }
 0x131   : > { %v833_v20 = vsel %vm716_vm2, %v794_v11, 0.0  ;;  %1031 = vst.msk [vmem:[%s1619_s29 + $0x20] sm:$0xf] %vm1022_vm3, %v1292_v12  ;;  %v734_v21 = vsel %vm716_vm2, %v624_v17, 0.0  ;;  %v795_v22 = vmul.f32 %v624_v17, %v624_v17  ;;  %v1293_v23 = vpack.c.bf16 %v624_v17, %v624_v17  ;;  %v626_v24 = vpop.f32.mrb[19].mxu0  ;;  %v690_v25 = vpop.f32.mrb[19].mxu1 }
 0x132   : > { %v834_v27 = vadd.f32 %v833_v20, %v832_v7  ;;  %v735_v28 = vadd.f32 %v734_v21, %v733_v16  ;;  %1047 = vst.msk [vmem:[%s1619_s29 + $0x60] sm:$0xf] %vm1022_vm3, %v1308_v18  ;;  %v1309_v30 = vpack.c.bf16 %v1706_v19, %v1706_v19 }
 0x133   : > { %v835_v29 = vsel %vm716_vm2, %v795_v22, 0.0  ;;  %1032 = vst.msk [vmem:[%s1619_s29 + $0x24] sm:$0xf] %vm1022_vm3, %v1293_v23 }
 0x134   : > { %v836_v31 = vadd.f32 %v835_v29, %v834_v27  ;;  %1048 = vst.msk [vmem:[%s1619_s29 + $0x64] sm:$0xf] %vm1022_vm3, %v1309_v30  ;;  %v802_v29 = vmul.f32 %v1621_v48, %v1621_v48 }
 0x136   : > { %v629_v32 = vpop.f32.mrb[20].mxu0  ;;  %v1721_v33 = vpop.f32.mrb[20].mxu1 }
 0x137   : > { %v736_v34 = vsel %vm716_vm2, %v629_v32, 0.0  ;;  %v796_v36 = vmul.f32 %v629_v32, %v629_v32  ;;  %v1294_v37 = vpack.c.bf16 %v629_v32, %v629_v32  ;;  %v631_v38 = vpop.f32.mrb[21].mxu0  ;;  %v695_v39 = vpop.f32.mrb[21].mxu1  ;;  %v1310_v42 = vpack.c.bf16 %v1721_v33, %v1721_v33 }
 0x138   : > { %v737_v40 = vadd.f32 %v736_v34, %v735_v28  ;;  %v632_v41 = vpop.f32.mrb[22].mxu0  ;;  %v1726_v43 = vpop.f32.mrb[22].mxu1 }
 0x139   : > { %v837_v44 = vsel %vm716_vm2, %v796_v36, 0.0  ;;  %1033 = vst.msk [vmem:[%s1619_s29 + $0x28] sm:$0xf] %vm1022_vm3, %v1294_v37  ;;  %v738_v45 = vsel %vm716_vm2, %v632_v41, 0.0  ;;  %v797_v46 = vmul.f32 %v632_v41, %v632_v41  ;;  %v1295_v47 = vpack.c.bf16 %v632_v41, %v632_v41  ;;  %v634_v50 = vpop.f32.mrb[23].mxu0  ;;  %v698_v51 = vpop.f32.mrb[23].mxu1 }
 0x13a   : > { %v838_v52 = vadd.f32 %v837_v44, %v836_v31  ;;  %v739_v53 = vadd.f32 %v738_v45, %v737_v40  ;;  %1049 = vst.msk [vmem:[%s1619_s29 + $0x68] sm:$0xf] %vm1022_vm3, %v1310_v42  ;;  %v1311_v56 = vpack.c.bf16 %v1726_v43, %v1726_v43  ;;  %v748_v45 = vsel %vm716_vm2, %v1621_v48, 0.0 }
 0x13b   : > { %v839_v54 = vsel %vm716_vm2, %v797_v46, 0.0  ;;  %1034 = vst.msk [vmem:[%s1619_s29 + $0x2c] sm:$0xf] %vm1022_vm3, %v1295_v47  ;;  %v803_v46 = vmul.f32 %v1625_v55, %v1625_v55  ;;  %v804_v48 = vmul.f32 %v1641_v4, %v1641_v4 }
 0x13c   : > { %v840_v57 = vadd.f32 %v839_v54, %v838_v52  ;;  %1050 = vst.msk [vmem:[%s1619_s29 + $0x6c] sm:$0xf] %vm1022_vm3, %v1311_v56  ;;  %v750_v54 = vsel %vm716_vm2, %v1625_v55, 0.0  ;;  %v754_v55 = vsel %vm716_vm2, %v1646_v13, 0.0 }
 0x13e   : > { %v637_v58 = vpop.f32.mrb[24].mxu0  ;;  %v1741_v60 = vpop.f32.mrb[24].mxu1 }
 0x13f   : > { %v740_v61 = vsel %vm716_vm2, %v637_v58, 0.0  ;;  %v798_v62 = vmul.f32 %v637_v58, %v637_v58  ;;  %v1296_v63 = vpack.c.bf16 %v637_v58, %v637_v58  ;;  %v639_v0 = vpop.f32.mrb[25].mxu0  ;;  %v703_v1 = vpop.f32.mrb[25].mxu1  ;;  %v1312_v5 = vpack.c.bf16 %v1741_v60, %v1741_v60 }
 0x140   : > { %v741_v2 = vadd.f32 %v740_v61, %v739_v53  ;;  %v640_v3 = vpop.f32.mrb[26].mxu0  ;;  %v1746_v6 = vpop.f32.mrb[26].mxu1  ;;  %v849_v53 = vsel %vm716_vm2, %v802_v29, 0.0  ;;  %v851_v58 = vsel %vm716_vm2, %v803_v46, 0.0  ;;  %v752_v61 = vsel %vm716_vm2, %v1641_v4, 0.0 }
 0x141   : > { %v841_v7 = vsel %vm716_vm2, %v798_v62, 0.0  ;;  %1035 = vst.msk [vmem:[%s1619_s29 + $0x30] sm:$0xf] %vm1022_vm3, %v1296_v63  ;;  %v742_v8 = vsel %vm716_vm2, %v640_v3, 0.0  ;;  %v799_v10 = vmul.f32 %v640_v3, %v640_v3  ;;  %v1297_v11 = vpack.c.bf16 %v640_v3, %v640_v3  ;;  %v642_v12 = vpop.f32.mrb[27].mxu0  ;;  %v706_v14 = vpop.f32.mrb[27].mxu1 }
 0x142   : > { %v842_v15 = vadd.f32 %v841_v7, %v840_v57  ;;  %v743_v16 = vadd.f32 %v742_v8, %v741_v2  ;;  %1051 = vst.msk [vmem:[%s1619_s29 + $0x70] sm:$0xf] %vm1022_vm3, %v1312_v5  ;;  %v1313_v18 = vpack.c.bf16 %v1746_v6, %v1746_v6  ;;  %v805_v62 = vmul.f32 %v1646_v13, %v1646_v13 }
 0x143   : > { %v843_v17 = vsel %vm716_vm2, %v799_v10, 0.0  ;;  %1036 = vst.msk [vmem:[%s1619_s29 + $0x34] sm:$0xf] %vm1022_vm3, %v1297_v11  ;;  %v853_v1 = vsel %vm716_vm2, %v804_v48, 0.0  ;;  %v806_v2 = vmul.f32 %v1661_v26, %v1661_v26  ;;  %v756_v4 = vsel %vm716_vm2, %v1661_v26, 0.0 }
 0x144   : > { %v844_v20 = vadd.f32 %v843_v17, %v842_v15  ;;  %1052 = vst.msk [vmem:[%s1619_s29 + $0x74] sm:$0xf] %vm1022_vm3, %v1313_v18  ;;  %v855_v7 = vsel %vm716_vm2, %v805_v62, 0.0  ;;  %v807_v8 = vmul.f32 %v1666_v35, %v1666_v35  ;;  %v758_v13 = vsel %vm716_vm2, %v1666_v35, 0.0 }
 0x145   : > { %v857_v12 = vsel %vm716_vm2, %v806_v2, 0.0  ;;  %v808_v14 = vmul.f32 %v1681_v49, %v1681_v49  ;;  %v760_v26 = vsel %vm716_vm2, %v1681_v49, 0.0  ;;  %v809_v18 = vmul.f32 %v1686_v59, %v1686_v59 }
 0x146   : > { %v645_v21 = vpop.f32.mrb[28].mxu0  ;;  %v1761_v22 = vpop.f32.mrb[28].mxu1  ;;  %v859_v17 = vsel %vm716_vm2, %v807_v8, 0.0  ;;  %v762_v35 = vsel %vm716_vm2, %v1686_v59, 0.0  ;;  %v764_v49 = vsel %vm716_vm2, %v1701_v9, 0.0  ;;  %v811_v29 = vmul.f32 %v1706_v19, %v1706_v19 }
 0x147   : > { %v744_v23 = vsel %vm716_vm2, %v645_v21, 0.0  ;;  %v800_v24 = vmul.f32 %v645_v21, %v645_v21  ;;  %v1298_v25 = vpack.c.bf16 %v645_v21, %v645_v21  ;;  %v647_v27 = vpop.f32.mrb[29].mxu0  ;;  %v711_v28 = vpop.f32.mrb[29].mxu1  ;;  %v1314_v32 = vpack.c.bf16 %v1761_v22, %v1761_v22 }
 0x148   : > { %v745_v30 = vadd.f32 %v744_v23, %v743_v16  ;;  %v648_v31 = vpop.f32.mrb[30].mxu0  ;;  %v1768_v34 = vpop.f32.mrb[30].mxu1  ;;  %v861_v23 = vsel %vm716_vm2, %v808_v14, 0.0  ;;  %v863_v28 = vsel %vm716_vm2, %v809_v18, 0.0  ;;  %v766_v59 = vsel %vm716_vm2, %v1706_v19, 0.0 }
 0x149   : > { %v845_v36 = vsel %vm716_vm2, %v800_v24, 0.0  ;;  %1037 = vst.msk [vmem:[%s1619_s29 + $0x38] sm:$0xf] %vm1022_vm3, %v1298_v25  ;;  %v746_v37 = vsel %vm716_vm2, %v648_v31, 0.0  ;;  %v801_v38 = vmul.f32 %v648_v31, %v648_v31  ;;  %v1299_v39 = vpack.c.bf16 %v648_v31, %v648_v31  ;;  %v650_v40 = vpop.f32.mrb[31].mxu0  ;;  %v714_v41 = vpop.f32.mrb[31].mxu1 }
 0x14a   : > { %v846_v42 = vadd.f32 %v845_v36, %v844_v20  ;;  %v747_v44 = vadd.f32 %v746_v37, %v745_v30  ;;  %1053 = vst.msk [vmem:[%s1619_s29 + $0x78] sm:$0xf] %vm1022_vm3, %v1314_v32  ;;  %v1315_v50 = vpack.c.bf16 %v1768_v34, %v1768_v34  ;;  %v810_v24 = vmul.f32 %v1701_v9, %v1701_v9 }
 0x14b   : > { %v847_v47 = vsel %vm716_vm2, %v801_v38, 0.0  ;;  %1038 = vst.msk [vmem:[%s1619_s29 + $0x3c] sm:$0xf] %vm1022_vm3, %v1299_v39  ;;  %v812_v36 = vmul.f32 %v1721_v33, %v1721_v33  ;;  %v867_v39 = vsel %vm716_vm2, %v811_v29, 0.0  ;;  %v768_v9 = vsel %vm716_vm2, %v1721_v33, 0.0 }
 0x14c   : > { %v749_v51 = vadd.f32 %v748_v45, %v747_v44  ;;  %v848_v52 = vadd.f32 %v847_v47, %v846_v42  ;;  %1054 = vst.msk [vmem:[%s1619_s29 + $0x7c] sm:$0xf] %vm1022_vm3, %v1315_v50  ;;  %v865_v32 = vsel %vm716_vm2, %v810_v24, 0.0  ;;  %v813_v40 = vmul.f32 %v1726_v43, %v1726_v43 }
 0x14d   : > { %v869_v44 = vsel %vm716_vm2, %v812_v36, 0.0  ;;  %v770_v19 = vsel %vm716_vm2, %v1726_v43, 0.0  ;;  %v814_v45 = vmul.f32 %v1741_v60, %v1741_v60  ;;  %v772_v33 = vsel %vm716_vm2, %v1741_v60, 0.0 }
 0x14e   : > { %v751_v56 = vadd.f32 %v750_v54, %v749_v51  ;;  %v850_v57 = vadd.f32 %v849_v53, %v848_v52  ;;  %v871_v50 = vsel %vm716_vm2, %v813_v40, 0.0  ;;  %v815_v51 = vmul.f32 %v1746_v6, %v1746_v6 }
 0x14f   : > { %v816_v52 = vmul.f32 %v1761_v22, %v1761_v22  ;;  %v873_v43 = vsel %vm716_vm2, %v814_v45, 0.0  ;;  %v774_v48 = vsel %vm716_vm2, %v1746_v6, 0.0  ;;  %v817_v62 = vmul.f32 %v1768_v34, %v1768_v34 }
 0x150   : > { %v753_v63 = vadd.f32 %v752_v61, %v751_v56  ;;  %v852_v0 = vadd.f32 %v851_v58, %v850_v57  ;;  %v776_v56 = vsel %vm716_vm2, %v1761_v22, 0.0  ;;  %v875_v60 = vsel %vm716_vm2, %v815_v51, 0.0 }
 0x151   : > { %v877_v61 = vsel %vm716_vm2, %v816_v52, 0.0  ;;  %v879_v2 = vsel %vm716_vm2, %v817_v62, 0.0 }
 0x152   : > { %v755_v3 = vadd.f32 %v754_v55, %v753_v63  ;;  %v854_v5 = vadd.f32 %v853_v1, %v852_v0  ;;  %v778_v1 = vsel %vm716_vm2, %v1768_v34, 0.0 }
 0x154   : > { %v856_v10 = vadd.f32 %v855_v7, %v854_v5  ;;  %v757_v11 = vadd.f32 %v756_v4, %v755_v3  ;;  %v887_v4 = vlaneseq }
 0x156   : > { %v759_v15 = vadd.f32 %v758_v13, %v757_v11  ;;  %v858_v16 = vadd.f32 %v857_v12, %v856_v10  ;;  %v888_v13 = vshrl.u32 %v887_v4, 7 }
 0x158   : > { %v761_v20 = vadd.f32 %v760_v26, %v759_v15  ;;  %v860_v21 = vadd.f32 %v859_v17, %v858_v16  ;;  %vm890_vm4 = vcmp.eq.s32.totalorder %v888_v13, 1  ;;  %vm889_vm5 = vcmp.eq.s32.totalorder %v888_v13, 0 }
 0x15a   : > { %v763_v25 = vadd.f32 %v762_v35, %v761_v20  ;;  %v862_v27 = vadd.f32 %v861_v23, %v860_v21 }
 0x15c   : > { %v765_v30 = vadd.f32 %v764_v49, %v763_v25  ;;  %v864_v31 = vadd.f32 %v863_v28, %v862_v27 }
 0x15e   : > { %v866_v37 = vadd.f32 %v865_v32, %v864_v31  ;;  %v767_v38 = vadd.f32 %v766_v59, %v765_v30 }
 0x160   : > { %v868_v41 = vadd.f32 %v867_v39, %v866_v37  ;;  %v769_v42 = vadd.f32 %v768_v9, %v767_v38 }
 0x162   : > { %v870_v46 = vadd.f32 %v869_v44, %v868_v41  ;;  %v771_v47 = vadd.f32 %v770_v19, %v769_v42 }
 0x164   : > { %v872_v53 = vadd.f32 %v871_v50, %v870_v46  ;;  %v773_v54 = vadd.f32 %v772_v33, %v771_v47 }
 0x166   : > { %v874_v57 = vadd.f32 %v873_v43, %v872_v53  ;;  %v775_v58 = vadd.f32 %v774_v48, %v773_v54 }
 0x168   : > { %v876_v63 = vadd.f32 %v875_v60, %v874_v57  ;;  %v777_v0 = vadd.f32 %v776_v56, %v775_v58 }
 0x16a   : > { %v878_v55 = vadd.f32 %v877_v61, %v876_v63  ;;  %v779_v6 = vadd.f32 %v778_v1, %v777_v0 }
 0x16c   : > { %v780_v22 = vrot.slane %v779_v6, 4  ;;  %v880_v3 = vadd.f32 %v879_v2, %v878_v55 }
 0x16e   : > { %v781_v5 = vadd.f32 %v780_v22, %v779_v6  ;;  %v881_v7 = vrot.slane %v880_v3, 4 }
 0x170   : > { %v782_v8 = vrot.slane %v781_v5, 2  ;;  %v882_v10 = vadd.f32 %v881_v7, %v880_v3 }
 0x172   : > { %v783_v11 = vadd.f32 %v782_v8, %v781_v5  ;;  %v883_v12 = vrot.slane %v882_v10, 2 }
 0x174   : > { %v884_v14 = vadd.f32 %v883_v12, %v882_v10  ;;  %v784_v15 = vrot.slane %v783_v11, 1 }
 0x176   : > { %v885_v34 = vrot.slane %v884_v14, 1  ;;  %v785_v17 = vadd.f32 %v784_v15, %v783_v11 }
 0x178   : > { %v886_v16 = vadd.f32 %v885_v34, %v884_v14 }
 0x17a   : > { %v891_v26 = vsel %vm890_vm4, %v886_v16, 0.0 }
 0x17b   : > { %v892_v18 = vsel %vm889_vm5, %v785_v17, %v891_v26 }
 0x17c   : > { %893 = vst.msk [vmem:[%s224_s4] sm:$0xff] %vm716_vm2, %v892_v18 }
 0x17d PF: > { %s14_s14 = sadd.s32 1, %s1450_s14   ;;  %s1880_s12 = smov %s1446_s13 }
 0x17e   : > { %p11_p6 = scmp.ge.s32.totalorder %s14_s14, 4   ;;  %s1881_s13 = smov %s1883_s15 }
 0x180   :  { %13 = sbr.rel (!%p11_p6) target bundleno = 2 (0x2), region = 73 }

// kernel: pallas_forward.25
= control target key start
LH: loop header
LB: loop body
LE: loop exit
PB: predicated region body
PF: predicated region fallthrough
CT: control target
= control target key end

     0   :  { %vm604_vm0 = vcmask 60416   ;;  %s1472_s0 = inlined_call_operand.vmem [shape: bf16[512,8], index: 0, kind: input, shape index: {}]   ;;  %s1473_s1 = inlined_call_operand.vmem [shape: f32[1,8], index: 1, kind: input, shape index: {}]   ;;  %s1474_s2 = inlined_call_operand.vmem [shape: f32[1,8], index: 2, kind: input, shape index: {}]   ;;  %s1475_s3 = inlined_call_operand.vmem [shape: bf16[512,8], index: 3, kind: output, shape index: {}]  }
   0x1   :  { %v804_v0 = vld [vmem:[%s1472_s0] sm:$0xff]   ;;  %v931_v4 = vld [vmem:[%s1472_s0 + $0x8] sm:$0xff]   ;;  %v932_v5 = vld [vmem:[%s1472_s0 + $0x10] sm:$0xff]  }
   0x2   :  { %v988_v1 = vld [vmem:[%s1473_s1] ss:$0 sm:$0xff]  ;;  %v805_v2 = vunpack.c.l.bf16 %v804_v0  ;;  %v806_v3 = vunpack.c.h.bf16 %v804_v0  ;;  %v933_v6 = vld [vmem:[%s1472_s0 + $0x18] sm:$0xff]   ;;  %v809_v8 = vunpack.c.l.bf16 %v931_v4  ;;  %v810_v9 = vunpack.c.h.bf16 %v931_v4  ;;  %v935_v41 = vld [vmem:[%s1472_s0 + $0x28] sm:$0xff]  }
   0x3   :  { %v1002_v7 = vld [vmem:[%s1474_s2] ss:$0 sm:$0xff]  ;;  %v813_v10 = vunpack.c.l.bf16 %v932_v5  ;;  %v814_v11 = vunpack.c.h.bf16 %v932_v5  ;;  %v817_v14 = vunpack.c.l.bf16 %v933_v6  ;;  %v818_v15 = vunpack.c.h.bf16 %v933_v6  ;;  %v936_v42 = vld [vmem:[%s1472_s0 + $0x30] sm:$0xff]   ;;  %v937_v47 = vld [vmem:[%s1472_s0 + $0x38] sm:$0xff]  }
   0x4   :  { %v149_v12 = vmul.f32 %v805_v2, %v988_v1  ;;  %v150_v13 = vmul.f32 %v806_v3, %v988_v1  ;;  %v151_v16 = vmul.f32 %v809_v8, %v988_v1  ;;  %v152_v17 = vmul.f32 %v810_v9, %v988_v1  ;;  %v934_v36 = vld [vmem:[%s1472_s0 + $0x20] sm:$0xff]  }
   0x5   :  { %v153_v18 = vmul.f32 %v813_v10, %v988_v1  ;;  %v154_v19 = vmul.f32 %v814_v11, %v988_v1  ;;  %v155_v22 = vmul.f32 %v817_v14, %v988_v1  ;;  %v156_v23 = vmul.f32 %v818_v15, %v988_v1 }
   0x6   :  { %v220_v20 = vadd.f32 %v1002_v7, %v149_v12  ;;  %v221_v21 = vadd.f32 %v1002_v7, %v150_v13  ;;  %v222_v24 = vadd.f32 %v1002_v7, %v151_v16  ;;  %v223_v25 = vadd.f32 %v1002_v7, %v152_v17 }
   0x7   :  { %v224_v26 = vadd.f32 %v1002_v7, %v153_v18  ;;  %v225_v27 = vadd.f32 %v1002_v7, %v154_v19  ;;  %v226_v30 = vadd.f32 %v1002_v7, %v155_v22  ;;  %v227_v31 = vadd.f32 %v1002_v7, %v156_v23  ;;  %v938_v18 = vld [vmem:[%s1472_s0 + $0x40] sm:$0xff]   ;;  %v939_v23 = vld [vmem:[%s1472_s0 + $0x48] sm:$0xff]  }
   0x8   :  { %v284_v28 = vmax.f32 %v220_v20, 0.0  ;;  %v285_v29 = vmax.f32 %v221_v21, 0.0  ;;  %v286_v32 = vmax.f32 %v222_v24, 0.0  ;;  %v287_v33 = vmax.f32 %v223_v25, 0.0  ;;  %v940_v24 = vld [vmem:[%s1472_s0 + $0x50] sm:$0xff]  }
   0x9   :  { %v288_v34 = vmax.f32 %v224_v26, 0.0  ;;  %v289_v35 = vmax.f32 %v225_v27, 0.0  ;;  %v290_v39 = vmax.f32 %v226_v30, 0.0  ;;  %v291_v40 = vmax.f32 %v227_v31, 0.0 }
   0xa   :  { %v739_v37 = vpack.c.bf16 %v284_v28, %v284_v28  ;;  %v740_v38 = vpack.c.bf16 %v285_v29, %v285_v29  ;;  %v741_v43 = vpack.c.bf16 %v286_v32, %v286_v32  ;;  %v742_v44 = vpack.c.bf16 %v287_v33, %v287_v33  ;;  %v941_v29 = vld [vmem:[%s1472_s0 + $0x58] sm:$0xff]  }
   0xb   :  { %v743_v45 = vpack.c.bf16 %v288_v34, %v288_v34  ;;  %v744_v46 = vpack.c.bf16 %v289_v35, %v289_v35  ;;  %v745_v48 = vpack.c.bf16 %v290_v39, %v290_v39  ;;  %v746_v49 = vpack.c.bf16 %v291_v40, %v291_v40 }
   0xc   :  { %605 = vst.msk [vmem:[%s1475_s3] sm:$0xf] %vm604_vm0, %v739_v37  ;;  %606 = vst.msk [vmem:[%s1475_s3 + $0x4] sm:$0xf] %vm604_vm0, %v740_v38  ;;  %v821_v50 = vunpack.c.l.bf16 %v934_v36  ;;  %v822_v51 = vunpack.c.h.bf16 %v934_v36  ;;  %v825_v52 = vunpack.c.l.bf16 %v935_v41  ;;  %v826_v53 = vunpack.c.h.bf16 %v935_v41 }
   0xd   :  { %607 = vst.msk [vmem:[%s1475_s3 + $0x8] sm:$0xf] %vm604_vm0, %v741_v43  ;;  %608 = vst.msk [vmem:[%s1475_s3 + $0xc] sm:$0xf] %vm604_vm0, %v742_v44  ;;  %v829_v54 = vunpack.c.l.bf16 %v936_v42  ;;  %v830_v55 = vunpack.c.h.bf16 %v936_v42  ;;  %v833_v58 = vunpack.c.l.bf16 %v937_v47  ;;  %v834_v59 = vunpack.c.h.bf16 %v937_v47 }
   0xe   :  { %609 = vst.msk [vmem:[%s1475_s3 + $0x10] sm:$0xf] %vm604_vm0, %v743_v45  ;;  %610 = vst.msk [vmem:[%s1475_s3 + $0x14] sm:$0xf] %vm604_vm0, %v744_v46  ;;  %v157_v56 = vmul.f32 %v821_v50, %v988_v1  ;;  %v158_v57 = vmul.f32 %v822_v51, %v988_v1  ;;  %v159_v60 = vmul.f32 %v825_v52, %v988_v1  ;;  %v837_v32 = vunpack.c.l.bf16 %v938_v18 }
   0xf   :  { %611 = vst.msk [vmem:[%s1475_s3 + $0x18] sm:$0xf] %vm604_vm0, %v745_v48  ;;  %612 = vst.msk [vmem:[%s1475_s3 + $0x1c] sm:$0xf] %vm604_vm0, %v746_v49  ;;  %v160_v61 = vmul.f32 %v826_v53, %v988_v1  ;;  %v161_v62 = vmul.f32 %v829_v54, %v988_v1  ;;  %v162_v63 = vmul.f32 %v830_v55, %v988_v1  ;;  %v838_v33 = vunpack.c.h.bf16 %v938_v18 }
  0x10   :  { %v228_v0 = vadd.f32 %v1002_v7, %v157_v56  ;;  %v229_v2 = vadd.f32 %v1002_v7, %v158_v57  ;;  %v163_v3 = vmul.f32 %v833_v58, %v988_v1  ;;  %v164_v4 = vmul.f32 %v834_v59, %v988_v1 }
  0x11   :  { %v230_v5 = vadd.f32 %v1002_v7, %v159_v60  ;;  %v231_v6 = vadd.f32 %v1002_v7, %v160_v61  ;;  %v232_v8 = vadd.f32 %v1002_v7, %v161_v62  ;;  %v233_v9 = vadd.f32 %v1002_v7, %v162_v63  ;;  %v942_v62 = vld [vmem:[%s1472_s0 + $0x60] sm:$0xff]  }
  0x12   :  { %v292_v10 = vmax.f32 %v228_v0, 0.0  ;;  %v293_v11 = vmax.f32 %v229_v2, 0.0  ;;  %v234_v12 = vadd.f32 %v1002_v7, %v163_v3  ;;  %v235_v13 = vadd.f32 %v1002_v7, %v164_v4  ;;  %v943_v4 = vld [vmem:[%s1472_s0 + $0x68] sm:$0xff]  }
  0x13   :  { %v294_v14 = vmax.f32 %v230_v5, 0.0  ;;  %v295_v15 = vmax.f32 %v231_v6, 0.0  ;;  %v296_v16 = vmax.f32 %v232_v8, 0.0  ;;  %v297_v17 = vmax.f32 %v233_v9, 0.0  ;;  %v944_v5 = vld [vmem:[%s1472_s0 + $0x70] sm:$0xff]  }
  0x14   :  { %v747_v19 = vpack.c.bf16 %v292_v10, %v292_v10  ;;  %v748_v20 = vpack.c.bf16 %v293_v11, %v293_v11  ;;  %v298_v21 = vmax.f32 %v234_v12, 0.0  ;;  %v299_v22 = vmax.f32 %v235_v13, 0.0  ;;  %v945_v11 = vld [vmem:[%s1472_s0 + $0x78] sm:$0xff]  }
  0x15   :  { %v749_v25 = vpack.c.bf16 %v294_v14, %v294_v14  ;;  %v750_v26 = vpack.c.bf16 %v295_v15, %v295_v15  ;;  %v751_v27 = vpack.c.bf16 %v296_v16, %v296_v16  ;;  %v752_v28 = vpack.c.bf16 %v297_v17, %v297_v17 }
  0x16   :  { %613 = vst.msk [vmem:[%s1475_s3 + $0x20] sm:$0xf] %vm604_vm0, %v747_v19  ;;  %614 = vst.msk [vmem:[%s1475_s3 + $0x24] sm:$0xf] %vm604_vm0, %v748_v20  ;;  %v753_v30 = vpack.c.bf16 %v298_v21, %v298_v21  ;;  %v754_v31 = vpack.c.bf16 %v299_v22, %v299_v22  ;;  %v841_v34 = vunpack.c.l.bf16 %v939_v23  ;;  %v842_v35 = vunpack.c.h.bf16 %v939_v23 }
  0x17   :  { %615 = vst.msk [vmem:[%s1475_s3 + $0x28] sm:$0xf] %vm604_vm0, %v749_v25  ;;  %616 = vst.msk [vmem:[%s1475_s3 + $0x2c] sm:$0xf] %vm604_vm0, %v750_v26  ;;  %v845_v36 = vunpack.c.l.bf16 %v940_v24  ;;  %v846_v37 = vunpack.c.h.bf16 %v940_v24  ;;  %v165_v38 = vmul.f32 %v837_v32, %v988_v1  ;;  %v166_v39 = vmul.f32 %v838_v33, %v988_v1 }
  0x18   :  { %617 = vst.msk [vmem:[%s1475_s3 + $0x30] sm:$0xf] %vm604_vm0, %v751_v27  ;;  %618 = vst.msk [vmem:[%s1475_s3 + $0x34] sm:$0xf] %vm604_vm0, %v752_v28  ;;  %v849_v40 = vunpack.c.l.bf16 %v941_v29  ;;  %v850_v41 = vunpack.c.h.bf16 %v941_v29  ;;  %v167_v42 = vmul.f32 %v841_v34, %v988_v1  ;;  %v168_v43 = vmul.f32 %v842_v35, %v988_v1 }
  0x19   :  { %619 = vst.msk [vmem:[%s1475_s3 + $0x38] sm:$0xf] %vm604_vm0, %v753_v30  ;;  %620 = vst.msk [vmem:[%s1475_s3 + $0x3c] sm:$0xf] %vm604_vm0, %v754_v31  ;;  %v169_v44 = vmul.f32 %v845_v36, %v988_v1  ;;  %v170_v45 = vmul.f32 %v846_v37, %v988_v1  ;;  %v236_v46 = vadd.f32 %v1002_v7, %v165_v38  ;;  %v853_v14 = vunpack.c.l.bf16 %v942_v62 }
  0x1a   :  { %v237_v47 = vadd.f32 %v1002_v7, %v166_v39  ;;  %v171_v48 = vmul.f32 %v849_v40, %v988_v1  ;;  %v172_v49 = vmul.f32 %v850_v41, %v988_v1  ;;  %v238_v50 = vadd.f32 %v1002_v7, %v167_v42 }
  0x1b   :  { %v239_v51 = vadd.f32 %v1002_v7, %v168_v43  ;;  %v240_v52 = vadd.f32 %v1002_v7, %v169_v44  ;;  %v241_v53 = vadd.f32 %v1002_v7, %v170_v45  ;;  %v300_v54 = vmax.f32 %v236_v46, 0.0  ;;  %v946_v44 = vld [vmem:[%s1472_s0 + $0x80] sm:$0xff]  }
  0x1c   :  { %v301_v55 = vmax.f32 %v237_v47, 0.0  ;;  %v242_v56 = vadd.f32 %v1002_v7, %v171_v48  ;;  %v243_v57 = vadd.f32 %v1002_v7, %v172_v49  ;;  %v302_v58 = vmax.f32 %v238_v50, 0.0  ;;  %v947_v49 = vld [vmem:[%s1472_s0 + $0x88] sm:$0xff]   ;;  %v948_v50 = vld [vmem:[%s1472_s0 + $0x90] sm:$0xff]  }
  0x1d   :  { %v303_v59 = vmax.f32 %v239_v51, 0.0  ;;  %v304_v60 = vmax.f32 %v240_v52, 0.0  ;;  %v305_v61 = vmax.f32 %v241_v53, 0.0  ;;  %v755_v63 = vpack.c.bf16 %v300_v54, %v300_v54 }
  0x1e   :  { %v756_v0 = vpack.c.bf16 %v301_v55, %v301_v55  ;;  %v306_v2 = vmax.f32 %v242_v56, 0.0  ;;  %v307_v3 = vmax.f32 %v243_v57, 0.0  ;;  %v757_v6 = vpack.c.bf16 %v302_v58, %v302_v58  ;;  %v949_v55 = vld [vmem:[%s1472_s0 + $0x98] sm:$0xff]  }
  0x1f   :  { %v758_v8 = vpack.c.bf16 %v303_v59, %v303_v59  ;;  %v759_v9 = vpack.c.bf16 %v304_v60, %v304_v60  ;;  %v760_v10 = vpack.c.bf16 %v305_v61, %v305_v61  ;;  %621 = vst.msk [vmem:[%s1475_s3 + $0x40] sm:$0xf] %vm604_vm0, %v755_v63  ;;  %v854_v15 = vunpack.c.h.bf16 %v942_v62 }
  0x20   :  { %622 = vst.msk [vmem:[%s1475_s3 + $0x44] sm:$0xf] %vm604_vm0, %v756_v0  ;;  %v761_v12 = vpack.c.bf16 %v306_v2, %v306_v2  ;;  %v762_v13 = vpack.c.bf16 %v307_v3, %v307_v3  ;;  %623 = vst.msk [vmem:[%s1475_s3 + $0x48] sm:$0xf] %vm604_vm0, %v757_v6  ;;  %v857_v16 = vunpack.c.l.bf16 %v943_v4  ;;  %v858_v17 = vunpack.c.h.bf16 %v943_v4 }
  0x21   :  { %624 = vst.msk [vmem:[%s1475_s3 + $0x4c] sm:$0xf] %vm604_vm0, %v758_v8  ;;  %625 = vst.msk [vmem:[%s1475_s3 + $0x50] sm:$0xf] %vm604_vm0, %v759_v9  ;;  %v861_v18 = vunpack.c.l.bf16 %v944_v5  ;;  %v862_v19 = vunpack.c.h.bf16 %v944_v5  ;;  %v173_v20 = vmul.f32 %v853_v14, %v988_v1  ;;  %v174_v21 = vmul.f32 %v854_v15, %v988_v1 }
  0x22   :  { %626 = vst.msk [vmem:[%s1475_s3 + $0x54] sm:$0xf] %vm604_vm0, %v760_v10  ;;  %627 = vst.msk [vmem:[%s1475_s3 + $0x58] sm:$0xf] %vm604_vm0, %v761_v12  ;;  %v865_v22 = vunpack.c.l.bf16 %v945_v11  ;;  %v866_v23 = vunpack.c.h.bf16 %v945_v11  ;;  %v175_v24 = vmul.f32 %v857_v16, %v988_v1  ;;  %v176_v25 = vmul.f32 %v858_v17, %v988_v1 }
  0x23   :  { %628 = vst.msk [vmem:[%s1475_s3 + $0x5c] sm:$0xf] %vm604_vm0, %v762_v13  ;;  %v177_v26 = vmul.f32 %v861_v18, %v988_v1  ;;  %v178_v27 = vmul.f32 %v862_v19, %v988_v1  ;;  %v244_v28 = vadd.f32 %v1002_v7, %v173_v20  ;;  %v245_v29 = vadd.f32 %v1002_v7, %v174_v21 }
  0x24   :  { %v179_v30 = vmul.f32 %v865_v22, %v988_v1  ;;  %v180_v31 = vmul.f32 %v866_v23, %v988_v1  ;;  %v246_v32 = vadd.f32 %v1002_v7, %v175_v24  ;;  %v247_v33 = vadd.f32 %v1002_v7, %v176_v25 }
  0x25   :  { %v248_v34 = vadd.f32 %v1002_v7, %v177_v26  ;;  %v249_v35 = vadd.f32 %v1002_v7, %v178_v27  ;;  %v308_v36 = vmax.f32 %v244_v28, 0.0  ;;  %v309_v37 = vmax.f32 %v245_v29, 0.0  ;;  %v950_v26 = vld [vmem:[%s1472_s0 + $0xa0] sm:$0xff]  }
  0x26   :  { %v250_v38 = vadd.f32 %v1002_v7, %v179_v30  ;;  %v251_v39 = vadd.f32 %v1002_v7, %v180_v31  ;;  %v310_v40 = vmax.f32 %v246_v32, 0.0  ;;  %v311_v41 = vmax.f32 %v247_v33, 0.0  ;;  %v951_v31 = vld [vmem:[%s1472_s0 + $0xa8] sm:$0xff]   ;;  %v952_v32 = vld [vmem:[%s1472_s0 + $0xb0] sm:$0xff]  }
  0x27   :  { %v312_v42 = vmax.f32 %v248_v34, 0.0  ;;  %v313_v43 = vmax.f32 %v249_v35, 0.0  ;;  %v763_v45 = vpack.c.bf16 %v308_v36, %v308_v36  ;;  %v764_v46 = vpack.c.bf16 %v309_v37, %v309_v37  ;;  %v953_v37 = vld [vmem:[%s1472_s0 + $0xb8] sm:$0xff]  }
  0x28   :  { %v314_v47 = vmax.f32 %v250_v38, 0.0  ;;  %v315_v48 = vmax.f32 %v251_v39, 0.0  ;;  %v765_v51 = vpack.c.bf16 %v310_v40, %v310_v40  ;;  %v766_v52 = vpack.c.bf16 %v311_v41, %v311_v41 }
  0x29   :  { %v767_v53 = vpack.c.bf16 %v312_v42, %v312_v42  ;;  %v768_v54 = vpack.c.bf16 %v313_v43, %v313_v43  ;;  %629 = vst.msk [vmem:[%s1475_s3 + $0x60] sm:$0xf] %vm604_vm0, %v763_v45  ;;  %630 = vst.msk [vmem:[%s1475_s3 + $0x64] sm:$0xf] %vm604_vm0, %v764_v46  ;;  %v869_v58 = vunpack.c.l.bf16 %v946_v44  ;;  %v870_v59 = vunpack.c.h.bf16 %v946_v44 }
  0x2a   :  { %v769_v56 = vpack.c.bf16 %v314_v47, %v314_v47  ;;  %v770_v57 = vpack.c.bf16 %v315_v48, %v315_v48  ;;  %631 = vst.msk [vmem:[%s1475_s3 + $0x68] sm:$0xf] %vm604_vm0, %v765_v51  ;;  %632 = vst.msk [vmem:[%s1475_s3 + $0x6c] sm:$0xf] %vm604_vm0, %v766_v52  ;;  %v873_v60 = vunpack.c.l.bf16 %v947_v49  ;;  %v874_v61 = vunpack.c.h.bf16 %v947_v49 }
  0x2b   :  { %633 = vst.msk [vmem:[%s1475_s3 + $0x70] sm:$0xf] %vm604_vm0, %v767_v53  ;;  %634 = vst.msk [vmem:[%s1475_s3 + $0x74] sm:$0xf] %vm604_vm0, %v768_v54  ;;  %v877_v62 = vunpack.c.l.bf16 %v948_v50  ;;  %v878_v63 = vunpack.c.h.bf16 %v948_v50  ;;  %v181_v0 = vmul.f32 %v869_v58, %v988_v1  ;;  %v182_v2 = vmul.f32 %v870_v59, %v988_v1 }
  0x2c   :  { %635 = vst.msk [vmem:[%s1475_s3 + $0x78] sm:$0xf] %vm604_vm0, %v769_v56  ;;  %636 = vst.msk [vmem:[%s1475_s3 + $0x7c] sm:$0xf] %vm604_vm0, %v770_v57  ;;  %v881_v3 = vunpack.c.l.bf16 %v949_v55  ;;  %v882_v4 = vunpack.c.h.bf16 %v949_v55  ;;  %v183_v5 = vmul.f32 %v873_v60, %v988_v1  ;;  %v184_v6 = vmul.f32 %v874_v61, %v988_v1 }
  0x2d   :  { %v185_v8 = vmul.f32 %v877_v62, %v988_v1  ;;  %v186_v9 = vmul.f32 %v878_v63, %v988_v1  ;;  %v252_v10 = vadd.f32 %v1002_v7, %v181_v0  ;;  %v253_v11 = vadd.f32 %v1002_v7, %v182_v2 }
  0x2e   :  { %v187_v12 = vmul.f32 %v881_v3, %v988_v1  ;;  %v188_v13 = vmul.f32 %v882_v4, %v988_v1  ;;  %v254_v14 = vadd.f32 %v1002_v7, %v183_v5  ;;  %v255_v15 = vadd.f32 %v1002_v7, %v184_v6 }
  0x2f   :  { %v256_v16 = vadd.f32 %v1002_v7, %v185_v8  ;;  %v257_v17 = vadd.f32 %v1002_v7, %v186_v9  ;;  %v316_v18 = vmax.f32 %v252_v10, 0.0  ;;  %v317_v19 = vmax.f32 %v253_v11, 0.0  ;;  %v954_v8 = vld [vmem:[%s1472_s0 + $0xc0] sm:$0xff]  }
  0x30   :  { %v258_v20 = vadd.f32 %v1002_v7, %v187_v12  ;;  %v259_v21 = vadd.f32 %v1002_v7, %v188_v13  ;;  %v318_v22 = vmax.f32 %v254_v14, 0.0  ;;  %v319_v23 = vmax.f32 %v255_v15, 0.0  ;;  %v955_v13 = vld [vmem:[%s1472_s0 + $0xc8] sm:$0xff]   ;;  %v956_v14 = vld [vmem:[%s1472_s0 + $0xd0] sm:$0xff]  }
  0x31   :  { %v320_v24 = vmax.f32 %v256_v16, 0.0  ;;  %v321_v25 = vmax.f32 %v257_v17, 0.0  ;;  %v771_v27 = vpack.c.bf16 %v316_v18, %v316_v18  ;;  %v772_v28 = vpack.c.bf16 %v317_v19, %v317_v19  ;;  %v957_v19 = vld [vmem:[%s1472_s0 + $0xd8] sm:$0xff]  }
  0x32   :  { %v322_v29 = vmax.f32 %v258_v20, 0.0  ;;  %v323_v30 = vmax.f32 %v259_v21, 0.0  ;;  %v773_v33 = vpack.c.bf16 %v318_v22, %v318_v22  ;;  %v774_v34 = vpack.c.bf16 %v319_v23, %v319_v23 }
  0x33   :  { %v775_v35 = vpack.c.bf16 %v320_v24, %v320_v24  ;;  %v776_v36 = vpack.c.bf16 %v321_v25, %v321_v25  ;;  %637 = vst.msk [vmem:[%s1475_s3 + $0x80] sm:$0xf] %vm604_vm0, %v771_v27  ;;  %638 = vst.msk [vmem:[%s1475_s3 + $0x84] sm:$0xf] %vm604_vm0, %v772_v28  ;;  %v885_v40 = vunpack.c.l.bf16 %v950_v26  ;;  %v886_v41 = vunpack.c.h.bf16 %v950_v26 }
  0x34   :  { %v777_v38 = vpack.c.bf16 %v322_v29, %v322_v29  ;;  %v778_v39 = vpack.c.bf16 %v323_v30, %v323_v30  ;;  %639 = vst.msk [vmem:[%s1475_s3 + $0x88] sm:$0xf] %vm604_vm0, %v773_v33  ;;  %640 = vst.msk [vmem:[%s1475_s3 + $0x8c] sm:$0xf] %vm604_vm0, %v774_v34  ;;  %v889_v42 = vunpack.c.l.bf16 %v951_v31  ;;  %v890_v43 = vunpack.c.h.bf16 %v951_v31 }
  0x35   :  { %641 = vst.msk [vmem:[%s1475_s3 + $0x90] sm:$0xf] %vm604_vm0, %v775_v35  ;;  %642 = vst.msk [vmem:[%s1475_s3 + $0x94] sm:$0xf] %vm604_vm0, %v776_v36  ;;  %v893_v44 = vunpack.c.l.bf16 %v952_v32  ;;  %v894_v45 = vunpack.c.h.bf16 %v952_v32  ;;  %v189_v46 = vmul.f32 %v885_v40, %v988_v1  ;;  %v190_v47 = vmul.f32 %v886_v41, %v988_v1 }
  0x36   :  { %643 = vst.msk [vmem:[%s1475_s3 + $0x98] sm:$0xf] %vm604_vm0, %v777_v38  ;;  %644 = vst.msk [vmem:[%s1475_s3 + $0x9c] sm:$0xf] %vm604_vm0, %v778_v39  ;;  %v897_v48 = vunpack.c.l.bf16 %v953_v37  ;;  %v898_v49 = vunpack.c.h.bf16 %v953_v37  ;;  %v191_v50 = vmul.f32 %v889_v42, %v988_v1  ;;  %v192_v51 = vmul.f32 %v890_v43, %v988_v1 }
  0x37   :  { %v193_v52 = vmul.f32 %v893_v44, %v988_v1  ;;  %v194_v53 = vmul.f32 %v894_v45, %v988_v1  ;;  %v260_v54 = vadd.f32 %v1002_v7, %v189_v46  ;;  %v261_v55 = vadd.f32 %v1002_v7, %v190_v47 }
  0x38   :  { %v195_v56 = vmul.f32 %v897_v48, %v988_v1  ;;  %v196_v57 = vmul.f32 %v898_v49, %v988_v1  ;;  %v262_v58 = vadd.f32 %v1002_v7, %v191_v50  ;;  %v263_v59 = vadd.f32 %v1002_v7, %v192_v51 }
  0x39   :  { %v264_v60 = vadd.f32 %v1002_v7, %v193_v52  ;;  %v265_v61 = vadd.f32 %v1002_v7, %v194_v53  ;;  %v324_v62 = vmax.f32 %v260_v54, 0.0  ;;  %v325_v63 = vmax.f32 %v261_v55, 0.0  ;;  %v958_v52 = vld [vmem:[%s1472_s0 + $0xe0] sm:$0xff]  }
  0x3a   :  { %v266_v0 = vadd.f32 %v1002_v7, %v195_v56  ;;  %v267_v2 = vadd.f32 %v1002_v7, %v196_v57  ;;  %v326_v3 = vmax.f32 %v262_v58, 0.0  ;;  %v327_v4 = vmax.f32 %v263_v59, 0.0  ;;  %v959_v57 = vld [vmem:[%s1472_s0 + $0xe8] sm:$0xff]   ;;  %v960_v58 = vld [vmem:[%s1472_s0 + $0xf0] sm:$0xff]  }
  0x3b   :  { %v328_v5 = vmax.f32 %v264_v60, 0.0  ;;  %v329_v6 = vmax.f32 %v265_v61, 0.0  ;;  %v779_v9 = vpack.c.bf16 %v324_v62, %v324_v62  ;;  %v780_v10 = vpack.c.bf16 %v325_v63, %v325_v63  ;;  %v961_v63 = vld [vmem:[%s1472_s0 + $0xf8] sm:$0xff]  }
  0x3c   :  { %v330_v11 = vmax.f32 %v266_v0, 0.0  ;;  %v331_v12 = vmax.f32 %v267_v2, 0.0  ;;  %v781_v15 = vpack.c.bf16 %v326_v3, %v326_v3  ;;  %v782_v16 = vpack.c.bf16 %v327_v4, %v327_v4 }
  0x3d   :  { %v783_v17 = vpack.c.bf16 %v328_v5, %v328_v5  ;;  %v784_v18 = vpack.c.bf16 %v329_v6, %v329_v6  ;;  %645 = vst.msk [vmem:[%s1475_s3 + $0xa0] sm:$0xf] %vm604_vm0, %v779_v9  ;;  %646 = vst.msk [vmem:[%s1475_s3 + $0xa4] sm:$0xf] %vm604_vm0, %v780_v10  ;;  %v901_v22 = vunpack.c.l.bf16 %v954_v8  ;;  %v902_v23 = vunpack.c.h.bf16 %v954_v8 }
  0x3e   :  { %v785_v20 = vpack.c.bf16 %v330_v11, %v330_v11  ;;  %v786_v21 = vpack.c.bf16 %v331_v12, %v331_v12  ;;  %647 = vst.msk [vmem:[%s1475_s3 + $0xa8] sm:$0xf] %vm604_vm0, %v781_v15  ;;  %648 = vst.msk [vmem:[%s1475_s3 + $0xac] sm:$0xf] %vm604_vm0, %v782_v16  ;;  %v905_v24 = vunpack.c.l.bf16 %v955_v13  ;;  %v906_v25 = vunpack.c.h.bf16 %v955_v13 }
  0x3f   :  { %649 = vst.msk [vmem:[%s1475_s3 + $0xb0] sm:$0xf] %vm604_vm0, %v783_v17  ;;  %650 = vst.msk [vmem:[%s1475_s3 + $0xb4] sm:$0xf] %vm604_vm0, %v784_v18  ;;  %v909_v26 = vunpack.c.l.bf16 %v956_v14  ;;  %v910_v27 = vunpack.c.h.bf16 %v956_v14  ;;  %v197_v28 = vmul.f32 %v901_v22, %v988_v1  ;;  %v198_v29 = vmul.f32 %v902_v23, %v988_v1 }
  0x40   :  { %651 = vst.msk [vmem:[%s1475_s3 + $0xb8] sm:$0xf] %vm604_vm0, %v785_v20  ;;  %652 = vst.msk [vmem:[%s1475_s3 + $0xbc] sm:$0xf] %vm604_vm0, %v786_v21  ;;  %v913_v30 = vunpack.c.l.bf16 %v957_v19  ;;  %v914_v31 = vunpack.c.h.bf16 %v957_v19  ;;  %v199_v32 = vmul.f32 %v905_v24, %v988_v1  ;;  %v200_v33 = vmul.f32 %v906_v25, %v988_v1 }
  0x41   :  { %v201_v34 = vmul.f32 %v909_v26, %v988_v1  ;;  %v202_v35 = vmul.f32 %v910_v27, %v988_v1  ;;  %v268_v36 = vadd.f32 %v1002_v7, %v197_v28  ;;  %v269_v37 = vadd.f32 %v1002_v7, %v198_v29 }
  0x42   :  { %v203_v38 = vmul.f32 %v913_v30, %v988_v1  ;;  %v204_v39 = vmul.f32 %v914_v31, %v988_v1  ;;  %v270_v40 = vadd.f32 %v1002_v7, %v199_v32  ;;  %v271_v41 = vadd.f32 %v1002_v7, %v200_v33 }
  0x43   :  { %v272_v42 = vadd.f32 %v1002_v7, %v201_v34  ;;  %v273_v43 = vadd.f32 %v1002_v7, %v202_v35  ;;  %v332_v44 = vmax.f32 %v268_v36, 0.0  ;;  %v333_v45 = vmax.f32 %v269_v37, 0.0 }
  0x44   :  { %v274_v46 = vadd.f32 %v1002_v7, %v203_v38  ;;  %v275_v47 = vadd.f32 %v1002_v7, %v204_v39  ;;  %v334_v48 = vmax.f32 %v270_v40, 0.0  ;;  %v335_v49 = vmax.f32 %v271_v41, 0.0 }
  0x45   :  { %v336_v50 = vmax.f32 %v272_v42, 0.0  ;;  %v337_v51 = vmax.f32 %v273_v43, 0.0  ;;  %v787_v53 = vpack.c.bf16 %v332_v44, %v332_v44  ;;  %v788_v54 = vpack.c.bf16 %v333_v45, %v333_v45 }
  0x46   :  { %v338_v55 = vmax.f32 %v274_v46, 0.0  ;;  %v339_v56 = vmax.f32 %v275_v47, 0.0  ;;  %v789_v59 = vpack.c.bf16 %v334_v48, %v334_v48  ;;  %v790_v60 = vpack.c.bf16 %v335_v49, %v335_v49 }
  0x47   :  { %v791_v61 = vpack.c.bf16 %v336_v50, %v336_v50  ;;  %v792_v62 = vpack.c.bf16 %v337_v51, %v337_v51  ;;  %653 = vst.msk [vmem:[%s1475_s3 + $0xc0] sm:$0xf] %vm604_vm0, %v787_v53  ;;  %654 = vst.msk [vmem:[%s1475_s3 + $0xc4] sm:$0xf] %vm604_vm0, %v788_v54  ;;  %v917_v3 = vunpack.c.l.bf16 %v958_v52  ;;  %v918_v4 = vunpack.c.h.bf16 %v958_v52 }
  0x48   :  { %v793_v0 = vpack.c.bf16 %v338_v55, %v338_v55  ;;  %v794_v2 = vpack.c.bf16 %v339_v56, %v339_v56  ;;  %655 = vst.msk [vmem:[%s1475_s3 + $0xc8] sm:$0xf] %vm604_vm0, %v789_v59  ;;  %656 = vst.msk [vmem:[%s1475_s3 + $0xcc] sm:$0xf] %vm604_vm0, %v790_v60  ;;  %v921_v5 = vunpack.c.l.bf16 %v959_v57  ;;  %v922_v6 = vunpack.c.h.bf16 %v959_v57 }
  0x49   :  { %657 = vst.msk [vmem:[%s1475_s3 + $0xd0] sm:$0xf] %vm604_vm0, %v791_v61  ;;  %658 = vst.msk [vmem:[%s1475_s3 + $0xd4] sm:$0xf] %vm604_vm0, %v792_v62  ;;  %v925_v8 = vunpack.c.l.bf16 %v960_v58  ;;  %v926_v9 = vunpack.c.h.bf16 %v960_v58  ;;  %v205_v10 = vmul.f32 %v917_v3, %v988_v1  ;;  %v206_v11 = vmul.f32 %v918_v4, %v988_v1 }
  0x4a   :  { %659 = vst.msk [vmem:[%s1475_s3 + $0xd8] sm:$0xf] %vm604_vm0, %v793_v0  ;;  %660 = vst.msk [vmem:[%s1475_s3 + $0xdc] sm:$0xf] %vm604_vm0, %v794_v2  ;;  %v929_v12 = vunpack.c.l.bf16 %v961_v63  ;;  %v930_v13 = vunpack.c.h.bf16 %v961_v63  ;;  %v207_v14 = vmul.f32 %v921_v5, %v988_v1  ;;  %v208_v15 = vmul.f32 %v922_v6, %v988_v1 }
  0x4b   :  { %v209_v16 = vmul.f32 %v925_v8, %v988_v1  ;;  %v210_v17 = vmul.f32 %v926_v9, %v988_v1  ;;  %v276_v18 = vadd.f32 %v1002_v7, %v205_v10  ;;  %v277_v19 = vadd.f32 %v1002_v7, %v206_v11 }
  0x4c   :  { %v211_v20 = vmul.f32 %v929_v12, %v988_v1  ;;  %v212_v21 = vmul.f32 %v930_v13, %v988_v1  ;;  %v278_v22 = vadd.f32 %v1002_v7, %v207_v14  ;;  %v279_v23 = vadd.f32 %v1002_v7, %v208_v15 }
  0x4d   :  { %v280_v24 = vadd.f32 %v1002_v7, %v209_v16  ;;  %v281_v25 = vadd.f32 %v1002_v7, %v210_v17  ;;  %v340_v26 = vmax.f32 %v276_v18, 0.0  ;;  %v341_v27 = vmax.f32 %v277_v19, 0.0 }
  0x4e   :  { %v282_v28 = vadd.f32 %v1002_v7, %v211_v20  ;;  %v283_v29 = vadd.f32 %v1002_v7, %v212_v21  ;;  %v342_v30 = vmax.f32 %v278_v22, 0.0  ;;  %v343_v31 = vmax.f32 %v279_v23, 0.0 }
  0x4f   :  { %v344_v32 = vmax.f32 %v280_v24, 0.0  ;;  %v345_v33 = vmax.f32 %v281_v25, 0.0  ;;  %v795_v34 = vpack.c.bf16 %v340_v26, %v340_v26  ;;  %v796_v1 = vpack.c.bf16 %v341_v27, %v341_v27 }
  0x50   :  { %v346_v35 = vmax.f32 %v282_v28, 0.0  ;;  %v347_v36 = vmax.f32 %v283_v29, 0.0  ;;  %v797_v37 = vpack.c.bf16 %v342_v30, %v342_v30  ;;  %v798_v38 = vpack.c.bf16 %v343_v31, %v343_v31 }
  0x51   :  { %v799_v39 = vpack.c.bf16 %v344_v32, %v344_v32  ;;  %v800_v40 = vpack.c.bf16 %v345_v33, %v345_v33  ;;  %661 = vst.msk [vmem:[%s1475_s3 + $0xe0] sm:$0xf] %vm604_vm0, %v795_v34  ;;  %662 = vst.msk [vmem:[%s1475_s3 + $0xe4] sm:$0xf] %vm604_vm0, %v796_v1 }
  0x52   :  { %v801_v7 = vpack.c.bf16 %v346_v35, %v346_v35  ;;  %v802_v41 = vpack.c.bf16 %v347_v36, %v347_v36  ;;  %663 = vst.msk [vmem:[%s1475_s3 + $0xe8] sm:$0xf] %vm604_vm0, %v797_v37  ;;  %664 = vst.msk [vmem:[%s1475_s3 + $0xec] sm:$0xf] %vm604_vm0, %v798_v38 }
  0x53   :  { %665 = vst.msk [vmem:[%s1475_s3 + $0xf0] sm:$0xf] %vm604_vm0, %v799_v39  ;;  %666 = vst.msk [vmem:[%s1475_s3 + $0xf4] sm:$0xf] %vm604_vm0, %v800_v40 }
  0x54   :  { %667 = vst.msk [vmem:[%s1475_s3 + $0xf8] sm:$0xf] %vm604_vm0, %v801_v7  ;;  %668 = vst.msk [vmem:[%s1475_s3 + $0xfc] sm:$0xf] %vm604_vm0, %v802_v41 }

// kernel: pallas_forward.26
= control target key start
LH: loop header
LB: loop body
LE: loop exit
PB: predicated region body
PF: predicated region fallthrough
CT: control target
= control target key end

     0   :  { %vm106_vm0 = vcmask 588800   ;;  %vm131_vm1 = vcmask 1043456   ;;  %vm394_vm2 = vcmask 125952   ;;  %vm232_vm3 = vcmask 130048   ;;  %s745_s1 = inlined_call_operand.vmem [shape: bf16[72,16], index: 1, kind: input, shape index: {}]   ;;  %s746_s0 = inlined_call_operand.vmem [shape: bf16[128,72], index: 0, kind: input, shape index: {}]   ;;  %s747_s2 = inlined_call_operand.vmem [shape: bf16[128,16], index: 2, kind: output, shape index: {0}]   ;;  %s748_s3 = inlined_call_operand.vmem [shape: f32[8,16], index: 3, kind: output, shape index: {1}]  }
   0x1   :  { %v523_v0 = vld [vmem:[%s745_s1] sm:$0xff]   ;;  %v524_v1 = vld [vmem:[%s745_s1 + $0x8] sm:$0xff]   ;;  %v525_v2 = vld [vmem:[%s745_s1 + $0x10] sm:$0xff]  }
   0x2   :  { %485 = vmatprep.subr.bf16.mxu0 %v523_v0  ;;  %511 = vmatprep.subr.bf16.mxu1 %v523_v0  ;;  %v528_v3 = vld [vmem:[%s746_s0] sm:$0xff]   ;;  %v526_v4 = vld [vmem:[%s745_s1 + $0x18] sm:$0xff]   ;;  %v529_v8 = vld [vmem:[%s746_s0 + $0x8] sm:$0xff]  }
   0x3   :  { %486 = vmatpush3.bf16.msra.mxu0 %v523_v0  ;;  %516 = vmatpush3.bf16.msra.mxu1 %v523_v0  ;;  %v532_v5 = vld [vmem:[%s746_s0 + $0x20] sm:$0xff]   ;;  %v533_v9 = vld [vmem:[%s746_s0 + $0x28] sm:$0xff]   ;;  %v530_v10 = vld [vmem:[%s746_s0 + $0x10] sm:$0xff]  }
   0x4   :  { %487 = vmatprep.subr.bf16.mxu0 %v524_v1  ;;  %512 = vmatprep.subr.bf16.mxu1 %v524_v1  ;;  %v527_v6 = vld [vmem:[%s745_s1 + $0x20] ss:$0 sps:$4 sm:$0xff]   ;;  %v534_v11 = vld [vmem:[%s746_s0 + $0x30] sm:$0xff]   ;;  %v531_v12 = vld [vmem:[%s746_s0 + $0x18] sm:$0xff]  }
   0x5   :  { %495 = vmatprep.mubr.msk.bf16.mxu0 %vm106_vm0, %v528_v3  ;;  %503 = vmatprep.mubr.msk.bf16.mxu1 %vm106_vm0, %v532_v5  ;;  %v133_v7 = vsel %vm131_vm1, %v527_v6, 0  ;;  %v535_v13 = vld [vmem:[%s746_s0 + $0x38] sm:$0xff]  }
   0x7   :  { %488 = vmatpush3.bf16.msra.mxu0 %v524_v1  ;;  %517 = vmatpush3.bf16.msra.mxu1 %v524_v1 }
   0x8   :  { %489 = vmatprep.subr.bf16.mxu0 %v525_v2  ;;  %513 = vmatprep.subr.bf16.mxu1 %v525_v2 }
   0xb   :  { %490 = vmatpush3.bf16.msra.mxu0 %v525_v2  ;;  %518 = vmatpush3.bf16.msra.mxu1 %v525_v2 }
   0xc   :  { %491 = vmatprep.subr.bf16.mxu0 %v526_v4  ;;  %514 = vmatprep.subr.bf16.mxu1 %v526_v4 }
   0xf   :  { %492 = vmatpush3.bf16.msra.mxu0 %v526_v4  ;;  %519 = vmatpush3.bf16.msra.mxu1 %v526_v4 }
  0x10   :  { %521 = vmatprep.subr.msk.bf16.mxu0 %vm131_vm1, %v527_v6  ;;  %522 = vmatprep.subr.msk.bf16.mxu1 %vm131_vm1, %v527_v6 }
  0x13   :  { %494 = vmatpush3.bf16.msra.mxu0 %v133_v7  ;;  %520 = vmatpush3.bf16.msra.mxu1 %v133_v7 }
  0x16   :  { %496 = vmatmul.mubr.msk.bf16.vlgmr.msra.gmra.mrb[0].mxu0 %vm106_vm0, %v529_v8  ;;  %504 = vmatmul.mubr.msk.bf16.vlgmr.msra.gmra.mrb[0].mxu1 %vm106_vm0, %v533_v9 }
  0x17   :  { %499 = vmatprep.mubr.msk.bf16.mxu0 %vm106_vm0, %v530_v10  ;;  %507 = vmatprep.mubr.msk.bf16.mxu1 %vm106_vm0, %v534_v11 }
  0x1e   :  { %500 = vmatmul.mubr.msk.bf16.gmra.mrb[4].mxu0 %vm106_vm0, %v531_v12  ;;  %508 = vmatmul.mubr.msk.bf16.gmra.mrb[4].mxu1 %vm106_vm0, %v535_v13 }
  0xe9   :  { %v497_v14 = vpop.f32.mrb[0].mxu0  ;;  %v603_v15 = vpop.f32.mrb[0].mxu1 }
  0xea   :  { %v458_v16 = vpack.c.bf16 %v497_v14, %v497_v14  ;;  %v169_v17 = vpop.f32.mrb[1].mxu0  ;;  %v605_v18 = vpop.f32.mrb[1].mxu1  ;;  %v272_v23 = vmul.f32 %v497_v14, %v497_v14  ;;  %v466_v33 = vpack.c.bf16 %v603_v15, %v603_v15  ;;  %v236_v34 = vsel %vm232_vm3, %v497_v14, 0.0 }
  0xeb   :  { %v270_v19 = vmul.f32 %v169_v17, %v169_v17  ;;  %v456_v20 = vpack.c.bf16 %v169_v17, %v169_v17  ;;  %v498_v21 = vpop.f32.mrb[2].mxu0  ;;  %v607_v22 = vpop.f32.mrb[2].mxu1  ;;  %v233_v27 = vsel %vm232_vm3, %v169_v17, 0.0  ;;  %v464_v37 = vpack.c.bf16 %v605_v18, %v605_v18 }
  0xec   :  { %397 = vst.msk [vmem:[%s747_s2 + $0x8] sm:$0xf] %vm394_vm2, %v458_v16  ;;  %v459_v24 = vpack.c.bf16 %v498_v21, %v498_v21  ;;  %v172_v25 = vpop.f32.mrb[3].mxu0  ;;  %v613_v26 = vpop.f32.mrb[3].mxu1  ;;  %v273_v31 = vmul.f32 %v498_v21, %v498_v21  ;;  %405 = vst.msk [vmem:[%s747_s2 + $0x28] sm:$0xf] %vm394_vm2, %v466_v33  ;;  %v467_v42 = vpack.c.bf16 %v607_v22, %v607_v22 }
  0xed   :  { %395 = vst.msk [vmem:[%s747_s2] sm:$0xf] %vm394_vm2, %v456_v20  ;;  %v234_v28 = vsel %vm232_vm3, %v172_v25, 0.0  ;;  %v271_v29 = vmul.f32 %v172_v25, %v172_v25  ;;  %v457_v30 = vpack.c.bf16 %v172_v25, %v172_v25  ;;  %v286_v35 = vsel %vm232_vm3, %v270_v19, 0.0  ;;  %403 = vst.msk [vmem:[%s747_s2 + $0x20] sm:$0xf] %vm394_vm2, %v464_v37 }
  0xee   :  { %398 = vst.msk [vmem:[%s747_s2 + $0xc] sm:$0xf] %vm394_vm2, %v459_v24  ;;  %v235_v32 = vadd.f32 %v234_v28, %v233_v27  ;;  %v289_v40 = vsel %vm232_vm3, %v272_v23, 0.0  ;;  %v238_v44 = vsel %vm232_vm3, %v498_v21, 0.0  ;;  %v291_v45 = vsel %vm232_vm3, %v273_v31, 0.0 }
  0xef   :  { %v287_v36 = vsel %vm232_vm3, %v271_v29, 0.0  ;;  %396 = vst.msk [vmem:[%s747_s2 + $0x4] sm:$0xf] %vm394_vm2, %v457_v30  ;;  %406 = vst.msk [vmem:[%s747_s2 + $0x2c] sm:$0xf] %vm394_vm2, %v467_v42  ;;  %v278_v4 = vmul.f32 %v605_v18, %v605_v18  ;;  %v465_v5 = vpack.c.bf16 %v613_v26, %v613_v26  ;;  %v248_v14 = vsel %vm232_vm3, %v605_v18, 0.0 }
  0xf0   :  { %v237_v38 = vadd.f32 %v236_v34, %v235_v32  ;;  %v288_v39 = vadd.f32 %v287_v36, %v286_v35  ;;  %v279_v24 = vmul.f32 %v613_v26, %v613_v26  ;;  %v280_v28 = vmul.f32 %v603_v15, %v603_v15 }
  0xf1   :  { %v501_v41 = vpop.f32.mrb[4].mxu0  ;;  %v647_v43 = vpop.f32.mrb[4].mxu1  ;;  %404 = vst.msk [vmem:[%s747_s2 + $0x24] sm:$0xf] %vm394_vm2, %v465_v5  ;;  %v301_v23 = vsel %vm232_vm3, %v278_v4, 0.0  ;;  %v250_v29 = vsel %vm232_vm3, %v613_v26, 0.0  ;;  %v281_v33 = vmul.f32 %v607_v22, %v607_v22 }
  0xf2   :  { %v290_v46 = vadd.f32 %v289_v40, %v288_v39  ;;  %v462_v47 = vpack.c.bf16 %v501_v41, %v501_v41  ;;  %v185_v48 = vpop.f32.mrb[5].mxu0  ;;  %v217_v49 = vpop.f32.mrb[5].mxu1  ;;  %v239_v50 = vadd.f32 %v238_v44, %v237_v38  ;;  %v276_v63 = vmul.f32 %v501_v41, %v501_v41 }
  0xf3   :  { %v240_v51 = vsel %vm232_vm3, %v185_v48, 0.0  ;;  %v274_v52 = vmul.f32 %v185_v48, %v185_v48  ;;  %v460_v53 = vpack.c.bf16 %v185_v48, %v185_v48  ;;  %v502_v54 = vpop.f32.mrb[6].mxu0  ;;  %v656_v55 = vpop.f32.mrb[6].mxu1  ;;  %v244_v6 = vsel %vm232_vm3, %v501_v41, 0.0 }
  0xf4   :  { %401 = vst.msk [vmem:[%s747_s2 + $0x18] sm:$0xf] %vm394_vm2, %v462_v47  ;;  %v292_v56 = vadd.f32 %v291_v45, %v290_v46  ;;  %v188_v57 = vpop.f32.mrb[7].mxu0  ;;  %v220_v58 = vpop.f32.mrb[7].mxu1  ;;  %v241_v59 = vadd.f32 %v240_v51, %v239_v50  ;;  %v463_v61 = vpack.c.bf16 %v502_v54, %v502_v54  ;;  %v277_v7 = vmul.f32 %v502_v54, %v502_v54 }
  0xf5   :  { %v293_v60 = vsel %vm232_vm3, %v274_v52, 0.0  ;;  %399 = vst.msk [vmem:[%s747_s2 + $0x10] sm:$0xf] %vm394_vm2, %v460_v53  ;;  %v242_v62 = vsel %vm232_vm3, %v188_v57, 0.0  ;;  %v275_v1 = vmul.f32 %v188_v57, %v188_v57  ;;  %v461_v2 = vpack.c.bf16 %v188_v57, %v188_v57 }
  0xf6   :  { %v294_v0 = vadd.f32 %v293_v60, %v292_v56  ;;  %402 = vst.msk [vmem:[%s747_s2 + $0x1c] sm:$0xf] %vm394_vm2, %v463_v61  ;;  %v243_v3 = vadd.f32 %v242_v62, %v241_v59  ;;  %v470_v9 = vpack.c.bf16 %v647_v43, %v647_v43  ;;  %v297_v12 = vsel %vm232_vm3, %v276_v63, 0.0 }
  0xf7   :  { %v295_v8 = vsel %vm232_vm3, %v275_v1, 0.0  ;;  %400 = vst.msk [vmem:[%s747_s2 + $0x14] sm:$0xf] %vm394_vm2, %v461_v2  ;;  %v246_v13 = vsel %vm232_vm3, %v502_v54, 0.0  ;;  %v468_v16 = vpack.c.bf16 %v217_v49, %v217_v49  ;;  %v471_v20 = vpack.c.bf16 %v656_v55, %v656_v55 }
  0xf8   :  { %v245_v10 = vadd.f32 %v244_v6, %v243_v3  ;;  %v296_v11 = vadd.f32 %v295_v8, %v294_v0  ;;  %409 = vst.msk [vmem:[%s747_s2 + $0x38] sm:$0xf] %vm394_vm2, %v470_v9  ;;  %v299_v21 = vsel %vm232_vm3, %v277_v7, 0.0  ;;  %v469_v18 = vpack.c.bf16 %v220_v58, %v220_v58 }
  0xf9   :  { %407 = vst.msk [vmem:[%s747_s2 + $0x30] sm:$0xf] %vm394_vm2, %v468_v16  ;;  %410 = vst.msk [vmem:[%s747_s2 + $0x3c] sm:$0xf] %vm394_vm2, %v471_v20  ;;  %v252_v32 = vsel %vm232_vm3, %v603_v15, 0.0  ;;  %v303_v34 = vsel %vm232_vm3, %v279_v24, 0.0  ;;  %v282_v35 = vmul.f32 %v217_v49, %v217_v49  ;;  %v283_v44 = vmul.f32 %v220_v58, %v220_v58 }
  0xfa   :  { %v298_v17 = vadd.f32 %v297_v12, %v296_v11  ;;  %v247_v19 = vadd.f32 %v246_v13, %v245_v10  ;;  %408 = vst.msk [vmem:[%s747_s2 + $0x34] sm:$0xf] %vm394_vm2, %v469_v18  ;;  %v305_v26 = vsel %vm232_vm3, %v280_v28, 0.0  ;;  %v254_v38 = vsel %vm232_vm3, %v607_v22, 0.0 }
  0xfb   :  { %v256_v39 = vsel %vm232_vm3, %v217_v49, 0.0  ;;  %v307_v42 = vsel %vm232_vm3, %v281_v33, 0.0  ;;  %v309_v15 = vsel %vm232_vm3, %v282_v35, 0.0  ;;  %v284_v47 = vmul.f32 %v647_v43, %v647_v43 }
  0xfc   :  { %v249_v25 = vadd.f32 %v248_v14, %v247_v19  ;;  %v300_v27 = vadd.f32 %v299_v21, %v298_v17  ;;  %v258_v48 = vsel %vm232_vm3, %v220_v58, 0.0  ;;  %v260_v22 = vsel %vm232_vm3, %v647_v43, 0.0 }
  0xfd   :  { %v285_v49 = vmul.f32 %v656_v55, %v656_v55  ;;  %v311_v52 = vsel %vm232_vm3, %v283_v44, 0.0  ;;  %v313_v56 = vsel %vm232_vm3, %v284_v47, 0.0  ;;  %v262_v57 = vsel %vm232_vm3, %v656_v55, 0.0 }
  0xfe   :  { %v302_v30 = vadd.f32 %v301_v23, %v300_v27  ;;  %v251_v31 = vadd.f32 %v250_v29, %v249_v25  ;;  %v323_v0 = vlaneseq }
  0xff   :  { %v315_v58 = vsel %vm232_vm3, %v285_v49, 0.0 }
 0x100   :  { %v253_v36 = vadd.f32 %v252_v32, %v251_v31  ;;  %v304_v37 = vadd.f32 %v303_v34, %v302_v30  ;;  %v324_v5 = vshrl.u32 %v323_v0, 7 }
 0x102   :  { %v306_v40 = vadd.f32 %v305_v26, %v304_v37  ;;  %v255_v41 = vadd.f32 %v254_v38, %v253_v36  ;;  %vm326_vm4 = vcmp.eq.s32.totalorder %v324_v5, 1  ;;  %vm325_vm5 = vcmp.eq.s32.totalorder %v324_v5, 0 }
 0x104   :  { %v257_v45 = vadd.f32 %v256_v39, %v255_v41  ;;  %v308_v46 = vadd.f32 %v307_v42, %v306_v40 }
 0x106   :  { %v310_v50 = vadd.f32 %v309_v15, %v308_v46  ;;  %v259_v51 = vadd.f32 %v258_v48, %v257_v45 }
 0x108   :  { %v261_v53 = vadd.f32 %v260_v22, %v259_v51  ;;  %v312_v54 = vadd.f32 %v311_v52, %v310_v50 }
 0x10a   :  { %v263_v59 = vadd.f32 %v262_v57, %v261_v53  ;;  %v314_v60 = vadd.f32 %v313_v56, %v312_v54 }
 0x10c   :  { %v264_v61 = vrot.slane %v263_v59, 4  ;;  %v316_v62 = vadd.f32 %v315_v58, %v314_v60 }
 0x10e   :  { %v265_v63 = vadd.f32 %v264_v61, %v263_v59  ;;  %v317_v43 = vrot.slane %v316_v62, 4 }
 0x110   :  { %v266_v1 = vrot.slane %v265_v63, 2  ;;  %v318_v2 = vadd.f32 %v317_v43, %v316_v62 }
 0x112   :  { %v267_v3 = vadd.f32 %v266_v1, %v265_v63  ;;  %v319_v4 = vrot.slane %v318_v2, 2 }
 0x114   :  { %v320_v6 = vadd.f32 %v319_v4, %v318_v2  ;;  %v268_v7 = vrot.slane %v267_v3, 1 }
 0x116   :  { %v321_v8 = vrot.slane %v320_v6, 1  ;;  %v269_v55 = vadd.f32 %v268_v7, %v267_v3 }
 0x118   :  { %v322_v9 = vadd.f32 %v321_v8, %v320_v6 }
 0x11a   :  { %v327_v10 = vsel %vm326_vm4, %v322_v9, 0.0 }
 0x11b   :  { %v328_v11 = vsel %vm325_vm5, %v269_v55, %v327_v10 }
 0x11c   :  { %329 = vst.msk [vmem:[%s748_s3] sm:$0xff] %vm232_vm3, %v328_v11 }

// kernel: pallas_forward.27
= control target key start
LH: loop header
LB: loop body
LE: loop exit
PB: predicated region body
PF: predicated region fallthrough
CT: control target
= control target key end

     0   :  { %vm172_vm0 = vcmask 125952   ;;  %s416_s0 = inlined_call_operand.vmem [shape: bf16[128,16], index: 0, kind: input, shape index: {}]   ;;  %s417_s1 = inlined_call_operand.vmem [shape: f32[1,16], index: 1, kind: input, shape index: {}]   ;;  %s418_s2 = inlined_call_operand.vmem [shape: f32[1,16], index: 2, kind: input, shape index: {}]   ;;  %s419_s3 = inlined_call_operand.vmem [shape: bf16[128,16], index: 3, kind: output, shape index: {}]  }
   0x1   :  { %v228_v0 = vld [vmem:[%s416_s0] sm:$0xff]   ;;  %v259_v4 = vld [vmem:[%s416_s0 + $0x8] sm:$0xff]   ;;  %v260_v5 = vld [vmem:[%s416_s0 + $0x10] sm:$0xff]  }
   0x2   :  { %v292_v1 = vld [vmem:[%s417_s1] ss:$0 sm:$0xff]  ;;  %v229_v2 = vunpack.c.l.bf16 %v228_v0  ;;  %v230_v3 = vunpack.c.h.bf16 %v228_v0  ;;  %v261_v6 = vld [vmem:[%s416_s0 + $0x18] sm:$0xff]   ;;  %v233_v8 = vunpack.c.l.bf16 %v259_v4  ;;  %v234_v9 = vunpack.c.h.bf16 %v259_v4  ;;  %v263_v41 = vld [vmem:[%s416_s0 + $0x28] sm:$0xff]  }
   0x3   :  { %v306_v7 = vld [vmem:[%s418_s2] ss:$0 sm:$0xff]  ;;  %v237_v10 = vunpack.c.l.bf16 %v260_v5  ;;  %v238_v11 = vunpack.c.h.bf16 %v260_v5  ;;  %v241_v14 = vunpack.c.l.bf16 %v261_v6  ;;  %v242_v15 = vunpack.c.h.bf16 %v261_v6  ;;  %v264_v42 = vld [vmem:[%s416_s0 + $0x30] sm:$0xff]   ;;  %v265_v47 = vld [vmem:[%s416_s0 + $0x38] sm:$0xff]  }
   0x4   :  { %v53_v12 = vmul.f32 %v229_v2, %v292_v1  ;;  %v54_v13 = vmul.f32 %v230_v3, %v292_v1  ;;  %v55_v16 = vmul.f32 %v233_v8, %v292_v1  ;;  %v56_v17 = vmul.f32 %v234_v9, %v292_v1  ;;  %v262_v36 = vld [vmem:[%s416_s0 + $0x20] sm:$0xff]  }
   0x5   :  { %v57_v18 = vmul.f32 %v237_v10, %v292_v1  ;;  %v58_v19 = vmul.f32 %v238_v11, %v292_v1  ;;  %v59_v22 = vmul.f32 %v241_v14, %v292_v1  ;;  %v60_v23 = vmul.f32 %v242_v15, %v292_v1 }
   0x6   :  { %v76_v20 = vadd.f32 %v306_v7, %v53_v12  ;;  %v77_v21 = vadd.f32 %v306_v7, %v54_v13  ;;  %v78_v24 = vadd.f32 %v306_v7, %v55_v16  ;;  %v79_v25 = vadd.f32 %v306_v7, %v56_v17 }
   0x7   :  { %v80_v26 = vadd.f32 %v306_v7, %v57_v18  ;;  %v81_v27 = vadd.f32 %v306_v7, %v58_v19  ;;  %v82_v30 = vadd.f32 %v306_v7, %v59_v22  ;;  %v83_v31 = vadd.f32 %v306_v7, %v60_v23 }
   0x8   :  { %v92_v28 = vmax.f32 %v76_v20, 0.0  ;;  %v93_v29 = vmax.f32 %v77_v21, 0.0  ;;  %v94_v32 = vmax.f32 %v78_v24, 0.0  ;;  %v95_v33 = vmax.f32 %v79_v25, 0.0 }
   0x9   :  { %v96_v34 = vmax.f32 %v80_v26, 0.0  ;;  %v97_v35 = vmax.f32 %v81_v27, 0.0  ;;  %v98_v39 = vmax.f32 %v82_v30, 0.0  ;;  %v99_v40 = vmax.f32 %v83_v31, 0.0 }
   0xa   :  { %v211_v37 = vpack.c.bf16 %v92_v28, %v92_v28  ;;  %v212_v38 = vpack.c.bf16 %v93_v29, %v93_v29  ;;  %v213_v43 = vpack.c.bf16 %v94_v32, %v94_v32  ;;  %v214_v44 = vpack.c.bf16 %v95_v33, %v95_v33 }
   0xb   :  { %v215_v45 = vpack.c.bf16 %v96_v34, %v96_v34  ;;  %v216_v46 = vpack.c.bf16 %v97_v35, %v97_v35  ;;  %v217_v48 = vpack.c.bf16 %v98_v39, %v98_v39  ;;  %v218_v49 = vpack.c.bf16 %v99_v40, %v99_v40 }
   0xc   :  { %173 = vst.msk [vmem:[%s419_s3] sm:$0xf] %vm172_vm0, %v211_v37  ;;  %174 = vst.msk [vmem:[%s419_s3 + $0x4] sm:$0xf] %vm172_vm0, %v212_v38  ;;  %v245_v50 = vunpack.c.l.bf16 %v262_v36  ;;  %v246_v51 = vunpack.c.h.bf16 %v262_v36  ;;  %v249_v52 = vunpack.c.l.bf16 %v263_v41  ;;  %v250_v53 = vunpack.c.h.bf16 %v263_v41 }
   0xd   :  { %175 = vst.msk [vmem:[%s419_s3 + $0x8] sm:$0xf] %vm172_vm0, %v213_v43  ;;  %176 = vst.msk [vmem:[%s419_s3 + $0xc] sm:$0xf] %vm172_vm0, %v214_v44  ;;  %v253_v54 = vunpack.c.l.bf16 %v264_v42  ;;  %v254_v55 = vunpack.c.h.bf16 %v264_v42  ;;  %v257_v58 = vunpack.c.l.bf16 %v265_v47  ;;  %v258_v59 = vunpack.c.h.bf16 %v265_v47 }
   0xe   :  { %177 = vst.msk [vmem:[%s419_s3 + $0x10] sm:$0xf] %vm172_vm0, %v215_v45  ;;  %178 = vst.msk [vmem:[%s419_s3 + $0x14] sm:$0xf] %vm172_vm0, %v216_v46  ;;  %v61_v56 = vmul.f32 %v245_v50, %v292_v1  ;;  %v62_v57 = vmul.f32 %v246_v51, %v292_v1  ;;  %v63_v60 = vmul.f32 %v249_v52, %v292_v1 }
   0xf   :  { %179 = vst.msk [vmem:[%s419_s3 + $0x18] sm:$0xf] %vm172_vm0, %v217_v48  ;;  %180 = vst.msk [vmem:[%s419_s3 + $0x1c] sm:$0xf] %vm172_vm0, %v218_v49  ;;  %v64_v61 = vmul.f32 %v250_v53, %v292_v1  ;;  %v65_v62 = vmul.f32 %v253_v54, %v292_v1  ;;  %v66_v63 = vmul.f32 %v254_v55, %v292_v1 }
  0x10   :  { %v84_v0 = vadd.f32 %v306_v7, %v61_v56  ;;  %v85_v2 = vadd.f32 %v306_v7, %v62_v57  ;;  %v67_v3 = vmul.f32 %v257_v58, %v292_v1  ;;  %v68_v4 = vmul.f32 %v258_v59, %v292_v1 }
  0x11   :  { %v86_v5 = vadd.f32 %v306_v7, %v63_v60  ;;  %v87_v6 = vadd.f32 %v306_v7, %v64_v61  ;;  %v88_v8 = vadd.f32 %v306_v7, %v65_v62  ;;  %v89_v9 = vadd.f32 %v306_v7, %v66_v63 }
  0x12   :  { %v100_v10 = vmax.f32 %v84_v0, 0.0  ;;  %v101_v11 = vmax.f32 %v85_v2, 0.0  ;;  %v90_v12 = vadd.f32 %v306_v7, %v67_v3  ;;  %v91_v13 = vadd.f32 %v306_v7, %v68_v4 }
  0x13   :  { %v102_v14 = vmax.f32 %v86_v5, 0.0  ;;  %v103_v15 = vmax.f32 %v87_v6, 0.0  ;;  %v104_v16 = vmax.f32 %v88_v8, 0.0  ;;  %v105_v17 = vmax.f32 %v89_v9, 0.0 }
  0x14   :  { %v219_v18 = vpack.c.bf16 %v100_v10, %v100_v10  ;;  %v220_v1 = vpack.c.bf16 %v101_v11, %v101_v11  ;;  %v106_v19 = vmax.f32 %v90_v12, 0.0  ;;  %v107_v20 = vmax.f32 %v91_v13, 0.0 }
  0x15   :  { %v221_v21 = vpack.c.bf16 %v102_v14, %v102_v14  ;;  %v222_v22 = vpack.c.bf16 %v103_v15, %v103_v15  ;;  %v223_v23 = vpack.c.bf16 %v104_v16, %v104_v16  ;;  %v224_v24 = vpack.c.bf16 %v105_v17, %v105_v17 }
  0x16   :  { %181 = vst.msk [vmem:[%s419_s3 + $0x20] sm:$0xf] %vm172_vm0, %v219_v18  ;;  %182 = vst.msk [vmem:[%s419_s3 + $0x24] sm:$0xf] %vm172_vm0, %v220_v1  ;;  %v225_v7 = vpack.c.bf16 %v106_v19, %v106_v19  ;;  %v226_v25 = vpack.c.bf16 %v107_v20, %v107_v20 }
  0x17   :  { %183 = vst.msk [vmem:[%s419_s3 + $0x28] sm:$0xf] %vm172_vm0, %v221_v21  ;;  %184 = vst.msk [vmem:[%s419_s3 + $0x2c] sm:$0xf] %vm172_vm0, %v222_v22 }
  0x18   :  { %185 = vst.msk [vmem:[%s419_s3 + $0x30] sm:$0xf] %vm172_vm0, %v223_v23  ;;  %186 = vst.msk [vmem:[%s419_s3 + $0x34] sm:$0xf] %vm172_vm0, %v224_v24 }
  0x19   :  { %187 = vst.msk [vmem:[%s419_s3 + $0x38] sm:$0xf] %vm172_vm0, %v225_v7  ;;  %188 = vst.msk [vmem:[%s419_s3 + $0x3c] sm:$0xf] %vm172_vm0, %v226_v25 }

// kernel: pallas_forward.29
= control target key start
LH: loop header
LB: loop body
LE: loop exit
PB: predicated region body
PF: predicated region fallthrough
CT: control target
= control target key end

     0   :  { %vm64_vm0 = vcmask 257024   ;;  %s136_s0 = inlined_call_operand.vmem [shape: bf16[32,32], index: 0, kind: input, shape index: {}]   ;;  %s137_s1 = inlined_call_operand.vmem [shape: f32[1,32], index: 1, kind: input, shape index: {}]   ;;  %s138_s2 = inlined_call_operand.vmem [shape: f32[1,32], index: 2, kind: input, shape index: {}]   ;;  %s139_s3 = inlined_call_operand.vmem [shape: bf16[32,32], index: 3, kind: output, shape index: {}]  }
   0x1   :  { %v84_v0 = vld [vmem:[%s136_s0] sm:$0xff]   ;;  %v91_v4 = vld [vmem:[%s136_s0 + $0x8] sm:$0xff]  }
   0x2   :  { %v73_v1 = vld [vmem:[%s137_s1] ss:$0 sm:$0xff]  ;;  %v85_v2 = vunpack.c.l.bf16 %v84_v0  ;;  %v86_v3 = vunpack.c.h.bf16 %v84_v0  ;;  %v89_v6 = vunpack.c.l.bf16 %v91_v4  ;;  %v90_v7 = vunpack.c.h.bf16 %v91_v4 }
   0x3   :  { %v74_v5 = vld [vmem:[%s138_s2] ss:$0 sm:$0xff] }
   0x4   :  { %v29_v8 = vmul.f32 %v85_v2, %v73_v1  ;;  %v30_v9 = vmul.f32 %v86_v3, %v73_v1  ;;  %v31_v10 = vmul.f32 %v89_v6, %v73_v1  ;;  %v32_v11 = vmul.f32 %v90_v7, %v73_v1 }
   0x6   :  { %v40_v12 = vadd.f32 %v74_v5, %v29_v8  ;;  %v41_v13 = vadd.f32 %v74_v5, %v30_v9  ;;  %v42_v14 = vadd.f32 %v74_v5, %v31_v10  ;;  %v43_v15 = vadd.f32 %v74_v5, %v32_v11 }
   0x8   :  { %v44_v16 = vmax.f32 %v40_v12, 0.0  ;;  %v45_v17 = vmax.f32 %v41_v13, 0.0  ;;  %v46_v18 = vmax.f32 %v42_v14, 0.0  ;;  %v47_v19 = vmax.f32 %v43_v15, 0.0 }
   0xa   :  { %v79_v20 = vpack.c.bf16 %v44_v16, %v44_v16  ;;  %v80_v21 = vpack.c.bf16 %v45_v17, %v45_v17  ;;  %v81_v22 = vpack.c.bf16 %v46_v18, %v46_v18  ;;  %v82_v23 = vpack.c.bf16 %v47_v19, %v47_v19 }
   0xc   :  { %65 = vst.msk [vmem:[%s139_s3] sm:$0xf] %vm64_vm0, %v79_v20  ;;  %66 = vst.msk [vmem:[%s139_s3 + $0x4] sm:$0xf] %vm64_vm0, %v80_v21 }
   0xd   :  { %67 = vst.msk [vmem:[%s139_s3 + $0x8] sm:$0xf] %vm64_vm0, %v81_v22  ;;  %68 = vst.msk [vmem:[%s139_s3 + $0xc] sm:$0xf] %vm64_vm0, %v82_v23 }

// kernel: pallas_forward.28
= control target key start
LH: loop header
LB: loop body
LE: loop exit
PB: predicated region body
PF: predicated region fallthrough
CT: control target
= control target key end

     0   :  { %v288_v0 = vmov 0   ;;  %vm108_vm0 = vcmask 130048   ;;  %vm164_vm1 = vcmask 261120   ;;  %vm218_vm2 = vcmask 257024   ;;  %s376_s1 = inlined_call_operand.vmem [shape: bf16[144,32], index: 1, kind: input, shape index: {}]   ;;  %s377_s0 = inlined_call_operand.vmem [shape: bf16[32,144], index: 0, kind: input, shape index: {}]   ;;  %s378_s2 = inlined_call_operand.vmem [shape: bf16[32,32], index: 2, kind: output, shape index: {0}]   ;;  %s379_s3 = inlined_call_operand.vmem [shape: f32[8,32], index: 3, kind: output, shape index: {1}]  }
   0x1   :  { %115 = vmatprep.subr.bf16.mxu0 %v288_v0  ;;  %254 = vmatprep.subr.bf16.mxu1 %v288_v0  ;;  %v273_v1 = vld [vmem:[%s376_s1] sm:$0xff]   ;;  %v274_v2 = vld [vmem:[%s376_s1 + $0x8] sm:$0xff]   ;;  %v275_v3 = vld [vmem:[%s376_s1 + $0x10] sm:$0xff]   ;;  %v195_v47 = vlaneseq }
   0x2   :  { %116 = vmatpush1.bf16.msra.mxu0 %v273_v1  ;;  %263 = vmatpush1.bf16.msra.mxu1 %v273_v1  ;;  %v276_v4 = vld [vmem:[%s376_s1 + $0x18] sm:$0xff]   ;;  %v284_v5 = vld [vmem:[%s377_s0 + $0x4] ss:$8 sps:$4 sm:$0xff]   ;;  %v279_v9 = vld [vmem:[%s376_s1 + $0x30] sm:$0xff]  }
   0x3   :  { %117 = vmatprep.subr.bf16.mxu0 %v288_v0  ;;  %255 = vmatprep.subr.bf16.mxu1 %v288_v0  ;;  %v287_v6 = vld [vmem:[%s377_s0 + $0x14] ss:$8 sps:$4 sm:$0xff]   ;;  %v277_v7 = vld [vmem:[%s376_s1 + $0x20] sm:$0xff]   ;;  %v278_v8 = vld [vmem:[%s376_s1 + $0x28] sm:$0xff]   ;;  %v196_v52 = vshrl.u32 %v195_v47, 7 }
   0x4   :  { %244 = vmatprep.mubr.msk.bf16.mxu0 %vm108_vm0, %v284_v5  ;;  %245 = vmatprep.mubr.msk.bf16.mxu1 %vm108_vm0, %v287_v6  ;;  %v280_v10 = vld [vmem:[%s376_s1 + $0x38] sm:$0xff]   ;;  %v281_v11 = vld [vmem:[%s376_s1 + $0x40] sm:$0xff]  }
   0x5   :  { %v282_v12 = vld [vmem:[%s377_s0] ss:$8 sps:$4 sm:$0xff]   ;;  %v285_v13 = vld [vmem:[%s377_s0 + $0x10] ss:$8 sps:$4 sm:$0xff]   ;;  %vm198_vm3 = vcmp.eq.s32.totalorder %v196_v52, 1  ;;  %vm197_vm4 = vcmp.eq.s32.totalorder %v196_v52, 0 }
   0x6   :  { %118 = vmatpush1.bf16.msra.mxu0 %v274_v2  ;;  %264 = vmatpush1.bf16.msra.mxu1 %v274_v2 }
   0x7   :  { %119 = vmatprep.subr.bf16.mxu0 %v288_v0  ;;  %256 = vmatprep.subr.bf16.mxu1 %v288_v0 }
   0xa   :  { %120 = vmatpush1.bf16.msra.mxu0 %v275_v3  ;;  %265 = vmatpush1.bf16.msra.mxu1 %v275_v3 }
   0xb   :  { %121 = vmatprep.subr.bf16.mxu0 %v288_v0  ;;  %257 = vmatprep.subr.bf16.mxu1 %v288_v0 }
   0xe   :  { %122 = vmatpush1.bf16.msra.mxu0 %v276_v4  ;;  %266 = vmatpush1.bf16.msra.mxu1 %v276_v4 }
   0xf   :  { %123 = vmatprep.subr.bf16.mxu0 %v288_v0  ;;  %258 = vmatprep.subr.bf16.mxu1 %v288_v0 }
  0x12   :  { %124 = vmatpush1.bf16.msra.mxu0 %v277_v7  ;;  %267 = vmatpush1.bf16.msra.mxu1 %v277_v7 }
  0x13   :  { %125 = vmatprep.subr.bf16.mxu0 %v288_v0  ;;  %259 = vmatprep.subr.bf16.mxu1 %v288_v0 }
  0x16   :  { %126 = vmatpush1.bf16.msra.mxu0 %v278_v8  ;;  %268 = vmatpush1.bf16.msra.mxu1 %v278_v8 }
  0x17   :  { %127 = vmatprep.subr.bf16.mxu0 %v288_v0  ;;  %260 = vmatprep.subr.bf16.mxu1 %v288_v0 }
  0x1a   :  { %128 = vmatpush1.bf16.msra.mxu0 %v279_v9  ;;  %269 = vmatpush1.bf16.msra.mxu1 %v279_v9 }
  0x1b   :  { %129 = vmatprep.subr.bf16.mxu0 %v288_v0  ;;  %261 = vmatprep.subr.bf16.mxu1 %v288_v0 }
  0x1e   :  { %130 = vmatpush1.bf16.msra.mxu0 %v280_v10  ;;  %270 = vmatpush1.bf16.msra.mxu1 %v280_v10 }
  0x1f   :  { %131 = vmatprep.subr.bf16.mxu0 %v288_v0  ;;  %262 = vmatprep.subr.bf16.mxu1 %v288_v0 }
  0x22   :  { %132 = vmatpush1.bf16.msra.mxu0 %v281_v11  ;;  %271 = vmatpush1.bf16.msra.mxu1 %v281_v11 }
  0x25   :  { %148 = vmatmul.mubr.bf16.vlgmr.msra.gmra.mrb[0].mxu0 %v282_v12  ;;  %156 = vmatmul.mubr.bf16.vlgmr.msra.gmra.mrb[0].mxu1 %v285_v13 }
  0xf8   :  { %v149_v14 = vpop.f32.mrb[0].mxu0  ;;  %v157_v15 = vpop.f32.mrb[0].mxu1 }
  0xf9   :  { %v178_v16 = vmul.f32 %v149_v14, %v149_v14  ;;  %v250_v17 = vpack.c.bf16 %v149_v14, %v149_v14  ;;  %v151_v18 = vpop.f32.mrb[1].mxu0  ;;  %v159_v19 = vpop.f32.mrb[1].mxu1  ;;  %v165_v20 = vsel %vm164_vm1, %v149_v14, 0.0  ;;  %v180_v21 = vmul.f32 %v157_v15, %v157_v15 }
  0xfa   :  { %v252_v22 = vpack.c.bf16 %v157_v15, %v157_v15  ;;  %v152_v23 = vpop.f32.mrb[2].mxu0  ;;  %v160_v24 = vpop.f32.mrb[2].mxu1  ;;  %v168_v25 = vsel %vm164_vm1, %v157_v15, 0.0 }
  0xfb   :  { %219 = vst.msk [vmem:[%s378_s2] sm:$0xf] %vm218_vm2, %v250_v17  ;;  %v166_v26 = vsel %vm164_vm1, %v152_v23, 0.0  ;;  %v179_v27 = vmul.f32 %v152_v23, %v152_v23  ;;  %v251_v28 = vpack.c.bf16 %v152_v23, %v152_v23  ;;  %v154_v29 = vpop.f32.mrb[3].mxu0  ;;  %v162_v30 = vpop.f32.mrb[3].mxu1  ;;  %v182_v31 = vsel %vm164_vm1, %v178_v16, 0.0 }
  0xfc   :  { %221 = vst.msk [vmem:[%s378_s2 + $0x8] sm:$0xf] %vm218_vm2, %v252_v22  ;;  %v167_v32 = vadd.f32 %v166_v26, %v165_v20  ;;  %v185_v33 = vsel %vm164_vm1, %v180_v21, 0.0  ;;  %v181_v35 = vmul.f32 %v160_v24, %v160_v24  ;;  %v253_v36 = vpack.c.bf16 %v160_v24, %v160_v24 }
  0xfd   :  { %v183_v34 = vsel %vm164_vm1, %v179_v27, 0.0  ;;  %220 = vst.msk [vmem:[%s378_s2 + $0x4] sm:$0xf] %vm218_vm2, %v251_v28  ;;  %v170_v39 = vsel %vm164_vm1, %v160_v24, 0.0 }
  0xfe   :  { %v184_v37 = vadd.f32 %v183_v34, %v182_v31  ;;  %v169_v38 = vadd.f32 %v168_v25, %v167_v32  ;;  %222 = vst.msk [vmem:[%s378_s2 + $0xc] sm:$0xf] %vm218_vm2, %v253_v36  ;;  %v187_v42 = vsel %vm164_vm1, %v181_v35, 0.0 }
 0x100   :  { %v171_v40 = vadd.f32 %v170_v39, %v169_v38  ;;  %v186_v41 = vadd.f32 %v185_v33, %v184_v37 }
 0x102   :  { %v172_v43 = vrot.slane %v171_v40, 4  ;;  %v188_v44 = vadd.f32 %v187_v42, %v186_v41 }
 0x104   :  { %v173_v45 = vadd.f32 %v172_v43, %v171_v40  ;;  %v189_v46 = vrot.slane %v188_v44, 4 }
 0x106   :  { %v174_v48 = vrot.slane %v173_v45, 2  ;;  %v190_v49 = vadd.f32 %v189_v46, %v188_v44 }
 0x108   :  { %v175_v50 = vadd.f32 %v174_v48, %v173_v45  ;;  %v191_v51 = vrot.slane %v190_v49, 2 }
 0x10a   :  { %v192_v53 = vadd.f32 %v191_v51, %v190_v49  ;;  %v176_v54 = vrot.slane %v175_v50, 1 }
 0x10c   :  { %v193_v55 = vrot.slane %v192_v53, 1  ;;  %v177_v57 = vadd.f32 %v176_v54, %v175_v50 }
 0x10e   :  { %v194_v56 = vadd.f32 %v193_v55, %v192_v53 }
 0x110   :  { %v199_v58 = vsel %vm198_vm3, %v194_v56, 0.0 }
 0x111   :  { %v200_v59 = vsel %vm197_vm4, %v177_v57, %v199_v58 }
 0x112   :  { %201 = vst.msk [vmem:[%s379_s3] sm:$0xff] %vm164_vm1, %v200_v59 }

// kernel: pallas_forward.30
= control target key start
LH: loop header
LB: loop body
LE: loop exit
PB: predicated region body
PF: predicated region fallthrough
CT: control target
= control target key end

     0   :  { %v366_v1 = vmov 0.0   ;;  %vm367_vm0 = vmmov 0   ;;  %vm170_vm1 = vcmask 261120   ;;  %vm254_vm2 = vcmask 523264   ;;  %s457_s1 = inlined_call_operand.vmem [shape: bf16[288,64], index: 1, kind: input, shape index: {}]   ;;  %s458_s0 = inlined_call_operand.vmem [shape: bf16[8,288], index: 0, kind: input, shape index: {}]   ;;  %s459_s2 = inlined_call_operand.vmem [shape: bf16[8,64], index: 2, kind: output, shape index: {0}]   ;;  %s460_s3 = inlined_call_operand.vmem [shape: f32[8,64], index: 3, kind: output, shape index: {1}]  }
   0x1   :  { %v345_v0 = vld [vmem:[%s457_s1 + $0x40] sm:$0xff]   ;;  %335 = vmatprep.subr.bf16.mxu1 %v366_v1  ;;  %339 = vmatprep.mubr.msk.bf16.mxu1 %vm367_vm0, %v366_v1  ;;  %v347_v3 = vld [vmem:[%s457_s1 + $0x48] sm:$0xff]   ;;  %v349_v5 = vld [vmem:[%s457_s1 + $0x50] sm:$0xff]   ;;  %vm278_vm3 = vcmask 519168   ;;  %v270_v40 = vlaneseq }
   0x2   :  { %v346_v2 = vld [vmem:[%s457_s1] sm:$0xff]   ;;  %310 = vmatprep.subr.bf16.mxu0 %v345_v0  ;;  %v348_v4 = vld [vmem:[%s457_s1 + $0x8] sm:$0xff]   ;;  %v350_v6 = vld [vmem:[%s457_s1 + $0x10] sm:$0xff]  }
   0x3   :  { %311 = vmatpush3.bf16.msra.mxu0 %v346_v2  ;;  %v351_v7 = vld [vmem:[%s457_s1 + $0x58] sm:$0xff]   ;;  %v353_v9 = vld [vmem:[%s457_s1 + $0x60] sm:$0xff]   ;;  %v355_v12 = vld [vmem:[%s457_s1 + $0x68] sm:$0xff]   ;;  %v271_v45 = vshrl.u32 %v270_v40, 7 }
   0x4   :  { %312 = vmatprep.subr.bf16.mxu0 %v347_v3  ;;  %v352_v8 = vld [vmem:[%s457_s1 + $0x18] sm:$0xff]   ;;  %v359_v10 = vld [vmem:[%s457_s1 + $0x80] sm:$0xff]   ;;  %v362_v13 = vld [vmem:[%s457_s1 + $0x88] sm:$0xff]  }
   0x5   :  { %v354_v11 = vld [vmem:[%s457_s1 + $0x20] sm:$0xff]   ;;  %336 = vmatpush3.bf16.msra.mxu1 %v359_v10  ;;  %v356_v15 = vld [vmem:[%s457_s1 + $0x28] sm:$0xff]   ;;  %v357_v18 = vld [vmem:[%s457_s1 + $0x70] sm:$0xff]   ;;  %vm273_vm4 = vcmp.eq.s32.totalorder %v271_v45, 1  ;;  %vm272_vm5 = vcmp.eq.s32.totalorder %v271_v45, 0 }
   0x6   :  { %337 = vmatprep.subr.bf16.mxu1 %v366_v1  ;;  %v14_v14 = vld [vmem:[%s458_s0] sm:$0xff]  ;;  %v365_v17 = vld [vmem:[%s458_s0 + $0x8] ss:$0 sps:$4 sm:$0xff]   ;;  %v358_v19 = vld [vmem:[%s457_s1 + $0x30] sm:$0xff]  }
   0x7   :  { %313 = vmatpush3.bf16.msra.mxu0 %v348_v4  ;;  %v289_v16 = vcombine.high %v14_v14, %v14_v14  ;;  %v360_v20 = vld [vmem:[%s457_s1 + $0x78] sm:$0xff]   ;;  %v288_v22 = vcombine.low %v14_v14, %v14_v14 }
   0x8   :  { %314 = vmatprep.subr.bf16.mxu0 %v349_v5  ;;  %v361_v21 = vld [vmem:[%s457_s1 + $0x38] sm:$0xff]  }
   0x9   :  { %338 = vmatpush3.bf16.msra.mxu1 %v362_v13  ;;  %206 = vmatprep.mubr.bf16.mxu0 %v289_v16 }
   0xb   :  { %315 = vmatpush3.bf16.msra.mxu0 %v350_v6 }
   0xc   :  { %316 = vmatprep.subr.bf16.mxu0 %v351_v7  ;;  %340 = vmatmul.mubr.msk.bf16.vlgmr.msra.gmra.mrb[0].mxu1 %vm170_vm1, %v365_v17 }
   0xf   :  { %317 = vmatpush3.bf16.msra.mxu0 %v352_v8 }
  0x10   :  { %318 = vmatprep.subr.bf16.mxu0 %v353_v9 }
  0x13   :  { %319 = vmatpush3.bf16.msra.mxu0 %v354_v11 }
  0x14   :  { %320 = vmatprep.subr.bf16.mxu0 %v355_v12 }
  0x17   :  { %321 = vmatpush3.bf16.msra.mxu0 %v356_v15 }
  0x18   :  { %322 = vmatprep.subr.bf16.mxu0 %v357_v18 }
  0x1b   :  { %323 = vmatpush3.bf16.msra.mxu0 %v358_v19 }
  0x1c   :  { %324 = vmatprep.subr.bf16.mxu0 %v360_v20 }
  0x1f   :  { %325 = vmatpush3.bf16.msra.mxu0 %v361_v21 }
  0x22   :  { %207 = vmatmul.mubr.bf16.vlgmr.msra.gmra.mrb[0].mxu0 %v288_v22 }
  0xdf   :  { %v248_v23 = vpop.f32.mrb[0].mxu1 }
  0xe0   :  { %v341_v24 = vpop.f32.mrb[1].mxu1 }
  0xe1   :  { %v251_v25 = vpop.f32.mrb[2].mxu1 }
  0xe2   :  { %v342_v26 = vpop.f32.mrb[3].mxu1 }
  0xf5   :  { %v326_v27 = vpop.f32.mrb[0].mxu0 }
  0xf6   :  { %v327_v28 = vpop.f32.mrb[1].mxu0 }
  0xf7   :  { %v328_v29 = vadd.f32 %v327_v28, %v326_v27  ;;  %v329_v30 = vpop.f32.mrb[2].mxu0 }
  0xf8   :  { %v330_v31 = vpop.f32.mrb[3].mxu0 }
  0xf9   :  { %v249_v32 = vadd.f32 %v328_v29, %v248_v23 }
  0xfb   :  { %v255_v33 = vsel %vm254_vm2, %v249_v32, 0.0  ;;  %v262_v34 = vmul.f32 %v249_v32, %v249_v32  ;;  %v277_v35 = vpack.c.bf16 %v249_v32, %v249_v32 }
  0xfc   :  { %v256_v36 = vrot.slane %v255_v33, 4 }
  0xfd   :  { %v263_v37 = vsel %vm254_vm2, %v262_v34, 0.0  ;;  %279 = vst.msk [vmem:[%s459_s2] sm:$0xf] %vm278_vm3, %v277_v35 }
  0xfe   :  { %v257_v38 = vadd.f32 %v256_v36, %v255_v33  ;;  %v264_v39 = vrot.slane %v263_v37, 4 }
 0x100   :  { %v258_v41 = vrot.slane %v257_v38, 2  ;;  %v265_v42 = vadd.f32 %v264_v39, %v263_v37 }
 0x102   :  { %v259_v43 = vadd.f32 %v258_v41, %v257_v38  ;;  %v266_v44 = vrot.slane %v265_v42, 2 }
 0x104   :  { %v267_v46 = vadd.f32 %v266_v44, %v265_v42  ;;  %v260_v47 = vrot.slane %v259_v43, 1 }
 0x106   :  { %v268_v48 = vrot.slane %v267_v46, 1  ;;  %v261_v50 = vadd.f32 %v260_v47, %v259_v43 }
 0x108   :  { %v269_v49 = vadd.f32 %v268_v48, %v267_v46 }
 0x10a   :  { %v274_v51 = vsel %vm273_vm4, %v269_v49, 0.0 }
 0x10b   :  { %v275_v52 = vsel %vm272_vm5, %v261_v50, %v274_v51 }
 0x10c   :  { %276 = vst.msk [vmem:[%s460_s3] sm:$0xff] %vm254_vm2, %v275_v52 }

// kernel: pallas_forward.31
= control target key start
LH: loop header
LB: loop body
LE: loop exit
PB: predicated region body
PF: predicated region fallthrough
CT: control target
= control target key end

     0   :  { %vm34_vm0 = vcmask 519168   ;;  %s74_s0 = inlined_call_operand.vmem [shape: bf16[8,64], index: 0, kind: input, shape index: {}]   ;;  %s75_s1 = inlined_call_operand.vmem [shape: f32[1,64], index: 1, kind: input, shape index: {}]   ;;  %s76_s2 = inlined_call_operand.vmem [shape: f32[1,64], index: 2, kind: input, shape index: {}]   ;;  %s77_s3 = inlined_call_operand.vmem [shape: bf16[8,64], index: 3, kind: output, shape index: {}]  }
   0x1   :  { %v14_v0 = vld [vmem:[%s74_s0] sm:$0xf] }
   0x2   :  { %v40_v1 = vld [vmem:[%s75_s1] ss:$0 sm:$0xff]  ;;  %v15_v2 = vunpack.c.l.bf16 %v14_v0 }
   0x3   :  { %v41_v3 = vld [vmem:[%s76_s2] ss:$0 sm:$0xff] }
   0x4   :  { %v23_v4 = vmul.f32 %v40_v1, %v15_v2 }
   0x6   :  { %v31_v5 = vadd.f32 %v41_v3, %v23_v4 }
   0x8   :  { %v32_v6 = vmax.f32 %v31_v5, 0.0 }
   0xa   :  { %v33_v7 = vpack.c.bf16 %v32_v6, %v32_v6 }
   0xc   :  { %35 = vst.msk [vmem:[%s77_s3] sm:$0xf] %vm34_vm0, %v33_v7 }

// kernel: pallas_forward.34
= control target key start
LH: loop header
LB: loop body
LE: loop exit
PB: predicated region body
PF: predicated region fallthrough
CT: control target
= control target key end

     0   :  { %vm39_vm0 = vcmask 519168   ;;  %s87_s0 = inlined_call_operand.vmem [shape: bf16[8,64], index: 0, kind: input, shape index: {}]   ;;  %s88_s1 = inlined_call_operand.vmem [shape: f32[1,64], index: 1, kind: input, shape index: {}]   ;;  %s89_s2 = inlined_call_operand.vmem [shape: f32[1,64], index: 2, kind: input, shape index: {}]   ;;  %s90_s3 = inlined_call_operand.vmem [shape: bf16[8,64], index: 3, kind: input, shape index: {}]   ;;  %s91_s4 = inlined_call_operand.vmem [shape: bf16[8,64], index: 4, kind: output, shape index: {}]  }
   0x1   :  { %v17_v0 = vld [vmem:[%s87_s0] sm:$0xf] }
   0x2   :  { %v45_v1 = vld [vmem:[%s88_s1] ss:$0 sm:$0xff]  ;;  %v18_v2 = vunpack.c.l.bf16 %v17_v0 }
   0x3   :  { %v35_v3 = vld [vmem:[%s90_s3] sm:$0xf] }
   0x4   :  { %v46_v4 = vld [vmem:[%s89_s2] ss:$0 sm:$0xff]  ;;  %v26_v5 = vmul.f32 %v45_v1, %v18_v2  ;;  %v36_v6 = vunpack.c.l.bf16 %v35_v3 }
   0x6   :  { %v34_v7 = vadd.f32 %v46_v4, %v26_v5 }
   0x8   :  { %v37_v8 = vadd.f32 %v36_v6, %v34_v7 }
   0xa   :  { %v38_v9 = vpack.c.bf16 %v37_v8, %v37_v8 }
   0xc   :  { %40 = vst.msk [vmem:[%s91_s4] sm:$0xf] %vm39_vm0, %v38_v9 }

// kernel: pallas_forward.32
= control target key start
LH: loop header
LB: loop body
LE: loop exit
PB: predicated region body
PF: predicated region fallthrough
CT: control target
= control target key end

     0   :  { %v625_v36 = vmov 0.0   ;;  %vm626_vm0 = vmmov 0   ;;  %vm322_vm1 = vcmask 523264   ;;  %vm469_vm2 = vcmask 519168   ;;  %s774_s1 = inlined_call_operand.vmem [shape: bf16[576,64], index: 1, kind: input, shape index: {}]   ;;  %s775_s0 = inlined_call_operand.vmem [shape: bf16[8,576], index: 0, kind: input, shape index: {}]   ;;  %s776_s2 = inlined_call_operand.vmem [shape: bf16[8,64], index: 2, kind: output, shape index: {0}]   ;;  %s777_s3 = inlined_call_operand.vmem [shape: f32[8,64], index: 3, kind: output, shape index: {1}]  }
   0x1   :  { %v584_v0 = vld [vmem:[%s774_s1 + $0x40] sm:$0xff]   ;;  %v588_v4 = vld [vmem:[%s774_s1 + $0x48] sm:$0xff]   ;;  %v592_v8 = vld [vmem:[%s774_s1 + $0x50] sm:$0xff]  }
   0x2   :  { %v585_v1 = vld [vmem:[%s774_s1 + $0xc0] sm:$0xff]   ;;  %521 = vmatprep.subr.bf16.mxu0 %v584_v0  ;;  %v589_v5 = vld [vmem:[%s774_s1 + $0xc8] sm:$0xff]   ;;  %v593_v9 = vld [vmem:[%s774_s1 + $0xd0] sm:$0xff]  }
   0x3   :  { %v586_v2 = vld [vmem:[%s774_s1] sm:$0xff]   ;;  %543 = vmatprep.subr.bf16.mxu1 %v585_v1  ;;  %v590_v6 = vld [vmem:[%s774_s1 + $0x8] sm:$0xff]   ;;  %v594_v10 = vld [vmem:[%s774_s1 + $0x10] sm:$0xff]  }
   0x4   :  { %v587_v3 = vld [vmem:[%s774_s1 + $0x80] sm:$0xff]   ;;  %522 = vmatpush3.bf16.msra.mxu0 %v586_v2  ;;  %v591_v7 = vld [vmem:[%s774_s1 + $0x88] sm:$0xff]   ;;  %v595_v11 = vld [vmem:[%s774_s1 + $0x90] sm:$0xff]  }
   0x5   :  { %544 = vmatpush3.bf16.msra.mxu1 %v587_v3  ;;  %523 = vmatprep.subr.bf16.mxu0 %v588_v4  ;;  %v596_v12 = vld [vmem:[%s774_s1 + $0x58] sm:$0xff]   ;;  %v600_v16 = vld [vmem:[%s774_s1 + $0x60] sm:$0xff]   ;;  %v604_v20 = vld [vmem:[%s774_s1 + $0x68] sm:$0xff]   ;;  %v461_v3 = vlaneseq }
   0x6   :  { %545 = vmatprep.subr.bf16.mxu1 %v589_v5  ;;  %v597_v13 = vld [vmem:[%s774_s1 + $0xd8] sm:$0xff]   ;;  %v601_v17 = vld [vmem:[%s774_s1 + $0xe0] sm:$0xff]   ;;  %v605_v21 = vld [vmem:[%s774_s1 + $0xe8] sm:$0xff]  }
   0x7   :  { %v598_v14 = vld [vmem:[%s774_s1 + $0x18] sm:$0xff]   ;;  %v602_v18 = vld [vmem:[%s774_s1 + $0x20] sm:$0xff]   ;;  %v606_v22 = vld [vmem:[%s774_s1 + $0x28] sm:$0xff]  }
   0x8   :  { %524 = vmatpush3.bf16.msra.mxu0 %v590_v6  ;;  %v599_v15 = vld [vmem:[%s774_s1 + $0x98] sm:$0xff]   ;;  %v603_v19 = vld [vmem:[%s774_s1 + $0xa0] sm:$0xff]   ;;  %v607_v23 = vld [vmem:[%s774_s1 + $0xa8] sm:$0xff]  }
   0x9   :  { %546 = vmatpush3.bf16.msra.mxu1 %v591_v7  ;;  %525 = vmatprep.subr.bf16.mxu0 %v592_v8  ;;  %v608_v24 = vld [vmem:[%s774_s1 + $0x70] sm:$0xff]   ;;  %v612_v28 = vld [vmem:[%s774_s1 + $0x78] sm:$0xff]   ;;  %v14_v32 = vld [vmem:[%s775_s0] sm:$0xff]  ;;  %v462_v8 = vshrl.u32 %v461_v3, 7 }
   0xa   :  { %547 = vmatprep.subr.bf16.mxu1 %v593_v9  ;;  %v609_v25 = vld [vmem:[%s774_s1 + $0xf0] sm:$0xff]   ;;  %v613_v29 = vld [vmem:[%s774_s1 + $0xf8] sm:$0xff]   ;;  %v479_v33 = vcombine.low %v14_v32, %v14_v32  ;;  %v480_v34 = vcombine.high %v14_v32, %v14_v32  ;;  %v15_v35 = vld [vmem:[%s775_s0 + $0x8] sm:$0xff] }
   0xb   :  { %v610_v26 = vld [vmem:[%s774_s1 + $0x30] sm:$0xff]   ;;  %v614_v30 = vld [vmem:[%s774_s1 + $0x38] sm:$0xff]   ;;  %v481_v37 = vcombine.low %v15_v35, %v15_v35  ;;  %v482_v38 = vcombine.high %v15_v35, %v15_v35  ;;  %v621_v39 = vld [vmem:[%s774_s1 + $0x100] sm:$0xff]   ;;  %vm464_vm3 = vcmp.eq.s32.totalorder %v462_v8, 1  ;;  %vm463_vm4 = vcmp.eq.s32.totalorder %v462_v8, 0 }
   0xc   :  { %526 = vmatpush3.bf16.msra.mxu0 %v594_v10  ;;  %v611_v27 = vld [vmem:[%s774_s1 + $0xb0] sm:$0xff]   ;;  %v615_v31 = vld [vmem:[%s774_s1 + $0xb8] sm:$0xff]   ;;  %358 = vmatprep.mubr.bf16.mxu0 %v480_v34  ;;  %v622_v40 = vld [vmem:[%s774_s1 + $0x108] sm:$0xff]  }
   0xd   :  { %548 = vmatpush3.bf16.msra.mxu1 %v595_v11  ;;  %527 = vmatprep.subr.bf16.mxu0 %v596_v12  ;;  %v623_v41 = vld [vmem:[%s774_s1 + $0x110] sm:$0xff]   ;;  %v624_v42 = vld [vmem:[%s774_s1 + $0x118] sm:$0xff]  }
   0xe   :  { %549 = vmatprep.subr.bf16.mxu1 %v597_v13  ;;  %398 = vmatprep.mubr.bf16.mxu1 %v482_v38  ;;  %v618_v43 = vld [vmem:[%s775_s0 + $0x10] ss:$0 sps:$4 sm:$0xff]  }
  0x10   :  { %528 = vmatpush3.bf16.msra.mxu0 %v598_v14 }
  0x11   :  { %550 = vmatpush3.bf16.msra.mxu1 %v599_v15  ;;  %529 = vmatprep.subr.bf16.mxu0 %v600_v16 }
  0x12   :  { %551 = vmatprep.subr.bf16.mxu1 %v601_v17 }
  0x14   :  { %530 = vmatpush3.bf16.msra.mxu0 %v602_v18 }
  0x15   :  { %552 = vmatpush3.bf16.msra.mxu1 %v603_v19  ;;  %531 = vmatprep.subr.bf16.mxu0 %v604_v20 }
  0x16   :  { %553 = vmatprep.subr.bf16.mxu1 %v605_v21 }
  0x18   :  { %532 = vmatpush3.bf16.msra.mxu0 %v606_v22 }
  0x19   :  { %554 = vmatpush3.bf16.msra.mxu1 %v607_v23  ;;  %533 = vmatprep.subr.bf16.mxu0 %v608_v24 }
  0x1a   :  { %555 = vmatprep.subr.bf16.mxu1 %v609_v25 }
  0x1c   :  { %534 = vmatpush3.bf16.msra.mxu0 %v610_v26 }
  0x1d   :  { %556 = vmatpush3.bf16.msra.mxu1 %v611_v27  ;;  %535 = vmatprep.subr.bf16.mxu0 %v612_v28 }
  0x1e   :  { %557 = vmatprep.subr.bf16.mxu1 %v613_v29 }
  0x20   :  { %536 = vmatpush3.bf16.msra.mxu0 %v614_v30 }
  0x21   :  { %558 = vmatpush3.bf16.msra.mxu1 %v615_v31  ;;  %570 = vmatprep.subr.bf16.mxu0 %v625_v36 }
  0x23   :  { %359 = vmatmul.mubr.bf16.vlgmr.msra.gmra.mrb[0].mxu0 %v479_v33 }
  0x24   :  { %399 = vmatmul.mubr.bf16.vlgmr.msra.gmra.mrb[0].mxu1 %v481_v37  ;;  %571 = vmatpush3.bf16.msra.mxu0 %v621_v39 }
  0x25   :  { %572 = vmatprep.subr.bf16.mxu0 %v625_v36  ;;  %578 = vmatprep.mubr.msk.bf16.mxu0 %vm626_vm0, %v625_v36 }
  0x28   :  { %573 = vmatpush3.bf16.msra.mxu0 %v622_v40 }
  0x29   :  { %574 = vmatprep.subr.bf16.mxu0 %v625_v36 }
  0x2c   :  { %575 = vmatpush3.bf16.msra.mxu0 %v623_v41 }
  0x2d   :  { %576 = vmatprep.subr.bf16.mxu0 %v625_v36 }
  0x30   :  { %577 = vmatpush3.bf16.msra.mxu0 %v624_v42 }
  0x33   :  { %579 = vmatmul.mubr.msk.bf16.vlgmr.msra.gmra.mrb[4].mxu0 %vm322_vm1, %v618_v43 }
  0xf6   :  { %v537_v44 = vpop.f32.mrb[0].mxu0 }
  0xf7   :  { %v559_v45 = vpop.f32.mrb[0].mxu1  ;;  %v538_v46 = vpop.f32.mrb[1].mxu0 }
  0xf8   :  { %v539_v47 = vadd.f32 %v538_v46, %v537_v44  ;;  %v560_v48 = vpop.f32.mrb[1].mxu1  ;;  %v540_v49 = vpop.f32.mrb[2].mxu0 }
  0xf9   :  { %v561_v50 = vadd.f32 %v560_v48, %v559_v45  ;;  %v541_v51 = vpop.f32.mrb[3].mxu0  ;;  %v562_v52 = vpop.f32.mrb[2].mxu1 }
  0xfa   :  { %v563_v53 = vpop.f32.mrb[3].mxu1 }
  0xfb   :  { %v401_v54 = vadd.f32 %v561_v50, %v539_v47 }
 0x106   :  { %v440_v55 = vpop.f32.mrb[4].mxu0 }
 0x107   :  { %v441_v56 = vadd.f32 %v440_v55, %v401_v54  ;;  %v580_v57 = vpop.f32.mrb[5].mxu0 }
 0x108   :  { %v443_v58 = vpop.f32.mrb[6].mxu0 }
 0x109   :  { %v446_v59 = vsel %vm322_vm1, %v441_v56, 0.0  ;;  %v453_v60 = vmul.f32 %v441_v56, %v441_v56  ;;  %v468_v61 = vpack.c.bf16 %v441_v56, %v441_v56  ;;  %v581_v62 = vpop.f32.mrb[7].mxu0 }
 0x10a   :  { %v447_v63 = vrot.slane %v446_v59, 4 }
 0x10b   :  { %v454_v0 = vsel %vm322_vm1, %v453_v60, 0.0  ;;  %470 = vst.msk [vmem:[%s776_s2] sm:$0xf] %vm469_vm2, %v468_v61 }
 0x10c   :  { %v448_v1 = vadd.f32 %v447_v63, %v446_v59  ;;  %v455_v2 = vrot.slane %v454_v0, 4 }
 0x10e   :  { %v449_v4 = vrot.slane %v448_v1, 2  ;;  %v456_v5 = vadd.f32 %v455_v2, %v454_v0 }
 0x110   :  { %v450_v6 = vadd.f32 %v449_v4, %v448_v1  ;;  %v457_v7 = vrot.slane %v456_v5, 2 }
 0x112   :  { %v458_v9 = vadd.f32 %v457_v7, %v456_v5  ;;  %v451_v10 = vrot.slane %v450_v6, 1 }
 0x114   :  { %v459_v11 = vrot.slane %v458_v9, 1  ;;  %v452_v13 = vadd.f32 %v451_v10, %v450_v6 }
 0x116   :  { %v460_v12 = vadd.f32 %v459_v11, %v458_v9 }
 0x118   :  { %v465_v14 = vsel %vm464_vm3, %v460_v12, 0.0 }
 0x119   :  { %v466_v15 = vsel %vm463_vm4, %v452_v13, %v465_v14 }
 0x11a   :  { %467 = vst.msk [vmem:[%s777_s3] sm:$0xff] %vm322_vm1, %v466_v15 }

// kernel: pallas_forward.33
= control target key start
LH: loop header
LB: loop body
LE: loop exit
PB: predicated region body
PF: predicated region fallthrough
CT: control target
= control target key end

     0   :  { %v30_v22 = vlaneseq  ;;  %v683_v45 = vmov 0.0   ;;  %vm684_vm0 = vmmov 0   ;;  %vm390_vm1 = vcmask 523264   ;;  %s857_s3 = inlined_call_operand.vmem [shape: bf16[576,64], index: 3, kind: input, shape index: {}]   ;;  %s858_s0 = inlined_call_operand.vmem [shape: bf16[8,576], index: 0, kind: input, shape index: {}]   ;;  %s859_s1 = inlined_call_operand.vmem [shape: f32[1,576], index: 1, kind: input, shape index: {}]   ;;  %s860_s2 = inlined_call_operand.vmem [shape: f32[1,576], index: 2, kind: input, shape index: {}]   ;;  %s861_s4 = inlined_call_operand.vmem [shape: bf16[8,64], index: 4, kind: output, shape index: {0}]   ;;  %s862_s5 = inlined_call_operand.vmem [shape: f32[8,64], index: 5, kind: output, shape index: {1}]  }
   0x1   :  { %v647_v0 = vld [vmem:[%s857_s3 + $0x40] sm:$0xff]   ;;  %v651_v4 = vld [vmem:[%s857_s3 + $0x48] sm:$0xff]   ;;  %v655_v8 = vld [vmem:[%s857_s3 + $0x50] sm:$0xff]   ;;  %vm537_vm2 = vcmask 519168  }
   0x2   :  { %v648_v1 = vld [vmem:[%s857_s3 + $0xc0] sm:$0xff]   ;;  %584 = vmatprep.subr.bf16.mxu0 %v647_v0  ;;  %v652_v5 = vld [vmem:[%s857_s3 + $0xc8] sm:$0xff]   ;;  %v656_v9 = vld [vmem:[%s857_s3 + $0xd0] sm:$0xff]   ;;  %v793_v27 = vshrl.u32 %v30_v22, 7 }
   0x3   :  { %v649_v2 = vld [vmem:[%s857_s3] sm:$0xff]   ;;  %606 = vmatprep.subr.bf16.mxu1 %v648_v1  ;;  %v653_v6 = vld [vmem:[%s857_s3 + $0x8] sm:$0xff]   ;;  %v657_v10 = vld [vmem:[%s857_s3 + $0x10] sm:$0xff]  }
   0x4   :  { %v650_v3 = vld [vmem:[%s857_s3 + $0x80] sm:$0xff]   ;;  %585 = vmatpush3.bf16.msra.mxu0 %v649_v2  ;;  %v654_v7 = vld [vmem:[%s857_s3 + $0x88] sm:$0xff]   ;;  %v658_v11 = vld [vmem:[%s857_s3 + $0x90] sm:$0xff]   ;;  %v36_v32 = vsub.s32 1, %v793_v27  ;;  %v44_v34 = vsub.s32 3, %v793_v27  ;;  %v32_v36 = vsub.s32 0, %v793_v27 }
   0x5   :  { %607 = vmatpush3.bf16.msra.mxu1 %v650_v3  ;;  %586 = vmatprep.subr.bf16.mxu0 %v651_v4  ;;  %v659_v12 = vld [vmem:[%s857_s3 + $0x58] sm:$0xff]   ;;  %v663_v16 = vld [vmem:[%s857_s3 + $0x60] sm:$0xff]   ;;  %v667_v20 = vld [vmem:[%s857_s3 + $0x68] sm:$0xff]   ;;  %v40_v39 = vsub.s32 2, %v793_v27  ;;  %v48_v57 = vsub.s32 4, %v793_v27  ;;  %vm532_vm3 = vcmp.eq.s32.totalorder %v793_v27, 1 }
   0x6   :  { %608 = vmatprep.subr.bf16.mxu1 %v652_v5  ;;  %v660_v13 = vld [vmem:[%s857_s3 + $0xd8] sm:$0xff]   ;;  %v664_v17 = vld [vmem:[%s857_s3 + $0xe0] sm:$0xff]   ;;  %v668_v21 = vld [vmem:[%s857_s3 + $0xe8] sm:$0xff]   ;;  %vm531_vm4 = vcmp.eq.s32.totalorder %v793_v27, 0 }
   0x7   :  { %v661_v14 = vld [vmem:[%s857_s3 + $0x18] sm:$0xff]   ;;  %v665_v18 = vld [vmem:[%s857_s3 + $0x20] sm:$0xff]   ;;  %v669_v23 = vld [vmem:[%s857_s3 + $0x28] sm:$0xff]  }
   0x8   :  { %587 = vmatpush3.bf16.msra.mxu0 %v653_v6  ;;  %v662_v15 = vld [vmem:[%s857_s3 + $0x98] sm:$0xff]   ;;  %v666_v19 = vld [vmem:[%s857_s3 + $0xa0] sm:$0xff]   ;;  %v670_v24 = vld [vmem:[%s857_s3 + $0xa8] sm:$0xff]  }
   0x9   :  { %609 = vmatpush3.bf16.msra.mxu1 %v654_v7  ;;  %588 = vmatprep.subr.bf16.mxu0 %v655_v8  ;;  %v671_v25 = vld [vmem:[%s857_s3 + $0x70] sm:$0xff]   ;;  %v675_v30 = vld [vmem:[%s857_s3 + $0x78] sm:$0xff]   ;;  %v20_v37 = vld [vmem:[%s858_s0] sm:$0xff] }
   0xa   :  { %610 = vmatprep.subr.bf16.mxu1 %v656_v9  ;;  %v672_v26 = vld [vmem:[%s857_s3 + $0xf0] sm:$0xff]   ;;  %v676_v31 = vld [vmem:[%s857_s3 + $0xf8] sm:$0xff]   ;;  %v28_v38 = vld [vmem:[%s859_s1] sm:$0x1f]  ;;  %v23_v40 = vunpack.c.l.bf16 %v20_v37  ;;  %v24_v41 = vunpack.c.h.bf16 %v20_v37 }
   0xb   :  { %v673_v28 = vld [vmem:[%s857_s3 + $0x30] sm:$0xff]   ;;  %v677_v33 = vld [vmem:[%s857_s3 + $0x38] sm:$0xff]   ;;  %v37_v42 = vrot.slane %v28_v38, %v36_v32  ;;  %v60_v43 = vld [vmem:[%s860_s2] sm:$0x1f]  ;;  %v45_v50 = vrot.slane %v28_v38, %v44_v34  ;;  %v33_v52 = vrot.slane %v28_v38, %v32_v36  ;;  %v41_v54 = vrot.slane %v28_v38, %v40_v39 }
   0xc   :  { %589 = vmatpush3.bf16.msra.mxu0 %v657_v10  ;;  %v674_v29 = vld [vmem:[%s857_s3 + $0xb0] sm:$0xff]   ;;  %v678_v35 = vld [vmem:[%s857_s3 + $0xb8] sm:$0xff]   ;;  %v21_v44 = vld [vmem:[%s858_s0 + $0x8] sm:$0xff]  ;;  %v69_v46 = vrot.slane %v60_v43, %v36_v32  ;;  %v77_v51 = vrot.slane %v60_v43, %v44_v34  ;;  %v65_v53 = vrot.slane %v60_v43, %v32_v36  ;;  %v73_v55 = vrot.slane %v60_v43, %v40_v39 }
   0xd   :  { %611 = vmatpush3.bf16.msra.mxu1 %v658_v11  ;;  %590 = vmatprep.subr.bf16.mxu0 %v659_v12  ;;  %v25_v47 = vunpack.c.l.bf16 %v21_v44  ;;  %v26_v48 = vunpack.c.h.bf16 %v21_v44  ;;  %v56_v49 = vmul.f32 %v37_v42, %v24_v41  ;;  %v22_v56 = vld [vmem:[%s858_s0 + $0x10] sm:$0xf]  ;;  %v55_v60 = vmul.f32 %v33_v52, %v23_v40  ;;  %v679_v8 = vld [vmem:[%s857_s3 + $0x100] sm:$0xff]  }
   0xe   :  { %612 = vmatprep.subr.bf16.mxu1 %v660_v13  ;;  %v27_v1 = vunpack.c.l.bf16 %v22_v56  ;;  %v49_v3 = vrot.slane %v28_v38, %v48_v57  ;;  %v81_v13 = vrot.slane %v60_v43, %v48_v57 }
   0xf   :  { %v88_v58 = vadd.f32 %v69_v46, %v56_v49  ;;  %v58_v59 = vmul.f32 %v45_v50, %v26_v48  ;;  %v57_v61 = vmul.f32 %v41_v54, %v25_v47  ;;  %v87_v0 = vadd.f32 %v65_v53, %v55_v60 }
  0x10   :  { %591 = vmatpush3.bf16.msra.mxu0 %v661_v14  ;;  %v59_v12 = vmul.f32 %v49_v3, %v27_v1  ;;  %v680_v14 = vld [vmem:[%s857_s3 + $0x108] sm:$0xff]  }
  0x11   :  { %613 = vmatpush3.bf16.msra.mxu1 %v662_v15  ;;  %592 = vmatprep.subr.bf16.mxu0 %v663_v16  ;;  %v93_v62 = vmax.f32 %v88_v58, 0.0  ;;  %v90_v63 = vadd.f32 %v77_v51, %v58_v59  ;;  %v89_v2 = vadd.f32 %v73_v55, %v57_v61  ;;  %v92_v6 = vmax.f32 %v87_v0, 0.0  ;;  %v681_v16 = vld [vmem:[%s857_s3 + $0x110] sm:$0xff]  }
  0x12   :  { %614 = vmatprep.subr.bf16.mxu1 %v664_v17  ;;  %v91_v15 = vadd.f32 %v81_v13, %v59_v12 }
  0x13   :  { %v98_v4 = vpack.c.bf16 %v93_v62, %v93_v62  ;;  %v95_v5 = vmax.f32 %v90_v63, 0.0  ;;  %v94_v7 = vmax.f32 %v89_v2, 0.0  ;;  %v97_v10 = vpack.c.bf16 %v92_v6, %v92_v6 }
  0x14   :  { %593 = vmatpush3.bf16.msra.mxu0 %v665_v18  ;;  %v96_v17 = vmax.f32 %v91_v15, 0.0  ;;  %v682_v18 = vld [vmem:[%s857_s3 + $0x118] sm:$0xff]  }
  0x15   :  { %615 = vmatpush3.bf16.msra.mxu1 %v666_v19  ;;  %594 = vmatprep.subr.bf16.mxu0 %v667_v20  ;;  %v100_v9 = vpack.c.bf16 %v95_v5, %v95_v5  ;;  %v99_v11 = vpack.c.bf16 %v94_v7, %v94_v7 }
  0x16   :  { %616 = vmatprep.subr.bf16.mxu1 %v668_v21  ;;  %426 = vmatprep.mubr.bf16.mxu0 %v98_v4  ;;  %v101_v19 = vpack.c.bf16 %v96_v17, %v96_v17 }
  0x17   :  { %466 = vmatprep.mubr.bf16.mxu1 %v100_v9 }
  0x18   :  { %595 = vmatpush3.bf16.msra.mxu0 %v669_v23 }
  0x19   :  { %617 = vmatpush3.bf16.msra.mxu1 %v670_v24  ;;  %596 = vmatprep.subr.bf16.mxu0 %v671_v25 }
  0x1a   :  { %618 = vmatprep.subr.bf16.mxu1 %v672_v26 }
  0x1c   :  { %597 = vmatpush3.bf16.msra.mxu0 %v673_v28 }
  0x1d   :  { %619 = vmatpush3.bf16.msra.mxu1 %v674_v29  ;;  %598 = vmatprep.subr.bf16.mxu0 %v675_v30 }
  0x1e   :  { %620 = vmatprep.subr.bf16.mxu1 %v676_v31 }
  0x20   :  { %599 = vmatpush3.bf16.msra.mxu0 %v677_v33 }
  0x21   :  { %621 = vmatpush3.bf16.msra.mxu1 %v678_v35  ;;  %633 = vmatprep.subr.bf16.mxu0 %v683_v45 }
  0x23   :  { %427 = vmatmul.mubr.bf16.vlgmr.msra.gmra.mrb[0].mxu0 %v97_v10 }
  0x24   :  { %467 = vmatmul.mubr.bf16.vlgmr.msra.gmra.mrb[0].mxu1 %v99_v11  ;;  %634 = vmatpush3.bf16.msra.mxu0 %v679_v8 }
  0x25   :  { %635 = vmatprep.subr.bf16.mxu0 %v683_v45  ;;  %641 = vmatprep.mubr.msk.bf16.mxu0 %vm684_vm0, %v683_v45 }
  0x28   :  { %636 = vmatpush3.bf16.msra.mxu0 %v680_v14 }
  0x29   :  { %637 = vmatprep.subr.bf16.mxu0 %v683_v45 }
  0x2c   :  { %638 = vmatpush3.bf16.msra.mxu0 %v681_v16 }
  0x2d   :  { %639 = vmatprep.subr.bf16.mxu0 %v683_v45 }
  0x30   :  { %640 = vmatpush3.bf16.msra.mxu0 %v682_v18 }
  0x33   :  { %642 = vmatmul.mubr.msk.bf16.vlgmr.msra.gmra.mrb[4].mxu0 %vm390_vm1, %v101_v19 }
  0xf6   :  { %v600_v20 = vpop.f32.mrb[0].mxu0 }
  0xf7   :  { %v622_v21 = vpop.f32.mrb[0].mxu1  ;;  %v601_v22 = vpop.f32.mrb[1].mxu0 }
  0xf8   :  { %v602_v23 = vadd.f32 %v601_v22, %v600_v20  ;;  %v623_v24 = vpop.f32.mrb[1].mxu1  ;;  %v603_v25 = vpop.f32.mrb[2].mxu0 }
  0xf9   :  { %v624_v26 = vadd.f32 %v623_v24, %v622_v21  ;;  %v604_v28 = vpop.f32.mrb[3].mxu0  ;;  %v625_v29 = vpop.f32.mrb[2].mxu1 }
  0xfa   :  { %v626_v30 = vpop.f32.mrb[3].mxu1 }
  0xfb   :  { %v469_v31 = vadd.f32 %v624_v26, %v602_v23 }
 0x106   :  { %v508_v32 = vpop.f32.mrb[4].mxu0 }
 0x107   :  { %v509_v33 = vadd.f32 %v508_v32, %v469_v31  ;;  %v643_v34 = vpop.f32.mrb[5].mxu0 }
 0x108   :  { %v511_v35 = vpop.f32.mrb[6].mxu0 }
 0x109   :  { %v514_v36 = vsel %vm390_vm1, %v509_v33, 0.0  ;;  %v521_v37 = vmul.f32 %v509_v33, %v509_v33  ;;  %v536_v38 = vpack.c.bf16 %v509_v33, %v509_v33  ;;  %v644_v39 = vpop.f32.mrb[7].mxu0 }
 0x10a   :  { %v515_v40 = vrot.slane %v514_v36, 4 }
 0x10b   :  { %v522_v41 = vsel %vm390_vm1, %v521_v37, 0.0  ;;  %538 = vst.msk [vmem:[%s861_s4] sm:$0xf] %vm537_vm2, %v536_v38 }
 0x10c   :  { %v516_v42 = vadd.f32 %v515_v40, %v514_v36  ;;  %v523_v43 = vrot.slane %v522_v41, 4 }
 0x10e   :  { %v517_v44 = vrot.slane %v516_v42, 2  ;;  %v524_v45 = vadd.f32 %v523_v43, %v522_v41 }
 0x110   :  { %v518_v46 = vadd.f32 %v517_v44, %v516_v42  ;;  %v525_v47 = vrot.slane %v524_v45, 2 }
 0x112   :  { %v526_v48 = vadd.f32 %v525_v47, %v524_v45  ;;  %v519_v49 = vrot.slane %v518_v46, 1 }
 0x114   :  { %v527_v50 = vrot.slane %v526_v48, 1  ;;  %v520_v52 = vadd.f32 %v519_v49, %v518_v46 }
 0x116   :  { %v528_v51 = vadd.f32 %v527_v50, %v526_v48 }
 0x118   :  { %v533_v53 = vsel %vm532_vm3, %v528_v51, 0.0 }
 0x119   :  { %v534_v54 = vsel %vm531_vm4, %v520_v52, %v533_v53 }
 0x11a   :  { %535 = vst.msk [vmem:[%s862_s5] sm:$0xff] %vm390_vm1, %v534_v54 }

// kernel: pallas_forward.35
= control target key start
LH: loop header
LB: loop body
LE: loop exit
PB: predicated region body
PF: predicated region fallthrough
CT: control target
= control target key end

     0   :  { %v134_v0 = vmov 0.0   ;;  %vm135_vm0 = vmmov 0   ;;  %vm55_vm1 = vcmask 523264   ;;  %vm99_vm2 = vcmask 64512   ;;  %s177_s1 = inlined_call_operand.vmem [shape: bf16[64,8], index: 1, kind: input, shape index: {}]   ;;  %s178_s0 = inlined_call_operand.vmem [shape: bf16[8,64], index: 0, kind: input, shape index: {}]   ;;  %s179_s2 = inlined_call_operand.vmem [shape: f32[1,8], index: 2, kind: input, shape index: {}]   ;;  %s180_s3 = inlined_call_operand.vmem [shape: f32[8,8], index: 3, kind: output, shape index: {}]  }
   0x1   :  { %116 = vmatprep.subr.bf16.mxu0 %v134_v0  ;;  %v130_v1 = vld [vmem:[%s177_s1] sm:$0xff]   ;;  %124 = vmatprep.mubr.msk.bf16.mxu0 %vm135_vm0, %v134_v0  ;;  %v131_v2 = vld [vmem:[%s177_s1 + $0x8] sm:$0xff]   ;;  %v132_v3 = vld [vmem:[%s177_s1 + $0x10] sm:$0xff]  }
   0x2   :  { %117 = vmatpush3.bf16.msra.mxu0 %v130_v1  ;;  %v133_v4 = vld [vmem:[%s177_s1 + $0x18] sm:$0xff]   ;;  %v15_v5 = vld [vmem:[%s178_s0] sm:$0xf] }
   0x3   :  { %118 = vmatprep.subr.bf16.mxu0 %v134_v0  ;;  %v105_v6 = vld [vmem:[%s179_s2] ss:$0 sm:$0xff] }
   0x6   :  { %119 = vmatpush3.bf16.msra.mxu0 %v131_v2 }
   0x7   :  { %120 = vmatprep.subr.bf16.mxu0 %v134_v0 }
   0xa   :  { %121 = vmatpush3.bf16.msra.mxu0 %v132_v3 }
   0xb   :  { %122 = vmatprep.subr.bf16.mxu0 %v134_v0 }
   0xe   :  { %123 = vmatpush3.bf16.msra.mxu0 %v133_v4 }
  0x11   :  { %125 = vmatmul.mubr.msk.bf16.vlgmr.msra.gmra.mrb[0].mxu0 %vm55_vm1, %v15_v5 }
  0xe4   :  { %v93_v7 = vpop.f32.mrb[0].mxu0 }
  0xe5   :  { %v94_v8 = vadd.f32 %v105_v6, %v93_v7  ;;  %v126_v9 = vpop.f32.mrb[1].mxu0 }
  0xe6   :  { %v96_v10 = vpop.f32.mrb[2].mxu0 }
  0xe7   :  { %100 = vst.msk [vmem:[%s180_s3] sm:$0xff] %vm99_vm2, %v94_v8  ;;  %v127_v11 = vpop.f32.mrb[3].mxu0 }

// kernel: pallas_forward.37
= control target key start
LH: loop header
LB: loop body
LE: loop exit
PB: predicated region body
PF: predicated region fallthrough
CT: control target
= control target key end

     0   :  { %vm28_vm0 = vcmask 1043456   ;;  %v91_v0 = vmov 0.0   ;;  %vm92_vm1 = vmmov 0   ;;  %vm24_vm2 = vcmask 64512   ;;  %s125_s1 = inlined_call_operand.vmem [shape: bf16[8,64], index: 1, kind: input, shape index: {}]   ;;  %s126_s0 = inlined_call_operand.vmem [shape: bf16[8,8], index: 0, kind: input, shape index: {}]   ;;  %s127_s2 = inlined_call_operand.vmem [shape: f32[1,64], index: 2, kind: input, shape index: {}]   ;;  %s128_s3 = inlined_call_operand.vmem [shape: bf16[8,64], index: 3, kind: output, shape index: {}]  }
   0x1   :  { %83 = vmatprep.subr.bf16.mxu0 %v91_v0  ;;  %v16_v1 = vld [vmem:[%s125_s1] sm:$0xf]  ;;  %85 = vmatprep.mubr.msk.bf16.mxu0 %vm92_vm1, %v91_v0  ;;  %vm73_vm3 = vcmask 519168  }
   0x2   :  { %v30_v2 = vsel %vm28_vm0, %v16_v1, 0  ;;  %v15_v3 = vld [vmem:[%s126_s0] sm:$0xf] }
   0x3   :  { %84 = vmatpush3.bf16.msra.mxu0 %v30_v2  ;;  %v79_v4 = vld [vmem:[%s127_s2] ss:$0 sm:$0xff] }
   0x6   :  { %86 = vmatmul.mubr.msk.bf16.vlgmr.msra.gmra.mrb[0].mxu0 %vm24_vm2, %v15_v3 }
  0xd9   :  { %v66_v5 = vpop.f32.mrb[0].mxu0 }
  0xda   :  { %v67_v6 = vadd.f32 %v79_v4, %v66_v5  ;;  %v87_v7 = vpop.f32.mrb[1].mxu0 }
  0xdb   :  { %v69_v8 = vpop.f32.mrb[2].mxu0 }
  0xdc   :  { %v72_v9 = vpack.c.bf16 %v67_v6, %v67_v6  ;;  %v88_v10 = vpop.f32.mrb[3].mxu0 }
  0xde   :  { %74 = vst.msk [vmem:[%s128_s3] sm:$0xf] %vm73_vm3, %v72_v9 }

// kernel: tile.70
= control target key start
LH: loop header
LB: loop body
LE: loop exit
PB: predicated region body
PF: predicated region fallthrough
CT: control target
= control target key end

     0   :  { %vm7_vm0 = vcmask 261120   ;;  %s37_s8 = smov 32   ;;  %s38_s9 = smov 64   ;;  %vm13_vm1 = vcmask 1048320   ;;  %vm19_vm2 = vcmask 785920   ;;  %vm25_vm3 = vcmask 523520   ;;  %s55_s0 = inlined_call_operand.vmem [shape: f32[4,32], index: 0, kind: input, shape index: {}]   ;;  %s56_s1 = inlined_call_operand.vmem [shape: f32[1,128], index: 1, kind: output, shape index: {}]  }
   0x1   :  { %v4_v0 = vld [vmem:[%s55_s0] sm:$0xf]  ;;  %s36_s0 = smov 96  }
   0x2   :  { %5 = vst [vmem:[#allocation1] sm:$0xf] %v4_v0 }
   0x9   :  { %v10_v1 = vld [vmem:[#allocation1 + $0x3] sm:$0x1]   ;;  %v22_v2 = vld [vmem:[#allocation1 + $0x1] sm:$0x1]   ;;  %v6_v3 = vld [vmem:[#allocation1] sm:$0x1]  }
   0xa   :  { %11 = vrot.lane.b32.xlu0 %v10_v1, %s36_s0  ;;  %23 = vrot.lane.b32.xlu1 %v22_v2, %s37_s8  ;;  %v16_v4 = vld [vmem:[#allocation1 + $0x2] sm:$0x1]   ;;  %8 = vst.msk [vmem:[#allocation0] sm:$0x1] %vm7_vm0, %v6_v3  }
   0xe   :  { %17 = vrot.lane.b32.xlu0 %v16_v4, %s38_s9 }
  0x7c   :  { %v12_v5 = vpop.permute.xlu0 %11   ;;  %v24_v6 = vpop.permute.xlu1 %23  }
  0x7d   :  { %14 = vst.msk [vmem:[#allocation0] sm:$0x1] %vm13_vm1, %v12_v5  }
  0x80   :  { %v18_v7 = vpop.permute.xlu0 %17  }
  0x81   :  { %20 = vst.msk [vmem:[#allocation0] sm:$0x1] %vm19_vm2, %v18_v7  }
  0x82   :  { %26 = vst.msk [vmem:[#allocation0] sm:$0x1] %vm25_vm3, %v24_v6  }
  0x89   :  { %v30_v8 = vld [vmem:[#allocation0] sm:$0x1] }
  0x8a   :  { %32 = vst [vmem:[%s56_s1] sm:$0x1] %v30_v8 }

// kernel: tile.65
= control target key start
LH: loop header
LB: loop body
LE: loop exit
PB: predicated region body
PF: predicated region fallthrough
CT: control target
= control target key end

     0   :  { %s22_s0 = inlined_call_operand.vmem [shape: f32[32], index: 0, kind: input, shape index: {}]   ;;  %s23_s1 = inlined_call_operand.vmem [shape: f32[4,32], index: 1, kind: output, shape index: {}]  }
   0x1   :  { %v4_v0 = vld [vmem:[%s22_s0] ss:$0 sm:$0xff] }
   0x2   :  { %5 = vst [vmem:[%s23_s1] sm:$0xf] %v4_v0 }

// kernel: pallas_forward.41
= control target key start
LH: loop header
LB: loop body
LE: loop exit
PB: predicated region body
PF: predicated region fallthrough
CT: control target
= control target key end

     0   :  { %v203_v29 = vlaneseq  ;;  %s355_s1 = inlined_call_operand.vmem [shape: bf16[256,128], index: 1, kind: input, shape index: {}]   ;;  %s356_s0 = inlined_call_operand.vmem [shape: bf16[8,256], index: 0, kind: input, shape index: {}]   ;;  %s357_s2 = inlined_call_operand.vmem [shape: bf16[8,128], index: 2, kind: output, shape index: {0}]   ;;  %s358_s3 = inlined_call_operand.vmem [shape: f32[8,128], index: 3, kind: output, shape index: {1}]  }
   0x1   :  { %v260_v0 = vld [vmem:[%s355_s1 + $0x40] sm:$0xff]   ;;  %v262_v2 = vld [vmem:[%s355_s1 + $0x48] sm:$0xff]   ;;  %v264_v4 = vld [vmem:[%s355_s1 + $0x50] sm:$0xff]  }
   0x2   :  { %v261_v1 = vld [vmem:[%s355_s1] sm:$0xff]   ;;  %238 = vmatprep.subr.bf16.mxu0 %v260_v0  ;;  %v263_v3 = vld [vmem:[%s355_s1 + $0x8] sm:$0xff]   ;;  %v265_v5 = vld [vmem:[%s355_s1 + $0x10] sm:$0xff]   ;;  %v204_v34 = vshrl.u32 %v203_v29, 7 }
   0x3   :  { %239 = vmatpush3.bf16.msra.mxu0 %v261_v1  ;;  %v266_v6 = vld [vmem:[%s355_s1 + $0x58] sm:$0xff]   ;;  %v268_v8 = vld [vmem:[%s355_s1 + $0x60] sm:$0xff]   ;;  %v270_v10 = vld [vmem:[%s355_s1 + $0x68] sm:$0xff]  }
   0x4   :  { %240 = vmatprep.subr.bf16.mxu0 %v262_v2  ;;  %v267_v7 = vld [vmem:[%s355_s1 + $0x18] sm:$0xff]   ;;  %v269_v9 = vld [vmem:[%s355_s1 + $0x20] sm:$0xff]   ;;  %v271_v13 = vld [vmem:[%s355_s1 + $0x28] sm:$0xff]   ;;  %vm206_vm0 = vcmp.eq.s32.totalorder %v204_v34, 1  ;;  %vm205_vm1 = vcmp.eq.s32.totalorder %v204_v34, 0 }
   0x5   :  { %v14_v11 = vld [vmem:[%s356_s0] sm:$0xff]  ;;  %v272_v14 = vld [vmem:[%s355_s1 + $0x70] sm:$0xff]   ;;  %v274_v16 = vld [vmem:[%s355_s1 + $0x78] sm:$0xff]  }
   0x6   :  { %v221_v12 = vcombine.high %v14_v11, %v14_v11  ;;  %v273_v15 = vld [vmem:[%s355_s1 + $0x30] sm:$0xff]   ;;  %v275_v17 = vld [vmem:[%s355_s1 + $0x38] sm:$0xff]   ;;  %v220_v18 = vcombine.low %v14_v11, %v14_v11 }
   0x7   :  { %241 = vmatpush3.bf16.msra.mxu0 %v263_v3 }
   0x8   :  { %242 = vmatprep.subr.bf16.mxu0 %v264_v4  ;;  %182 = vmatprep.mubr.bf16.mxu0 %v221_v12 }
   0xb   :  { %243 = vmatpush3.bf16.msra.mxu0 %v265_v5 }
   0xc   :  { %244 = vmatprep.subr.bf16.mxu0 %v266_v6 }
   0xf   :  { %245 = vmatpush3.bf16.msra.mxu0 %v267_v7 }
  0x10   :  { %246 = vmatprep.subr.bf16.mxu0 %v268_v8 }
  0x13   :  { %247 = vmatpush3.bf16.msra.mxu0 %v269_v9 }
  0x14   :  { %248 = vmatprep.subr.bf16.mxu0 %v270_v10 }
  0x17   :  { %249 = vmatpush3.bf16.msra.mxu0 %v271_v13 }
  0x18   :  { %250 = vmatprep.subr.bf16.mxu0 %v272_v14 }
  0x1b   :  { %251 = vmatpush3.bf16.msra.mxu0 %v273_v15 }
  0x1c   :  { %252 = vmatprep.subr.bf16.mxu0 %v274_v16 }
  0x1f   :  { %253 = vmatpush3.bf16.msra.mxu0 %v275_v17 }
  0x22   :  { %183 = vmatmul.mubr.bf16.vlgmr.msra.gmra.mrb[0].mxu0 %v220_v18 }
  0xf5   :  { %v254_v19 = vpop.f32.mrb[0].mxu0 }
  0xf6   :  { %v255_v20 = vpop.f32.mrb[1].mxu0 }
  0xf7   :  { %v256_v21 = vadd.f32 %v255_v20, %v254_v19  ;;  %v257_v22 = vpop.f32.mrb[2].mxu0 }
  0xf8   :  { %v258_v23 = vpop.f32.mrb[3].mxu0 }
  0xf9   :  { %v190_v24 = vrot.slane %v256_v21, 4  ;;  %v196_v25 = vmul.f32 %v256_v21, %v256_v21  ;;  %v210_v26 = vpack.c.bf16 %v256_v21, %v256_v21 }
  0xfb   :  { %v191_v27 = vadd.f32 %v256_v21, %v190_v24  ;;  %v197_v28 = vrot.slane %v196_v25, 4  ;;  %211 = vst [vmem:[%s357_s2] sm:$0xf] %v210_v26 }
  0xfd   :  { %v192_v30 = vrot.slane %v191_v27, 2  ;;  %v198_v31 = vadd.f32 %v197_v28, %v196_v25 }
  0xff   :  { %v193_v32 = vadd.f32 %v192_v30, %v191_v27  ;;  %v199_v33 = vrot.slane %v198_v31, 2 }
 0x101   :  { %v200_v35 = vadd.f32 %v199_v33, %v198_v31  ;;  %v194_v36 = vrot.slane %v193_v32, 1 }
 0x103   :  { %v201_v37 = vrot.slane %v200_v35, 1  ;;  %v195_v39 = vadd.f32 %v194_v36, %v193_v32 }
 0x105   :  { %v202_v38 = vadd.f32 %v201_v37, %v200_v35 }
 0x107   :  { %v207_v40 = vsel %vm206_vm0, %v202_v38, 0.0 }
 0x108   :  { %v208_v41 = vsel %vm205_vm1, %v195_v39, %v207_v40 }
 0x109   :  { %209 = vst [vmem:[%s358_s3] sm:$0xff] %v208_v41 }

// kernel: pallas_forward.42
= control target key start
LH: loop header
LB: loop body
LE: loop exit
PB: predicated region body
PF: predicated region fallthrough
CT: control target
= control target key end

     0   :  { %s73_s0 = inlined_call_operand.vmem [shape: bf16[8,128], index: 0, kind: input, shape index: {}]   ;;  %s74_s1 = inlined_call_operand.vmem [shape: f32[1,128], index: 1, kind: input, shape index: {}]   ;;  %s75_s2 = inlined_call_operand.vmem [shape: f32[1,128], index: 2, kind: input, shape index: {}]   ;;  %s76_s3 = inlined_call_operand.vmem [shape: bf16[8,128], index: 3, kind: output, shape index: {}]  }
   0x1   :  { %v14_v0 = vld [vmem:[%s73_s0] sm:$0xf] }
   0x2   :  { %v39_v1 = vld [vmem:[%s74_s1] ss:$0 sm:$0xff]  ;;  %v15_v2 = vunpack.c.l.bf16 %v14_v0 }
   0x3   :  { %v40_v3 = vld [vmem:[%s75_s2] ss:$0 sm:$0xff] }
   0x4   :  { %v23_v4 = vmul.f32 %v39_v1, %v15_v2 }
   0x6   :  { %v31_v5 = vadd.f32 %v40_v3, %v23_v4 }
   0x8   :  { %v32_v6 = vmax.f32 %v31_v5, 0.0 }
   0xa   :  { %v33_v7 = vpack.c.bf16 %v32_v6, %v32_v6 }
   0xc   :  { %34 = vst [vmem:[%s76_s3] sm:$0xf] %v33_v7 }

// kernel: tile.75
= control target key start
LH: loop header
LB: loop body
LE: loop exit
PB: predicated region body
PF: predicated region fallthrough
CT: control target
= control target key end

     0   :  { %s22_s0 = inlined_call_operand.vmem [shape: f32[16], index: 0, kind: input, shape index: {}]   ;;  %s23_s1 = inlined_call_operand.vmem [shape: f32[4,16], index: 1, kind: output, shape index: {}]  }
   0x1   :  { %v4_v0 = vld [vmem:[%s22_s0] ss:$0 sm:$0xff] }
   0x2   :  { %5 = vst [vmem:[%s23_s1] sm:$0xf] %v4_v0 }

// kernel: tile.80
= control target key start
LH: loop header
LB: loop body
LE: loop exit
PB: predicated region body
PF: predicated region fallthrough
CT: control target
= control target key end

     0   :  { %vm7_vm0 = vcmask 130048   ;;  %s37_s8 = smov 16   ;;  %s38_s9 = smov 32   ;;  %vm13_vm1 = vcmask 523648   ;;  %vm19_vm2 = vcmask 392448   ;;  %vm25_vm3 = vcmask 261248   ;;  %s55_s0 = inlined_call_operand.vmem [shape: f32[4,16], index: 0, kind: input, shape index: {}]   ;;  %s56_s1 = inlined_call_operand.vmem [shape: f32[1,64], index: 1, kind: output, shape index: {}]  }
   0x1   :  { %v4_v0 = vld [vmem:[%s55_s0] sm:$0xf]  ;;  %s36_s0 = smov 48  }
   0x2   :  { %5 = vst [vmem:[#allocation1] sm:$0xf] %v4_v0 }
   0x9   :  { %v10_v1 = vld [vmem:[#allocation1 + $0x3] sm:$0x1]   ;;  %v22_v2 = vld [vmem:[#allocation1 + $0x1] sm:$0x1]   ;;  %v6_v3 = vld [vmem:[#allocation1] sm:$0x1]  }
   0xa   :  { %11 = vrot.lane.b32.xlu0 %v10_v1, %s36_s0  ;;  %23 = vrot.lane.b32.xlu1 %v22_v2, %s37_s8  ;;  %v16_v4 = vld [vmem:[#allocation1 + $0x2] sm:$0x1]   ;;  %8 = vst.msk [vmem:[#allocation0] sm:$0x1] %vm7_vm0, %v6_v3  }
   0xe   :  { %17 = vrot.lane.b32.xlu0 %v16_v4, %s38_s9 }
  0x7c   :  { %v12_v5 = vpop.permute.xlu0 %11   ;;  %v24_v6 = vpop.permute.xlu1 %23  }
  0x7d   :  { %14 = vst.msk [vmem:[#allocation0] sm:$0x1] %vm13_vm1, %v12_v5  }
  0x80   :  { %v18_v7 = vpop.permute.xlu0 %17  }
  0x81   :  { %20 = vst.msk [vmem:[#allocation0] sm:$0x1] %vm19_vm2, %v18_v7  }
  0x82   :  { %26 = vst.msk [vmem:[#allocation0] sm:$0x1] %vm25_vm3, %v24_v6  }
  0x89   :  { %v30_v8 = vld [vmem:[#allocation0] sm:$0x1] }
  0x8a   :  { %32 = vst [vmem:[%s56_s1] sm:$0x1] %v30_v8 }

// kernel: pallas_forward.43
= control target key start
LH: loop header
LB: loop body
LE: loop exit
PB: predicated region body
PF: predicated region fallthrough
CT: control target
= control target key end

     0   :  { %vm197_vm0 = vcmask 519168   ;;  %vm143_vm1 = vcmask 523264   ;;  %v174_v39 = vlaneseq  ;;  %s346_s1 = inlined_call_operand.vmem [shape: bf16[128,64], index: 1, kind: input, shape index: {}]   ;;  %s347_s0 = inlined_call_operand.vmem [shape: bf16[32,128], index: 0, kind: input, shape index: {}]   ;;  %s348_s2 = inlined_call_operand.vmem [shape: bf16[32,64], index: 2, kind: output, shape index: {0}]   ;;  %s349_s3 = inlined_call_operand.vmem [shape: f32[8,64], index: 3, kind: output, shape index: {1}]  }
   0x1   :  { %v258_v0 = vld [vmem:[%s346_s1] sm:$0xff]   ;;  %v259_v1 = vld [vmem:[%s346_s1 + $0x8] sm:$0xff]   ;;  %v260_v2 = vld [vmem:[%s346_s1 + $0x10] sm:$0xff]  }
   0x2   :  { %238 = vmatprep.subr.bf16.mxu0 %v258_v0  ;;  %v261_v3 = vld [vmem:[%s346_s1 + $0x18] sm:$0xff]   ;;  %v266_v4 = vld [vmem:[%s347_s0] sm:$0xff]   ;;  %v263_v6 = vld [vmem:[%s346_s1 + $0x28] sm:$0xff]   ;;  %v175_v44 = vshrl.u32 %v174_v39, 7 }
   0x3   :  { %239 = vmatpush3.bf16.msra.mxu0 %v258_v0  ;;  %254 = vmatprep.mubr.bf16.mxu0 %v266_v4  ;;  %v262_v5 = vld [vmem:[%s346_s1 + $0x20] sm:$0xff]   ;;  %v264_v7 = vld [vmem:[%s346_s1 + $0x30] sm:$0xff]   ;;  %v265_v8 = vld [vmem:[%s346_s1 + $0x38] sm:$0xff]  }
   0x4   :  { %240 = vmatprep.subr.bf16.mxu0 %v259_v1  ;;  %v267_v9 = vld [vmem:[%s347_s0 + $0x8] sm:$0xff]   ;;  %vm177_vm2 = vcmp.eq.s32.totalorder %v175_v44, 1  ;;  %vm176_vm3 = vcmp.eq.s32.totalorder %v175_v44, 0 }
   0x7   :  { %241 = vmatpush3.bf16.msra.mxu0 %v259_v1 }
   0x8   :  { %242 = vmatprep.subr.bf16.mxu0 %v260_v2 }
   0xb   :  { %243 = vmatpush3.bf16.msra.mxu0 %v260_v2 }
   0xc   :  { %244 = vmatprep.subr.bf16.mxu0 %v261_v3 }
   0xf   :  { %245 = vmatpush3.bf16.msra.mxu0 %v261_v3 }
  0x10   :  { %246 = vmatprep.subr.bf16.mxu0 %v262_v5 }
  0x13   :  { %247 = vmatpush3.bf16.msra.mxu0 %v262_v5 }
  0x14   :  { %248 = vmatprep.subr.bf16.mxu0 %v263_v6 }
  0x17   :  { %249 = vmatpush3.bf16.msra.mxu0 %v263_v6 }
  0x18   :  { %250 = vmatprep.subr.bf16.mxu0 %v264_v7 }
  0x1b   :  { %251 = vmatpush3.bf16.msra.mxu0 %v264_v7 }
  0x1c   :  { %252 = vmatprep.subr.bf16.mxu0 %v265_v8 }
  0x1f   :  { %253 = vmatpush3.bf16.msra.mxu0 %v265_v8 }
  0x22   :  { %255 = vmatmul.mubr.bf16.vlgmr.msra.gmra.mrb[0].mxu0 %v267_v9 }
  0xf5   :  { %v256_v10 = vpop.f32.mrb[0].mxu0 }
  0xf6   :  { %v226_v11 = vpack.c.bf16 %v256_v10, %v256_v10  ;;  %v128_v12 = vpop.f32.mrb[1].mxu0  ;;  %v159_v16 = vmul.f32 %v256_v10, %v256_v10  ;;  %v147_v24 = vsel %vm143_vm1, %v256_v10, 0.0 }
  0xf7   :  { %v157_v13 = vmul.f32 %v128_v12, %v128_v12  ;;  %v224_v14 = vpack.c.bf16 %v128_v12, %v128_v12  ;;  %v257_v15 = vpop.f32.mrb[2].mxu0  ;;  %v144_v19 = vsel %vm143_vm1, %v128_v12, 0.0 }
  0xf8   :  { %200 = vst.msk [vmem:[%s348_s2 + $0x8] sm:$0xf] %vm197_vm0, %v226_v11  ;;  %v227_v17 = vpack.c.bf16 %v257_v15, %v257_v15  ;;  %v131_v18 = vpop.f32.mrb[3].mxu0  ;;  %v160_v26 = vmul.f32 %v257_v15, %v257_v15  ;;  %v164_v30 = vsel %vm143_vm1, %v159_v16, 0.0  ;;  %v149_v31 = vsel %vm143_vm1, %v257_v15, 0.0 }
  0xf9   :  { %198 = vst.msk [vmem:[%s348_s2] sm:$0xf] %vm197_vm0, %v224_v14  ;;  %v145_v20 = vsel %vm143_vm1, %v131_v18, 0.0  ;;  %v158_v21 = vmul.f32 %v131_v18, %v131_v18  ;;  %v225_v22 = vpack.c.bf16 %v131_v18, %v131_v18  ;;  %v161_v25 = vsel %vm143_vm1, %v157_v13, 0.0 }
  0xfa   :  { %201 = vst.msk [vmem:[%s348_s2 + $0xc] sm:$0xf] %vm197_vm0, %v227_v17  ;;  %v146_v23 = vadd.f32 %v145_v20, %v144_v19  ;;  %v166_v34 = vsel %vm143_vm1, %v160_v26, 0.0 }
  0xfb   :  { %v162_v27 = vsel %vm143_vm1, %v158_v21, 0.0  ;;  %199 = vst.msk [vmem:[%s348_s2 + $0x4] sm:$0xf] %vm197_vm0, %v225_v22 }
  0xfc   :  { %v148_v28 = vadd.f32 %v147_v24, %v146_v23  ;;  %v163_v29 = vadd.f32 %v162_v27, %v161_v25 }
  0xfe   :  { %v150_v32 = vadd.f32 %v149_v31, %v148_v28  ;;  %v165_v33 = vadd.f32 %v164_v30, %v163_v29 }
 0x100   :  { %v151_v35 = vrot.slane %v150_v32, 4  ;;  %v167_v36 = vadd.f32 %v166_v34, %v165_v33 }
 0x102   :  { %v152_v37 = vadd.f32 %v151_v35, %v150_v32  ;;  %v168_v38 = vrot.slane %v167_v36, 4 }
 0x104   :  { %v153_v40 = vrot.slane %v152_v37, 2  ;;  %v169_v41 = vadd.f32 %v168_v38, %v167_v36 }
 0x106   :  { %v154_v42 = vadd.f32 %v153_v40, %v152_v37  ;;  %v170_v43 = vrot.slane %v169_v41, 2 }
 0x108   :  { %v171_v45 = vadd.f32 %v170_v43, %v169_v41  ;;  %v155_v46 = vrot.slane %v154_v42, 1 }
 0x10a   :  { %v172_v47 = vrot.slane %v171_v45, 1  ;;  %v156_v49 = vadd.f32 %v155_v46, %v154_v42 }
 0x10c   :  { %v173_v48 = vadd.f32 %v172_v47, %v171_v45 }
 0x10e   :  { %v178_v50 = vsel %vm177_vm2, %v173_v48, 0.0 }
 0x10f   :  { %v179_v51 = vsel %vm176_vm3, %v156_v49, %v178_v50 }
 0x110   :  { %180 = vst.msk [vmem:[%s349_s3] sm:$0xff] %vm143_vm1, %v179_v51 }

// kernel: pallas_forward.44
= control target key start
LH: loop header
LB: loop body
LE: loop exit
PB: predicated region body
PF: predicated region fallthrough
CT: control target
= control target key end

     0   :  { %vm64_vm0 = vcmask 519168   ;;  %s136_s0 = inlined_call_operand.vmem [shape: bf16[32,64], index: 0, kind: input, shape index: {}]   ;;  %s137_s1 = inlined_call_operand.vmem [shape: f32[1,64], index: 1, kind: input, shape index: {}]   ;;  %s138_s2 = inlined_call_operand.vmem [shape: f32[1,64], index: 2, kind: input, shape index: {}]   ;;  %s139_s3 = inlined_call_operand.vmem [shape: bf16[32,64], index: 3, kind: output, shape index: {}]  }
   0x1   :  { %v84_v0 = vld [vmem:[%s136_s0] sm:$0xff]   ;;  %v91_v4 = vld [vmem:[%s136_s0 + $0x8] sm:$0xff]  }
   0x2   :  { %v73_v1 = vld [vmem:[%s137_s1] ss:$0 sm:$0xff]  ;;  %v85_v2 = vunpack.c.l.bf16 %v84_v0  ;;  %v86_v3 = vunpack.c.h.bf16 %v84_v0  ;;  %v89_v6 = vunpack.c.l.bf16 %v91_v4  ;;  %v90_v7 = vunpack.c.h.bf16 %v91_v4 }
   0x3   :  { %v74_v5 = vld [vmem:[%s138_s2] ss:$0 sm:$0xff] }
   0x4   :  { %v29_v8 = vmul.f32 %v85_v2, %v73_v1  ;;  %v30_v9 = vmul.f32 %v86_v3, %v73_v1  ;;  %v31_v10 = vmul.f32 %v89_v6, %v73_v1  ;;  %v32_v11 = vmul.f32 %v90_v7, %v73_v1 }
   0x6   :  { %v40_v12 = vadd.f32 %v74_v5, %v29_v8  ;;  %v41_v13 = vadd.f32 %v74_v5, %v30_v9  ;;  %v42_v14 = vadd.f32 %v74_v5, %v31_v10  ;;  %v43_v15 = vadd.f32 %v74_v5, %v32_v11 }
   0x8   :  { %v44_v16 = vmax.f32 %v40_v12, 0.0  ;;  %v45_v17 = vmax.f32 %v41_v13, 0.0  ;;  %v46_v18 = vmax.f32 %v42_v14, 0.0  ;;  %v47_v19 = vmax.f32 %v43_v15, 0.0 }
   0xa   :  { %v79_v20 = vpack.c.bf16 %v44_v16, %v44_v16  ;;  %v80_v21 = vpack.c.bf16 %v45_v17, %v45_v17  ;;  %v81_v22 = vpack.c.bf16 %v46_v18, %v46_v18  ;;  %v82_v23 = vpack.c.bf16 %v47_v19, %v47_v19 }
   0xc   :  { %65 = vst.msk [vmem:[%s139_s3] sm:$0xf] %vm64_vm0, %v79_v20  ;;  %66 = vst.msk [vmem:[%s139_s3 + $0x4] sm:$0xf] %vm64_vm0, %v80_v21 }
   0xd   :  { %67 = vst.msk [vmem:[%s139_s3 + $0x8] sm:$0xf] %vm64_vm0, %v81_v22  ;;  %68 = vst.msk [vmem:[%s139_s3 + $0xc] sm:$0xf] %vm64_vm0, %v82_v23 }

// kernel: tile.85
= control target key start
LH: loop header
LB: loop body
LE: loop exit
PB: predicated region body
PF: predicated region fallthrough
CT: control target
= control target key end

     0   :  { %s22_s0 = inlined_call_operand.vmem [shape: f32[8], index: 0, kind: input, shape index: {}]   ;;  %s23_s1 = inlined_call_operand.vmem [shape: f32[4,8], index: 1, kind: output, shape index: {}]  }
   0x1   :  { %v4_v0 = vld [vmem:[%s22_s0] ss:$0 sm:$0xff] }
   0x2   :  { %5 = vst [vmem:[%s23_s1] sm:$0xf] %v4_v0 }

// kernel: tile.90
= control target key start
LH: loop header
LB: loop body
LE: loop exit
PB: predicated region body
PF: predicated region fallthrough
CT: control target
= control target key end

     0   :  { %vm7_vm0 = vcmask 64512   ;;  %s37_s8 = smov 8   ;;  %s38_s9 = smov 16   ;;  %vm13_vm1 = vcmask 261312   ;;  %vm19_vm2 = vcmask 195712   ;;  %vm25_vm3 = vcmask 130112   ;;  %s55_s0 = inlined_call_operand.vmem [shape: f32[4,8], index: 0, kind: input, shape index: {}]   ;;  %s56_s1 = inlined_call_operand.vmem [shape: f32[1,32], index: 1, kind: output, shape index: {}]  }
   0x1   :  { %v4_v0 = vld [vmem:[%s55_s0] sm:$0xf]  ;;  %s36_s0 = smov 24  }
   0x2   :  { %5 = vst [vmem:[#allocation1] sm:$0xf] %v4_v0 }
   0x9   :  { %v10_v1 = vld [vmem:[#allocation1 + $0x3] sm:$0x1]   ;;  %v22_v2 = vld [vmem:[#allocation1 + $0x1] sm:$0x1]   ;;  %v6_v3 = vld [vmem:[#allocation1] sm:$0x1]  }
   0xa   :  { %11 = vrot.lane.b32.xlu0 %v10_v1, %s36_s0  ;;  %23 = vrot.lane.b32.xlu1 %v22_v2, %s37_s8  ;;  %v16_v4 = vld [vmem:[#allocation1 + $0x2] sm:$0x1]   ;;  %8 = vst.msk [vmem:[#allocation0] sm:$0x1] %vm7_vm0, %v6_v3  }
   0xe   :  { %17 = vrot.lane.b32.xlu0 %v16_v4, %s38_s9 }
  0x7c   :  { %v12_v5 = vpop.permute.xlu0 %11   ;;  %v24_v6 = vpop.permute.xlu1 %23  }
  0x7d   :  { %14 = vst.msk [vmem:[#allocation0] sm:$0x1] %vm13_vm1, %v12_v5  }
  0x80   :  { %v18_v7 = vpop.permute.xlu0 %17  }
  0x81   :  { %20 = vst.msk [vmem:[#allocation0] sm:$0x1] %vm19_vm2, %v18_v7  }
  0x82   :  { %26 = vst.msk [vmem:[#allocation0] sm:$0x1] %vm25_vm3, %v24_v6  }
  0x89   :  { %v30_v8 = vld [vmem:[#allocation0] sm:$0x1] }
  0x8a   :  { %32 = vst [vmem:[%s56_s1] sm:$0x1] %v30_v8 }

// kernel: pallas_forward.45
= control target key start
LH: loop header
LB: loop body
LE: loop exit
PB: predicated region body
PF: predicated region fallthrough
CT: control target
= control target key end

     0   :  { %vm102_vm0 = vcmask 523264   ;;  %vm386_vm1 = vcmask 257024   ;;  %vm224_vm2 = vcmask 261120   ;;  %s725_s1 = inlined_call_operand.vmem [shape: bf16[64,32], index: 1, kind: input, shape index: {}]   ;;  %s726_s0 = inlined_call_operand.vmem [shape: bf16[128,64], index: 0, kind: input, shape index: {}]   ;;  %s727_s2 = inlined_call_operand.vmem [shape: bf16[128,32], index: 2, kind: output, shape index: {0}]   ;;  %s728_s3 = inlined_call_operand.vmem [shape: f32[8,32], index: 3, kind: output, shape index: {1}]  }
   0x1   :  { %v507_v0 = vld [vmem:[%s725_s1] sm:$0xff]   ;;  %v508_v1 = vld [vmem:[%s725_s1 + $0x8] sm:$0xff]   ;;  %v509_v2 = vld [vmem:[%s725_s1 + $0x10] sm:$0xff]  }
   0x2   :  { %475 = vmatprep.subr.bf16.mxu0 %v507_v0  ;;  %499 = vmatprep.subr.bf16.mxu1 %v507_v0  ;;  %v511_v3 = vld [vmem:[%s726_s0] sm:$0xff]   ;;  %v510_v4 = vld [vmem:[%s725_s1 + $0x18] sm:$0xff]   ;;  %v512_v6 = vld [vmem:[%s726_s0 + $0x8] sm:$0xff]  }
   0x3   :  { %476 = vmatpush3.bf16.msra.mxu0 %v507_v0  ;;  %503 = vmatpush3.bf16.msra.mxu1 %v507_v0  ;;  %v515_v5 = vld [vmem:[%s726_s0 + $0x20] sm:$0xff]   ;;  %v516_v7 = vld [vmem:[%s726_s0 + $0x28] sm:$0xff]   ;;  %v513_v8 = vld [vmem:[%s726_s0 + $0x10] sm:$0xff]  }
   0x4   :  { %477 = vmatprep.subr.bf16.mxu0 %v508_v1  ;;  %500 = vmatprep.subr.bf16.mxu1 %v508_v1  ;;  %v517_v9 = vld [vmem:[%s726_s0 + $0x30] sm:$0xff]   ;;  %v514_v10 = vld [vmem:[%s726_s0 + $0x18] sm:$0xff]  }
   0x5   :  { %483 = vmatprep.mubr.msk.bf16.mxu0 %vm102_vm0, %v511_v3  ;;  %491 = vmatprep.mubr.msk.bf16.mxu1 %vm102_vm0, %v515_v5  ;;  %v518_v11 = vld [vmem:[%s726_s0 + $0x38] sm:$0xff]  }
   0x7   :  { %478 = vmatpush3.bf16.msra.mxu0 %v508_v1  ;;  %504 = vmatpush3.bf16.msra.mxu1 %v508_v1 }
   0x8   :  { %479 = vmatprep.subr.bf16.mxu0 %v509_v2  ;;  %501 = vmatprep.subr.bf16.mxu1 %v509_v2 }
   0xb   :  { %480 = vmatpush3.bf16.msra.mxu0 %v509_v2  ;;  %505 = vmatpush3.bf16.msra.mxu1 %v509_v2 }
   0xc   :  { %481 = vmatprep.subr.bf16.mxu0 %v510_v4  ;;  %502 = vmatprep.subr.bf16.mxu1 %v510_v4 }
   0xf   :  { %482 = vmatpush3.bf16.msra.mxu0 %v510_v4  ;;  %506 = vmatpush3.bf16.msra.mxu1 %v510_v4 }
  0x12   :  { %484 = vmatmul.mubr.msk.bf16.vlgmr.msra.gmra.mrb[0].mxu0 %vm102_vm0, %v512_v6  ;;  %492 = vmatmul.mubr.msk.bf16.vlgmr.msra.gmra.mrb[0].mxu1 %vm102_vm0, %v516_v7 }
  0x13   :  { %487 = vmatprep.mubr.msk.bf16.mxu0 %vm102_vm0, %v513_v8  ;;  %495 = vmatprep.mubr.msk.bf16.mxu1 %vm102_vm0, %v517_v9 }
  0x1a   :  { %488 = vmatmul.mubr.msk.bf16.gmra.mrb[4].mxu0 %vm102_vm0, %v514_v10  ;;  %496 = vmatmul.mubr.msk.bf16.gmra.mrb[4].mxu1 %vm102_vm0, %v518_v11 }
  0xe5   :  { %v485_v12 = vpop.f32.mrb[0].mxu0  ;;  %v583_v13 = vpop.f32.mrb[0].mxu1 }
  0xe6   :  { %v449_v14 = vpack.c.bf16 %v485_v12, %v485_v12  ;;  %v161_v15 = vpop.f32.mrb[1].mxu0  ;;  %v585_v16 = vpop.f32.mrb[1].mxu1  ;;  %v264_v21 = vmul.f32 %v485_v12, %v485_v12  ;;  %v457_v31 = vpack.c.bf16 %v583_v13, %v583_v13  ;;  %v228_v32 = vsel %vm224_vm2, %v485_v12, 0.0 }
  0xe7   :  { %v262_v17 = vmul.f32 %v161_v15, %v161_v15  ;;  %v447_v18 = vpack.c.bf16 %v161_v15, %v161_v15  ;;  %v486_v19 = vpop.f32.mrb[2].mxu0  ;;  %v587_v20 = vpop.f32.mrb[2].mxu1  ;;  %v225_v25 = vsel %vm224_vm2, %v161_v15, 0.0  ;;  %v455_v35 = vpack.c.bf16 %v585_v16, %v585_v16 }
  0xe8   :  { %389 = vst.msk [vmem:[%s727_s2 + $0x8] sm:$0xf] %vm386_vm1, %v449_v14  ;;  %v450_v22 = vpack.c.bf16 %v486_v19, %v486_v19  ;;  %v164_v23 = vpop.f32.mrb[3].mxu0  ;;  %v593_v24 = vpop.f32.mrb[3].mxu1  ;;  %v265_v29 = vmul.f32 %v486_v19, %v486_v19  ;;  %397 = vst.msk [vmem:[%s727_s2 + $0x28] sm:$0xf] %vm386_vm1, %v457_v31  ;;  %v458_v40 = vpack.c.bf16 %v587_v20, %v587_v20 }
  0xe9   :  { %387 = vst.msk [vmem:[%s727_s2] sm:$0xf] %vm386_vm1, %v447_v18  ;;  %v226_v26 = vsel %vm224_vm2, %v164_v23, 0.0  ;;  %v263_v27 = vmul.f32 %v164_v23, %v164_v23  ;;  %v448_v28 = vpack.c.bf16 %v164_v23, %v164_v23  ;;  %v278_v33 = vsel %vm224_vm2, %v262_v17, 0.0  ;;  %395 = vst.msk [vmem:[%s727_s2 + $0x20] sm:$0xf] %vm386_vm1, %v455_v35 }
  0xea   :  { %390 = vst.msk [vmem:[%s727_s2 + $0xc] sm:$0xf] %vm386_vm1, %v450_v22  ;;  %v227_v30 = vadd.f32 %v226_v26, %v225_v25  ;;  %v281_v38 = vsel %vm224_vm2, %v264_v21, 0.0  ;;  %v230_v42 = vsel %vm224_vm2, %v486_v19, 0.0  ;;  %v283_v43 = vsel %vm224_vm2, %v265_v29, 0.0 }
  0xeb   :  { %v279_v34 = vsel %vm224_vm2, %v263_v27, 0.0  ;;  %388 = vst.msk [vmem:[%s727_s2 + $0x4] sm:$0xf] %vm386_vm1, %v448_v28  ;;  %398 = vst.msk [vmem:[%s727_s2 + $0x2c] sm:$0xf] %vm386_vm1, %v458_v40  ;;  %v270_v2 = vmul.f32 %v585_v16, %v585_v16  ;;  %v456_v3 = vpack.c.bf16 %v593_v24, %v593_v24  ;;  %v240_v12 = vsel %vm224_vm2, %v585_v16, 0.0 }
  0xec   :  { %v229_v36 = vadd.f32 %v228_v32, %v227_v30  ;;  %v280_v37 = vadd.f32 %v279_v34, %v278_v33  ;;  %v271_v22 = vmul.f32 %v593_v24, %v593_v24  ;;  %v272_v26 = vmul.f32 %v583_v13, %v583_v13 }
  0xed   :  { %v489_v39 = vpop.f32.mrb[4].mxu0  ;;  %v627_v41 = vpop.f32.mrb[4].mxu1  ;;  %396 = vst.msk [vmem:[%s727_s2 + $0x24] sm:$0xf] %vm386_vm1, %v456_v3  ;;  %v293_v21 = vsel %vm224_vm2, %v270_v2, 0.0  ;;  %v242_v27 = vsel %vm224_vm2, %v593_v24, 0.0  ;;  %v273_v31 = vmul.f32 %v587_v20, %v587_v20 }
  0xee   :  { %v282_v44 = vadd.f32 %v281_v38, %v280_v37  ;;  %v453_v45 = vpack.c.bf16 %v489_v39, %v489_v39  ;;  %v177_v46 = vpop.f32.mrb[5].mxu0  ;;  %v209_v47 = vpop.f32.mrb[5].mxu1  ;;  %v231_v48 = vadd.f32 %v230_v42, %v229_v36  ;;  %v268_v61 = vmul.f32 %v489_v39, %v489_v39 }
  0xef   :  { %v232_v49 = vsel %vm224_vm2, %v177_v46, 0.0  ;;  %v266_v50 = vmul.f32 %v177_v46, %v177_v46  ;;  %v451_v51 = vpack.c.bf16 %v177_v46, %v177_v46  ;;  %v490_v52 = vpop.f32.mrb[6].mxu0  ;;  %v636_v53 = vpop.f32.mrb[6].mxu1  ;;  %v236_v4 = vsel %vm224_vm2, %v489_v39, 0.0 }
  0xf0   :  { %393 = vst.msk [vmem:[%s727_s2 + $0x18] sm:$0xf] %vm386_vm1, %v453_v45  ;;  %v284_v54 = vadd.f32 %v283_v43, %v282_v44  ;;  %v180_v55 = vpop.f32.mrb[7].mxu0  ;;  %v212_v56 = vpop.f32.mrb[7].mxu1  ;;  %v233_v57 = vadd.f32 %v232_v49, %v231_v48  ;;  %v454_v59 = vpack.c.bf16 %v490_v52, %v490_v52  ;;  %v269_v5 = vmul.f32 %v490_v52, %v490_v52 }
  0xf1   :  { %v285_v58 = vsel %vm224_vm2, %v266_v50, 0.0  ;;  %391 = vst.msk [vmem:[%s727_s2 + $0x10] sm:$0xf] %vm386_vm1, %v451_v51  ;;  %v234_v60 = vsel %vm224_vm2, %v180_v55, 0.0  ;;  %v267_v63 = vmul.f32 %v180_v55, %v180_v55  ;;  %v452_v0 = vpack.c.bf16 %v180_v55, %v180_v55 }
  0xf2   :  { %v286_v62 = vadd.f32 %v285_v58, %v284_v54  ;;  %394 = vst.msk [vmem:[%s727_s2 + $0x1c] sm:$0xf] %vm386_vm1, %v454_v59  ;;  %v235_v1 = vadd.f32 %v234_v60, %v233_v57  ;;  %v461_v7 = vpack.c.bf16 %v627_v41, %v627_v41  ;;  %v289_v10 = vsel %vm224_vm2, %v268_v61, 0.0 }
  0xf3   :  { %v287_v6 = vsel %vm224_vm2, %v267_v63, 0.0  ;;  %392 = vst.msk [vmem:[%s727_s2 + $0x14] sm:$0xf] %vm386_vm1, %v452_v0  ;;  %v238_v11 = vsel %vm224_vm2, %v490_v52, 0.0  ;;  %v459_v14 = vpack.c.bf16 %v209_v47, %v209_v47  ;;  %v462_v18 = vpack.c.bf16 %v636_v53, %v636_v53 }
  0xf4   :  { %v237_v8 = vadd.f32 %v236_v4, %v235_v1  ;;  %v288_v9 = vadd.f32 %v287_v6, %v286_v62  ;;  %401 = vst.msk [vmem:[%s727_s2 + $0x38] sm:$0xf] %vm386_vm1, %v461_v7  ;;  %v291_v19 = vsel %vm224_vm2, %v269_v5, 0.0  ;;  %v460_v16 = vpack.c.bf16 %v212_v56, %v212_v56 }
  0xf5   :  { %399 = vst.msk [vmem:[%s727_s2 + $0x30] sm:$0xf] %vm386_vm1, %v459_v14  ;;  %402 = vst.msk [vmem:[%s727_s2 + $0x3c] sm:$0xf] %vm386_vm1, %v462_v18  ;;  %v244_v30 = vsel %vm224_vm2, %v583_v13, 0.0  ;;  %v295_v32 = vsel %vm224_vm2, %v271_v22, 0.0  ;;  %v274_v33 = vmul.f32 %v209_v47, %v209_v47  ;;  %v275_v42 = vmul.f32 %v212_v56, %v212_v56 }
  0xf6   :  { %v290_v15 = vadd.f32 %v289_v10, %v288_v9  ;;  %v239_v17 = vadd.f32 %v238_v11, %v237_v8  ;;  %400 = vst.msk [vmem:[%s727_s2 + $0x34] sm:$0xf] %vm386_vm1, %v460_v16  ;;  %v297_v24 = vsel %vm224_vm2, %v272_v26, 0.0  ;;  %v246_v36 = vsel %vm224_vm2, %v587_v20, 0.0 }
  0xf7   :  { %v248_v37 = vsel %vm224_vm2, %v209_v47, 0.0  ;;  %v299_v40 = vsel %vm224_vm2, %v273_v31, 0.0  ;;  %v301_v13 = vsel %vm224_vm2, %v274_v33, 0.0  ;;  %v276_v45 = vmul.f32 %v627_v41, %v627_v41 }
  0xf8   :  { %v241_v23 = vadd.f32 %v240_v12, %v239_v17  ;;  %v292_v25 = vadd.f32 %v291_v19, %v290_v15  ;;  %v250_v46 = vsel %vm224_vm2, %v212_v56, 0.0  ;;  %v252_v20 = vsel %vm224_vm2, %v627_v41, 0.0 }
  0xf9   :  { %v277_v47 = vmul.f32 %v636_v53, %v636_v53  ;;  %v303_v50 = vsel %vm224_vm2, %v275_v42, 0.0  ;;  %v305_v54 = vsel %vm224_vm2, %v276_v45, 0.0  ;;  %v254_v55 = vsel %vm224_vm2, %v636_v53, 0.0 }
  0xfa   :  { %v294_v28 = vadd.f32 %v293_v21, %v292_v25  ;;  %v243_v29 = vadd.f32 %v242_v27, %v241_v23  ;;  %v315_v62 = vlaneseq }
  0xfb   :  { %v307_v56 = vsel %vm224_vm2, %v277_v47, 0.0 }
  0xfc   :  { %v245_v34 = vadd.f32 %v244_v30, %v243_v29  ;;  %v296_v35 = vadd.f32 %v295_v32, %v294_v28  ;;  %v316_v3 = vshrl.u32 %v315_v62, 7 }
  0xfe   :  { %v298_v38 = vadd.f32 %v297_v24, %v296_v35  ;;  %v247_v39 = vadd.f32 %v246_v36, %v245_v34  ;;  %vm318_vm3 = vcmp.eq.s32.totalorder %v316_v3, 1  ;;  %vm317_vm4 = vcmp.eq.s32.totalorder %v316_v3, 0 }
 0x100   :  { %v249_v43 = vadd.f32 %v248_v37, %v247_v39  ;;  %v300_v44 = vadd.f32 %v299_v40, %v298_v38 }
 0x102   :  { %v302_v48 = vadd.f32 %v301_v13, %v300_v44  ;;  %v251_v49 = vadd.f32 %v250_v46, %v249_v43 }
 0x104   :  { %v253_v51 = vadd.f32 %v252_v20, %v251_v49  ;;  %v304_v52 = vadd.f32 %v303_v50, %v302_v48 }
 0x106   :  { %v255_v57 = vadd.f32 %v254_v55, %v253_v51  ;;  %v306_v58 = vadd.f32 %v305_v54, %v304_v52 }
 0x108   :  { %v256_v59 = vrot.slane %v255_v57, 4  ;;  %v308_v60 = vadd.f32 %v307_v56, %v306_v58 }
 0x10a   :  { %v257_v61 = vadd.f32 %v256_v59, %v255_v57  ;;  %v309_v41 = vrot.slane %v308_v60, 4 }
 0x10c   :  { %v258_v63 = vrot.slane %v257_v61, 2  ;;  %v310_v0 = vadd.f32 %v309_v41, %v308_v60 }
 0x10e   :  { %v259_v1 = vadd.f32 %v258_v63, %v257_v61  ;;  %v311_v2 = vrot.slane %v310_v0, 2 }
 0x110   :  { %v312_v4 = vadd.f32 %v311_v2, %v310_v0  ;;  %v260_v5 = vrot.slane %v259_v1, 1 }
 0x112   :  { %v313_v6 = vrot.slane %v312_v4, 1  ;;  %v261_v53 = vadd.f32 %v260_v5, %v259_v1 }
 0x114   :  { %v314_v7 = vadd.f32 %v313_v6, %v312_v4 }
 0x116   :  { %v319_v8 = vsel %vm318_vm3, %v314_v7, 0.0 }
 0x117   :  { %v320_v9 = vsel %vm317_vm4, %v261_v53, %v319_v8 }
 0x118   :  { %321 = vst.msk [vmem:[%s728_s3] sm:$0xff] %vm224_vm2, %v320_v9 }

// kernel: pallas_forward.46
= control target key start
LH: loop header
LB: loop body
LE: loop exit
PB: predicated region body
PF: predicated region fallthrough
CT: control target
= control target key end

     0   :  { %vm172_vm0 = vcmask 257024   ;;  %s416_s0 = inlined_call_operand.vmem [shape: bf16[128,32], index: 0, kind: input, shape index: {}]   ;;  %s417_s1 = inlined_call_operand.vmem [shape: f32[1,32], index: 1, kind: input, shape index: {}]   ;;  %s418_s2 = inlined_call_operand.vmem [shape: f32[1,32], index: 2, kind: input, shape index: {}]   ;;  %s419_s3 = inlined_call_operand.vmem [shape: bf16[128,32], index: 3, kind: output, shape index: {}]  }
   0x1   :  { %v228_v0 = vld [vmem:[%s416_s0] sm:$0xff]   ;;  %v259_v4 = vld [vmem:[%s416_s0 + $0x8] sm:$0xff]   ;;  %v260_v5 = vld [vmem:[%s416_s0 + $0x10] sm:$0xff]  }
   0x2   :  { %v292_v1 = vld [vmem:[%s417_s1] ss:$0 sm:$0xff]  ;;  %v229_v2 = vunpack.c.l.bf16 %v228_v0  ;;  %v230_v3 = vunpack.c.h.bf16 %v228_v0  ;;  %v261_v6 = vld [vmem:[%s416_s0 + $0x18] sm:$0xff]   ;;  %v233_v8 = vunpack.c.l.bf16 %v259_v4  ;;  %v234_v9 = vunpack.c.h.bf16 %v259_v4  ;;  %v263_v41 = vld [vmem:[%s416_s0 + $0x28] sm:$0xff]  }
   0x3   :  { %v306_v7 = vld [vmem:[%s418_s2] ss:$0 sm:$0xff]  ;;  %v237_v10 = vunpack.c.l.bf16 %v260_v5  ;;  %v238_v11 = vunpack.c.h.bf16 %v260_v5  ;;  %v241_v14 = vunpack.c.l.bf16 %v261_v6  ;;  %v242_v15 = vunpack.c.h.bf16 %v261_v6  ;;  %v264_v42 = vld [vmem:[%s416_s0 + $0x30] sm:$0xff]   ;;  %v265_v47 = vld [vmem:[%s416_s0 + $0x38] sm:$0xff]  }
   0x4   :  { %v53_v12 = vmul.f32 %v229_v2, %v292_v1  ;;  %v54_v13 = vmul.f32 %v230_v3, %v292_v1  ;;  %v55_v16 = vmul.f32 %v233_v8, %v292_v1  ;;  %v56_v17 = vmul.f32 %v234_v9, %v292_v1  ;;  %v262_v36 = vld [vmem:[%s416_s0 + $0x20] sm:$0xff]  }
   0x5   :  { %v57_v18 = vmul.f32 %v237_v10, %v292_v1  ;;  %v58_v19 = vmul.f32 %v238_v11, %v292_v1  ;;  %v59_v22 = vmul.f32 %v241_v14, %v292_v1  ;;  %v60_v23 = vmul.f32 %v242_v15, %v292_v1 }
   0x6   :  { %v76_v20 = vadd.f32 %v306_v7, %v53_v12  ;;  %v77_v21 = vadd.f32 %v306_v7, %v54_v13  ;;  %v78_v24 = vadd.f32 %v306_v7, %v55_v16  ;;  %v79_v25 = vadd.f32 %v306_v7, %v56_v17 }
   0x7   :  { %v80_v26 = vadd.f32 %v306_v7, %v57_v18  ;;  %v81_v27 = vadd.f32 %v306_v7, %v58_v19  ;;  %v82_v30 = vadd.f32 %v306_v7, %v59_v22  ;;  %v83_v31 = vadd.f32 %v306_v7, %v60_v23 }
   0x8   :  { %v92_v28 = vmax.f32 %v76_v20, 0.0  ;;  %v93_v29 = vmax.f32 %v77_v21, 0.0  ;;  %v94_v32 = vmax.f32 %v78_v24, 0.0  ;;  %v95_v33 = vmax.f32 %v79_v25, 0.0 }
   0x9   :  { %v96_v34 = vmax.f32 %v80_v26, 0.0  ;;  %v97_v35 = vmax.f32 %v81_v27, 0.0  ;;  %v98_v39 = vmax.f32 %v82_v30, 0.0  ;;  %v99_v40 = vmax.f32 %v83_v31, 0.0 }
   0xa   :  { %v211_v37 = vpack.c.bf16 %v92_v28, %v92_v28  ;;  %v212_v38 = vpack.c.bf16 %v93_v29, %v93_v29  ;;  %v213_v43 = vpack.c.bf16 %v94_v32, %v94_v32  ;;  %v214_v44 = vpack.c.bf16 %v95_v33, %v95_v33 }
   0xb   :  { %v215_v45 = vpack.c.bf16 %v96_v34, %v96_v34  ;;  %v216_v46 = vpack.c.bf16 %v97_v35, %v97_v35  ;;  %v217_v48 = vpack.c.bf16 %v98_v39, %v98_v39  ;;  %v218_v49 = vpack.c.bf16 %v99_v40, %v99_v40 }
   0xc   :  { %173 = vst.msk [vmem:[%s419_s3] sm:$0xf] %vm172_vm0, %v211_v37  ;;  %174 = vst.msk [vmem:[%s419_s3 + $0x4] sm:$0xf] %vm172_vm0, %v212_v38  ;;  %v245_v50 = vunpack.c.l.bf16 %v262_v36  ;;  %v246_v51 = vunpack.c.h.bf16 %v262_v36  ;;  %v249_v52 = vunpack.c.l.bf16 %v263_v41  ;;  %v250_v53 = vunpack.c.h.bf16 %v263_v41 }
   0xd   :  { %175 = vst.msk [vmem:[%s419_s3 + $0x8] sm:$0xf] %vm172_vm0, %v213_v43  ;;  %176 = vst.msk [vmem:[%s419_s3 + $0xc] sm:$0xf] %vm172_vm0, %v214_v44  ;;  %v253_v54 = vunpack.c.l.bf16 %v264_v42  ;;  %v254_v55 = vunpack.c.h.bf16 %v264_v42  ;;  %v257_v58 = vunpack.c.l.bf16 %v265_v47  ;;  %v258_v59 = vunpack.c.h.bf16 %v265_v47 }
   0xe   :  { %177 = vst.msk [vmem:[%s419_s3 + $0x10] sm:$0xf] %vm172_vm0, %v215_v45  ;;  %178 = vst.msk [vmem:[%s419_s3 + $0x14] sm:$0xf] %vm172_vm0, %v216_v46  ;;  %v61_v56 = vmul.f32 %v245_v50, %v292_v1  ;;  %v62_v57 = vmul.f32 %v246_v51, %v292_v1  ;;  %v63_v60 = vmul.f32 %v249_v52, %v292_v1 }
   0xf   :  { %179 = vst.msk [vmem:[%s419_s3 + $0x18] sm:$0xf] %vm172_vm0, %v217_v48  ;;  %180 = vst.msk [vmem:[%s419_s3 + $0x1c] sm:$0xf] %vm172_vm0, %v218_v49  ;;  %v64_v61 = vmul.f32 %v250_v53, %v292_v1  ;;  %v65_v62 = vmul.f32 %v253_v54, %v292_v1  ;;  %v66_v63 = vmul.f32 %v254_v55, %v292_v1 }
  0x10   :  { %v84_v0 = vadd.f32 %v306_v7, %v61_v56  ;;  %v85_v2 = vadd.f32 %v306_v7, %v62_v57  ;;  %v67_v3 = vmul.f32 %v257_v58, %v292_v1  ;;  %v68_v4 = vmul.f32 %v258_v59, %v292_v1 }
  0x11   :  { %v86_v5 = vadd.f32 %v306_v7, %v63_v60  ;;  %v87_v6 = vadd.f32 %v306_v7, %v64_v61  ;;  %v88_v8 = vadd.f32 %v306_v7, %v65_v62  ;;  %v89_v9 = vadd.f32 %v306_v7, %v66_v63 }
  0x12   :  { %v100_v10 = vmax.f32 %v84_v0, 0.0  ;;  %v101_v11 = vmax.f32 %v85_v2, 0.0  ;;  %v90_v12 = vadd.f32 %v306_v7, %v67_v3  ;;  %v91_v13 = vadd.f32 %v306_v7, %v68_v4 }
  0x13   :  { %v102_v14 = vmax.f32 %v86_v5, 0.0  ;;  %v103_v15 = vmax.f32 %v87_v6, 0.0  ;;  %v104_v16 = vmax.f32 %v88_v8, 0.0  ;;  %v105_v17 = vmax.f32 %v89_v9, 0.0 }
  0x14   :  { %v219_v18 = vpack.c.bf16 %v100_v10, %v100_v10  ;;  %v220_v1 = vpack.c.bf16 %v101_v11, %v101_v11  ;;  %v106_v19 = vmax.f32 %v90_v12, 0.0  ;;  %v107_v20 = vmax.f32 %v91_v13, 0.0 }
  0x15   :  { %v221_v21 = vpack.c.bf16 %v102_v14, %v102_v14  ;;  %v222_v22 = vpack.c.bf16 %v103_v15, %v103_v15  ;;  %v223_v23 = vpack.c.bf16 %v104_v16, %v104_v16  ;;  %v224_v24 = vpack.c.bf16 %v105_v17, %v105_v17 }
  0x16   :  { %181 = vst.msk [vmem:[%s419_s3 + $0x20] sm:$0xf] %vm172_vm0, %v219_v18  ;;  %182 = vst.msk [vmem:[%s419_s3 + $0x24] sm:$0xf] %vm172_vm0, %v220_v1  ;;  %v225_v7 = vpack.c.bf16 %v106_v19, %v106_v19  ;;  %v226_v25 = vpack.c.bf16 %v107_v20, %v107_v20 }
  0x17   :  { %183 = vst.msk [vmem:[%s419_s3 + $0x28] sm:$0xf] %vm172_vm0, %v221_v21  ;;  %184 = vst.msk [vmem:[%s419_s3 + $0x2c] sm:$0xf] %vm172_vm0, %v222_v22 }
  0x18   :  { %185 = vst.msk [vmem:[%s419_s3 + $0x30] sm:$0xf] %vm172_vm0, %v223_v23  ;;  %186 = vst.msk [vmem:[%s419_s3 + $0x34] sm:$0xf] %vm172_vm0, %v224_v24 }
  0x19   :  { %187 = vst.msk [vmem:[%s419_s3 + $0x38] sm:$0xf] %vm172_vm0, %v225_v7  ;;  %188 = vst.msk [vmem:[%s419_s3 + $0x3c] sm:$0xf] %vm172_vm0, %v226_v25 }

// kernel: pallas_forward.47
= control target key start
LH: loop header
LB: loop body
LE: loop exit
PB: predicated region body
PF: predicated region fallthrough
CT: control target
= control target key end

     0   :  { %v1099_v1 = vmov 0   ;;  %vm624_vm0 = vcmask 64512   ;;  %vm628_vm1 = vcmask 1043456   ;;  %s1441_s1 = inlined_call_operand.vmem [shape: bf16[392,512], index: 1, kind: input, shape index: {}]   ;;  %s1442_s0 = inlined_call_operand.vmem [shape: bf16[8,392], index: 0, kind: input, shape index: {}]   ;;  %s1443_s2 = inlined_call_operand.vmem [shape: f32[8,1], index: 2, kind: input, shape index: {}]   ;;  %s1444_s3 = inlined_call_operand.vmem [shape: f32[8,512], index: 3, kind: output, shape index: {}]  }
   0x1   :  { %v939_v0 = vld [vmem:[%s1441_s1 + $0x4] ss:$16 sps:$4 sm:$0xff]   ;;  %938 = vset.pattern.permute.xlu0 %v1099_v1  ;;  %v941_v2 = vld [vmem:[%s1441_s1 + $0xc] ss:$16 sps:$4 sm:$0xff]   ;;  %v943_v3 = vld [vmem:[%s1441_s1] ss:$16 sps:$4 sm:$0xff]  }
   0x2   :  { %641 = vmatprep.subr.bf16.mxu0 %v939_v0  ;;  %v944_v4 = vld [vmem:[%s1441_s1 + $0x8] ss:$16 sps:$4 sm:$0xff]   ;;  %723 = vmatprep.subr.bf16.mxu1 %v941_v2  ;;  %v945_v5 = vld [vmem:[%s1441_s1 + $0x24] ss:$16 sps:$4 sm:$0xff]   ;;  %v947_v6 = vld [vmem:[%s1441_s1 + $0x2c] ss:$16 sps:$4 sm:$0xff]  }
   0x3   :  { %642 = vmatpush1.bf16.msra.mxu0 %v943_v3  ;;  %724 = vmatpush1.bf16.msra.mxu1 %v944_v4  ;;  %v949_v7 = vld [vmem:[%s1441_s1 + $0x20] ss:$16 sps:$4 sm:$0xff]   ;;  %v950_v8 = vld [vmem:[%s1441_s1 + $0x28] ss:$16 sps:$4 sm:$0xff]   ;;  %v951_v9 = vld [vmem:[%s1441_s1 + $0x44] ss:$16 sps:$4 sm:$0xff]  }
   0x4   :  { %643 = vmatprep.subr.bf16.mxu0 %v945_v5  ;;  %725 = vmatprep.subr.bf16.mxu1 %v947_v6  ;;  %v953_v10 = vld [vmem:[%s1441_s1 + $0x4c] ss:$16 sps:$4 sm:$0xff]   ;;  %v955_v11 = vld [vmem:[%s1441_s1 + $0x40] ss:$16 sps:$4 sm:$0xff]   ;;  %v956_v12 = vld [vmem:[%s1441_s1 + $0x48] ss:$16 sps:$4 sm:$0xff]  }
   0x5   :  { %v957_v13 = vld [vmem:[%s1441_s1 + $0x64] ss:$16 sps:$4 sm:$0xff]   ;;  %v959_v14 = vld [vmem:[%s1441_s1 + $0x6c] ss:$16 sps:$4 sm:$0xff]   ;;  %v961_v15 = vld [vmem:[%s1441_s1 + $0x60] ss:$16 sps:$4 sm:$0xff]  }
   0x6   :  { %v962_v16 = vld [vmem:[%s1441_s1 + $0x68] ss:$16 sps:$4 sm:$0xff]   ;;  %v963_v17 = vld [vmem:[%s1441_s1 + $0x84] ss:$16 sps:$4 sm:$0xff]   ;;  %v965_v18 = vld [vmem:[%s1441_s1 + $0x8c] ss:$16 sps:$4 sm:$0xff]  }
   0x7   :  { %644 = vmatpush1.bf16.msra.mxu0 %v949_v7  ;;  %726 = vmatpush1.bf16.msra.mxu1 %v950_v8  ;;  %v967_v19 = vld [vmem:[%s1441_s1 + $0x80] ss:$16 sps:$4 sm:$0xff]   ;;  %v968_v20 = vld [vmem:[%s1441_s1 + $0x88] ss:$16 sps:$4 sm:$0xff]   ;;  %v969_v21 = vld [vmem:[%s1441_s1 + $0xa4] ss:$16 sps:$4 sm:$0xff]  }
   0x8   :  { %645 = vmatprep.subr.bf16.mxu0 %v951_v9  ;;  %727 = vmatprep.subr.bf16.mxu1 %v953_v10  ;;  %v971_v22 = vld [vmem:[%s1441_s1 + $0xac] ss:$16 sps:$4 sm:$0xff]   ;;  %v973_v23 = vld [vmem:[%s1441_s1 + $0xa0] ss:$16 sps:$4 sm:$0xff]   ;;  %v974_v24 = vld [vmem:[%s1441_s1 + $0xa8] ss:$16 sps:$4 sm:$0xff]  }
   0x9   :  { %v975_v25 = vld [vmem:[%s1441_s1 + $0xc4] ss:$16 sps:$4 sm:$0xff]   ;;  %v977_v26 = vld [vmem:[%s1441_s1 + $0xcc] ss:$16 sps:$4 sm:$0xff]   ;;  %v979_v27 = vld [vmem:[%s1441_s1 + $0xc0] ss:$16 sps:$4 sm:$0xff]  }
   0xa   :  { %v980_v28 = vld [vmem:[%s1441_s1 + $0xc8] ss:$16 sps:$4 sm:$0xff]   ;;  %v981_v29 = vld [vmem:[%s1441_s1 + $0xe4] ss:$16 sps:$4 sm:$0xff]   ;;  %v983_v30 = vld [vmem:[%s1441_s1 + $0xec] ss:$16 sps:$4 sm:$0xff]  }
   0xb   :  { %646 = vmatpush1.bf16.msra.mxu0 %v955_v11  ;;  %728 = vmatpush1.bf16.msra.mxu1 %v956_v12  ;;  %v985_v31 = vld [vmem:[%s1441_s1 + $0xe0] ss:$16 sps:$4 sm:$0xff]   ;;  %v986_v32 = vld [vmem:[%s1441_s1 + $0xe8] ss:$16 sps:$4 sm:$0xff]   ;;  %v987_v33 = vld [vmem:[%s1441_s1 + $0x104] ss:$16 sps:$4 sm:$0xff]  }
   0xc   :  { %647 = vmatprep.subr.bf16.mxu0 %v957_v13  ;;  %729 = vmatprep.subr.bf16.mxu1 %v959_v14  ;;  %v989_v34 = vld [vmem:[%s1441_s1 + $0x10c] ss:$16 sps:$4 sm:$0xff]   ;;  %v991_v35 = vld [vmem:[%s1441_s1 + $0x100] ss:$16 sps:$4 sm:$0xff]   ;;  %v992_v36 = vld [vmem:[%s1441_s1 + $0x108] ss:$16 sps:$4 sm:$0xff]  }
   0xd   :  { %v993_v37 = vld [vmem:[%s1441_s1 + $0x124] ss:$16 sps:$4 sm:$0xff]   ;;  %v995_v38 = vld [vmem:[%s1441_s1 + $0x12c] ss:$16 sps:$4 sm:$0xff]   ;;  %v997_v39 = vld [vmem:[%s1441_s1 + $0x120] ss:$16 sps:$4 sm:$0xff]  }
   0xe   :  { %v998_v40 = vld [vmem:[%s1441_s1 + $0x128] ss:$16 sps:$4 sm:$0xff]   ;;  %v999_v41 = vld [vmem:[%s1441_s1 + $0x144] ss:$16 sps:$4 sm:$0xff]   ;;  %v1001_v42 = vld [vmem:[%s1441_s1 + $0x14c] ss:$16 sps:$4 sm:$0xff]  }
   0xf   :  { %648 = vmatpush1.bf16.msra.mxu0 %v961_v15  ;;  %730 = vmatpush1.bf16.msra.mxu1 %v962_v16  ;;  %v1003_v43 = vld [vmem:[%s1441_s1 + $0x140] ss:$16 sps:$4 sm:$0xff]   ;;  %v1004_v44 = vld [vmem:[%s1441_s1 + $0x148] ss:$16 sps:$4 sm:$0xff]   ;;  %v1005_v45 = vld [vmem:[%s1441_s1 + $0x164] ss:$16 sps:$4 sm:$0xff]  }
  0x10   :  { %649 = vmatprep.subr.bf16.mxu0 %v963_v17  ;;  %731 = vmatprep.subr.bf16.mxu1 %v965_v18  ;;  %v1007_v46 = vld [vmem:[%s1441_s1 + $0x16c] ss:$16 sps:$4 sm:$0xff]   ;;  %v15_v47 = vld [vmem:[%s1442_s0] sm:$0xff]  ;;  %v1010_v50 = vld [vmem:[%s1441_s1 + $0x168] ss:$16 sps:$4 sm:$0xff]  }
  0x11   :  { %v818_v48 = vcombine.high %v15_v47, %v15_v47  ;;  %v1009_v49 = vld [vmem:[%s1441_s1 + $0x160] ss:$16 sps:$4 sm:$0xff]   ;;  %v1011_v51 = vld [vmem:[%s1441_s1 + $0x184] ss:$16 sps:$4 sm:$0xff]   ;;  %v1013_v52 = vld [vmem:[%s1441_s1 + $0x18c] ss:$16 sps:$4 sm:$0xff]   ;;  %v817_v6 = vcombine.low %v15_v47, %v15_v47 }
  0x12   :  { %v1015_v53 = vld [vmem:[%s1441_s1 + $0x180] ss:$16 sps:$4 sm:$0xff]   ;;  %v1016_v54 = vld [vmem:[%s1441_s1 + $0x188] ss:$16 sps:$4 sm:$0xff]   ;;  %v1017_v55 = vld [vmem:[%s1441_s1 + $0x1a4] ss:$16 sps:$4 sm:$0xff]  }
  0x13   :  { %650 = vmatpush1.bf16.msra.mxu0 %v967_v19  ;;  %732 = vmatpush1.bf16.msra.mxu1 %v968_v20  ;;  %v1019_v56 = vld [vmem:[%s1441_s1 + $0x1ac] ss:$16 sps:$4 sm:$0xff]   ;;  %v1021_v57 = vld [vmem:[%s1441_s1 + $0x1a0] ss:$16 sps:$4 sm:$0xff]   ;;  %v1022_v58 = vld [vmem:[%s1441_s1 + $0x1a8] ss:$16 sps:$4 sm:$0xff]  }
  0x14   :  { %651 = vmatprep.subr.bf16.mxu0 %v969_v21  ;;  %733 = vmatprep.subr.bf16.mxu1 %v971_v22  ;;  %v1023_v59 = vld [vmem:[%s1441_s1 + $0x1c4] ss:$16 sps:$4 sm:$0xff]   ;;  %v1025_v60 = vld [vmem:[%s1441_s1 + $0x1cc] ss:$16 sps:$4 sm:$0xff]   ;;  %v1027_v61 = vld [vmem:[%s1441_s1 + $0x1c0] ss:$16 sps:$4 sm:$0xff]  }
  0x15   :  { %673 = vmatprep.mubr.bf16.mxu0 %v818_v48  ;;  %755 = vmatprep.mubr.bf16.mxu1 %v818_v48  ;;  %v1028_v62 = vld [vmem:[%s1441_s1 + $0x1c8] ss:$16 sps:$4 sm:$0xff]   ;;  %v1029_v63 = vld [vmem:[%s1441_s1 + $0x1e4] ss:$16 sps:$4 sm:$0xff]   ;;  %v1031_v0 = vld [vmem:[%s1441_s1 + $0x1ec] ss:$16 sps:$4 sm:$0xff]  }
  0x16   :  { %v1033_v1 = vld [vmem:[%s1441_s1 + $0x1e0] ss:$16 sps:$4 sm:$0xff]   ;;  %v1034_v2 = vld [vmem:[%s1441_s1 + $0x1e8] ss:$16 sps:$4 sm:$0xff]   ;;  %v1041_v3 = vld [vmem:[%s1441_s1 + $0x204] ss:$16 sps:$4 sm:$0xff]  }
  0x17   :  { %652 = vmatpush1.bf16.msra.mxu0 %v973_v23  ;;  %734 = vmatpush1.bf16.msra.mxu1 %v974_v24  ;;  %v1044_v4 = vld [vmem:[%s1441_s1 + $0x20c] ss:$16 sps:$4 sm:$0xff]   ;;  %v1039_v7 = vld [vmem:[%s1441_s1 + $0x200] ss:$16 sps:$4 sm:$0xff]   ;;  %v1042_v8 = vld [vmem:[%s1441_s1 + $0x208] ss:$16 sps:$4 sm:$0xff]  }
  0x18   :  { %653 = vmatprep.subr.bf16.mxu0 %v975_v25  ;;  %735 = vmatprep.subr.bf16.mxu1 %v977_v26  ;;  %v1324_v5 = vld [vmem:[%s1442_s0 + $0x8] sm:$0xff]  ;;  %v1047_v9 = vld [vmem:[%s1441_s1 + $0x224] ss:$16 sps:$4 sm:$0xff]   ;;  %v1045_v13 = vld [vmem:[%s1441_s1 + $0x220] ss:$16 sps:$4 sm:$0xff]  }
  0x19   :  { %v1050_v10 = vld [vmem:[%s1441_s1 + $0x22c] ss:$16 sps:$4 sm:$0xff]   ;;  %v115_v11 = vld [vmem:[%s1443_s2] sm:$0xff]  ;;  %v820_v12 = vcombine.high %v1324_v5, %v1324_v5  ;;  %v1048_v14 = vld [vmem:[%s1441_s1 + $0x228] ss:$16 sps:$4 sm:$0xff]   ;;  %v819_v47 = vcombine.low %v1324_v5, %v1324_v5 }
  0x1a   :  { %118 = vperm.xlu0 %938, %v115_v11   ;;  %v1053_v15 = vld [vmem:[%s1441_s1 + $0x244] ss:$16 sps:$4 sm:$0xff]   ;;  %v1056_v16 = vld [vmem:[%s1441_s1 + $0x24c] ss:$16 sps:$4 sm:$0xff]   ;;  %v1051_v17 = vld [vmem:[%s1441_s1 + $0x240] ss:$16 sps:$4 sm:$0xff]  }
  0x1b   :  { %654 = vmatpush1.bf16.msra.mxu0 %v979_v27  ;;  %736 = vmatpush1.bf16.msra.mxu1 %v980_v28  ;;  %v1054_v18 = vld [vmem:[%s1441_s1 + $0x248] ss:$16 sps:$4 sm:$0xff]   ;;  %v1059_v19 = vld [vmem:[%s1441_s1 + $0x264] ss:$16 sps:$4 sm:$0xff]   ;;  %v1062_v20 = vld [vmem:[%s1441_s1 + $0x26c] ss:$16 sps:$4 sm:$0xff]  }
  0x1c   :  { %655 = vmatprep.subr.bf16.mxu0 %v981_v29  ;;  %737 = vmatprep.subr.bf16.mxu1 %v983_v30  ;;  %v1057_v21 = vld [vmem:[%s1441_s1 + $0x260] ss:$16 sps:$4 sm:$0xff]   ;;  %v1060_v22 = vld [vmem:[%s1441_s1 + $0x268] ss:$16 sps:$4 sm:$0xff]   ;;  %v1065_v23 = vld [vmem:[%s1441_s1 + $0x284] ss:$16 sps:$4 sm:$0xff]  }
  0x1d   :  { %v1068_v24 = vld [vmem:[%s1441_s1 + $0x28c] ss:$16 sps:$4 sm:$0xff]   ;;  %v1063_v25 = vld [vmem:[%s1441_s1 + $0x280] ss:$16 sps:$4 sm:$0xff]   ;;  %v1066_v26 = vld [vmem:[%s1441_s1 + $0x288] ss:$16 sps:$4 sm:$0xff]  }
  0x1e   :  { %v1071_v27 = vld [vmem:[%s1441_s1 + $0x2a4] ss:$16 sps:$4 sm:$0xff]   ;;  %v1074_v28 = vld [vmem:[%s1441_s1 + $0x2ac] ss:$16 sps:$4 sm:$0xff]   ;;  %v1069_v29 = vld [vmem:[%s1441_s1 + $0x2a0] ss:$16 sps:$4 sm:$0xff]  }
  0x1f   :  { %656 = vmatpush1.bf16.msra.mxu0 %v985_v31  ;;  %738 = vmatpush1.bf16.msra.mxu1 %v986_v32  ;;  %v1072_v30 = vld [vmem:[%s1441_s1 + $0x2a8] ss:$16 sps:$4 sm:$0xff]   ;;  %v1077_v31 = vld [vmem:[%s1441_s1 + $0x2c4] ss:$16 sps:$4 sm:$0xff]   ;;  %v1080_v32 = vld [vmem:[%s1441_s1 + $0x2cc] ss:$16 sps:$4 sm:$0xff]  }
  0x20   :  { %657 = vmatprep.subr.bf16.mxu0 %v987_v33  ;;  %739 = vmatprep.subr.bf16.mxu1 %v989_v34  ;;  %v1075_v33 = vld [vmem:[%s1441_s1 + $0x2c0] ss:$16 sps:$4 sm:$0xff]   ;;  %v1078_v34 = vld [vmem:[%s1441_s1 + $0x2c8] ss:$16 sps:$4 sm:$0xff]  }
  0x23   :  { %658 = vmatpush1.bf16.msra.mxu0 %v991_v35  ;;  %740 = vmatpush1.bf16.msra.mxu1 %v992_v36  ;;  %v1083_v35 = vld [vmem:[%s1441_s1 + $0x2e4] ss:$16 sps:$4 sm:$0xff]   ;;  %v1086_v36 = vld [vmem:[%s1441_s1 + $0x2ec] ss:$16 sps:$4 sm:$0xff]  }
  0x24   :  { %659 = vmatprep.subr.bf16.mxu0 %v993_v37  ;;  %741 = vmatprep.subr.bf16.mxu1 %v995_v38  ;;  %v113_v37 = vld [vmem:[%s1441_s1 + $0x300] sm:$0xff]  ;;  %v114_v38 = vld [vmem:[%s1441_s1 + $0x308] sm:$0xff] }
  0x27   :  { %660 = vmatpush1.bf16.msra.mxu0 %v997_v39  ;;  %742 = vmatpush1.bf16.msra.mxu1 %v998_v40  ;;  %v1081_v39 = vld [vmem:[%s1441_s1 + $0x2e0] ss:$16 sps:$4 sm:$0xff]   ;;  %v1084_v40 = vld [vmem:[%s1441_s1 + $0x2e8] ss:$16 sps:$4 sm:$0xff]  }
  0x28   :  { %661 = vmatprep.subr.bf16.mxu0 %v999_v41  ;;  %743 = vmatprep.subr.bf16.mxu1 %v1001_v42  ;;  %v918_v41 = vcombine.high %v113_v37, %v113_v37  ;;  %v920_v42 = vcombine.high %v114_v38, %v114_v38 }
  0x2b   :  { %662 = vmatpush1.bf16.msra.mxu0 %v1003_v43  ;;  %744 = vmatpush1.bf16.msra.mxu1 %v1004_v44  ;;  %v917_v43 = vcombine.low %v113_v37, %v113_v37  ;;  %v919_v44 = vcombine.low %v114_v38, %v114_v38 }
  0x2c   :  { %663 = vmatprep.subr.bf16.mxu0 %v1005_v45  ;;  %745 = vmatprep.subr.bf16.mxu1 %v1007_v46 }
  0x2d   :  { %v630_v45 = vsel %vm628_vm1, %v917_v43, 0  ;;  %v636_v46 = vsel %vm628_vm1, %v919_v44, 0 }
  0x2f   :  { %664 = vmatpush1.bf16.msra.mxu0 %v1009_v49  ;;  %746 = vmatpush1.bf16.msra.mxu1 %v1010_v50 }
  0x30   :  { %665 = vmatprep.subr.bf16.mxu0 %v1011_v51  ;;  %747 = vmatprep.subr.bf16.mxu1 %v1013_v52 }
  0x33   :  { %666 = vmatpush1.bf16.msra.mxu0 %v1015_v53  ;;  %748 = vmatpush1.bf16.msra.mxu1 %v1016_v54 }
  0x34   :  { %667 = vmatprep.subr.bf16.mxu0 %v1017_v55  ;;  %749 = vmatprep.subr.bf16.mxu1 %v1019_v56 }
  0x37   :  { %668 = vmatpush1.bf16.msra.mxu0 %v1021_v57  ;;  %750 = vmatpush1.bf16.msra.mxu1 %v1022_v58 }
  0x38   :  { %669 = vmatprep.subr.bf16.mxu0 %v1023_v59  ;;  %751 = vmatprep.subr.bf16.mxu1 %v1025_v60 }
  0x3b   :  { %670 = vmatpush1.bf16.msra.mxu0 %v1027_v61  ;;  %752 = vmatpush1.bf16.msra.mxu1 %v1028_v62 }
  0x3c   :  { %671 = vmatprep.subr.bf16.mxu0 %v1029_v63  ;;  %753 = vmatprep.subr.bf16.mxu1 %v1031_v0 }
  0x3f   :  { %672 = vmatpush1.bf16.msra.mxu0 %v1033_v1  ;;  %754 = vmatpush1.bf16.msra.mxu1 %v1034_v2 }
  0x40   :  { %682 = vmatprep.subr.bf16.mxu0 %v1041_v3  ;;  %764 = vmatprep.subr.bf16.mxu1 %v1044_v4 }
  0x42   :  { %674 = vmatmul.mubr.bf16.vlgmr.msra.gmra.mrb[0].mxu0 %v817_v6  ;;  %756 = vmatmul.mubr.bf16.vlgmr.msra.gmra.mrb[0].mxu1 %v817_v6 }
  0x43   :  { %683 = vmatpush1.bf16.msra.mxu0 %v1039_v7  ;;  %765 = vmatpush1.bf16.msra.mxu1 %v1042_v8 }
  0x44   :  { %684 = vmatprep.subr.bf16.mxu0 %v1047_v9  ;;  %766 = vmatprep.subr.bf16.mxu1 %v1050_v10 }
  0x45   :  { %922 = vmatprep.mubr.msk.bf16.mxu0 %vm624_vm0, %v820_v12  ;;  %924 = vmatprep.mubr.msk.bf16.mxu1 %vm624_vm0, %v820_v12 }
  0x47   :  { %685 = vmatpush1.bf16.msra.mxu0 %v1045_v13  ;;  %767 = vmatpush1.bf16.msra.mxu1 %v1048_v14 }
  0x48   :  { %686 = vmatprep.subr.bf16.mxu0 %v1053_v15  ;;  %768 = vmatprep.subr.bf16.mxu1 %v1056_v16 }
  0x4b   :  { %687 = vmatpush1.bf16.msra.mxu0 %v1051_v17  ;;  %769 = vmatpush1.bf16.msra.mxu1 %v1054_v18 }
  0x4c   :  { %688 = vmatprep.subr.bf16.mxu0 %v1059_v19  ;;  %770 = vmatprep.subr.bf16.mxu1 %v1062_v20 }
  0x4f   :  { %689 = vmatpush1.bf16.msra.mxu0 %v1057_v21  ;;  %771 = vmatpush1.bf16.msra.mxu1 %v1060_v22 }
  0x50   :  { %690 = vmatprep.subr.bf16.mxu0 %v1065_v23  ;;  %772 = vmatprep.subr.bf16.mxu1 %v1068_v24 }
  0x53   :  { %691 = vmatpush1.bf16.msra.mxu0 %v1063_v25  ;;  %773 = vmatpush1.bf16.msra.mxu1 %v1066_v26 }
  0x54   :  { %692 = vmatprep.subr.bf16.mxu0 %v1071_v27  ;;  %774 = vmatprep.subr.bf16.mxu1 %v1074_v28 }
  0x57   :  { %693 = vmatpush1.bf16.msra.mxu0 %v1069_v29  ;;  %775 = vmatpush1.bf16.msra.mxu1 %v1072_v30 }
  0x58   :  { %694 = vmatprep.subr.bf16.mxu0 %v1077_v31  ;;  %776 = vmatprep.subr.bf16.mxu1 %v1080_v32 }
  0x5b   :  { %695 = vmatpush1.bf16.msra.mxu0 %v1075_v33  ;;  %777 = vmatpush1.bf16.msra.mxu1 %v1078_v34 }
  0x5c   :  { %696 = vmatprep.subr.bf16.mxu0 %v1083_v35  ;;  %778 = vmatprep.subr.bf16.mxu1 %v1086_v36 }
  0x5f   :  { %697 = vmatpush1.bf16.msra.mxu0 %v1081_v39  ;;  %779 = vmatpush1.bf16.msra.mxu1 %v1084_v40 }
  0x60   :  { %921 = vmatprep.subr.msk.bf16.mxu0 %vm628_vm1, %v918_v41  ;;  %923 = vmatprep.subr.msk.bf16.mxu1 %vm628_vm1, %v920_v42 }
  0x63   :  { %699 = vmatpush1.bf16.msra.mxu0 %v630_v45  ;;  %781 = vmatpush1.bf16.msra.mxu1 %v636_v46 }
  0x66   :  { %715 = vmatmul.mubr.bf16.vlgmr.msra.gmra.mrb[0].mxu0 %v819_v47  ;;  %797 = vmatmul.mubr.bf16.vlgmr.msra.gmra.mrb[0].mxu1 %v819_v47 }
  0x99   :  { %v119_v48 = vpop.permute.xlu0 %118 }
 0x139   :  { %v716_v49 = vpop.f32.mrb[0].mxu0  ;;  %v798_v50 = vpop.f32.mrb[0].mxu1 }
 0x13a   :  { %v925_v51 = vadd.f32 %v716_v49, %v119_v48  ;;  %v927_v52 = vadd.f32 %v798_v50, %v119_v48  ;;  %v718_v53 = vpop.f32.mrb[1].mxu0  ;;  %v800_v54 = vpop.f32.mrb[1].mxu1 }
 0x13b   :  { %v926_v55 = vadd.f32 %v718_v53, %v119_v48  ;;  %v928_v56 = vadd.f32 %v800_v54, %v119_v48  ;;  %v720_v57 = vpop.f32.mrb[2].mxu0  ;;  %v802_v58 = vpop.f32.mrb[2].mxu1 }
 0x13c   :  { %1091 = vtanh.f32 %v925_v51  ;;  %v721_v59 = vpop.f32.mrb[3].mxu0  ;;  %v803_v60 = vpop.f32.mrb[3].mxu1 }
 0x13d   :  { %1093 = vtanh.f32 %v927_v52 }
 0x13e   :  { %1095 = vtanh.f32 %v926_v55 }
 0x13f   :  { %1097 = vtanh.f32 %v928_v56 }
 0x146   :  { %v1092_v61 = vpop.eup %1091 }
 0x147   :  { %v1094_v62 = vpop.eup %1093  ;;  %809 = vst [vmem:[%s1444_s3] sm:$0xff] %v1092_v61 }
 0x148   :  { %v1096_v63 = vpop.eup %1095  ;;  %811 = vst [vmem:[%s1444_s3 + $0x10] sm:$0xff] %v1094_v62 }
 0x149   :  { %v1098_v0 = vpop.eup %1097  ;;  %810 = vst [vmem:[%s1444_s3 + $0x8] sm:$0xff] %v1096_v63 }
 0x14a   :  { %812 = vst [vmem:[%s1444_s3 + $0x18] sm:$0xff] %v1098_v0 }

</bundles_post_ra>
